<compile_context>
chip_gen: v5e
topology: v5e:2x2
jax: 0.10.0
libtpu: 0.0.40
codegen_flags: <defaults>
</compile_context>

<pallas_src>
import numpy as np

import jax
import jax.numpy as jnp
from jax import lax
from jax.experimental import pallas as pl
from jax.experimental.pallas import tpu as pltpu

BN_EPS = 1e-5


# --------------------------------------------------------------------------- #
# Kernel
# --------------------------------------------------------------------------- #
def _bn_relu(y, gb):
    """Training-mode BatchNorm2d (biased var, eps=1e-5) + ReLU.  y: [M, C] f32."""
    mu = jnp.mean(y, axis=0, keepdims=True)                     # [1, C]
    var = jnp.mean(jnp.square(y - mu), axis=0, keepdims=True)   # biased, stable form
    inv = lax.rsqrt(var + BN_EPS)                               # EUP
    return jnp.maximum((y - mu) * inv * gb[0:1, :] + gb[1:2, :], 0.0)


def _conv3x3(x, s_ref, w_flat, patch_ref):
    """3x3 / stride-2 / pad-1 conv of a flattened [M_in, Cin] activation.

    s_ref    : [9, M_out, M_in] bf16 0/1 tap-selection matrices (exact gather)
    w_flat   : [9*Cin, Cout] f32 weights, row index = tap*Cin + cin
    patch_ref: [M_out, 9*Cin] f32 VMEM scratch (combined-K patch buffer)
    Returns f32 [M_out, Cout].
    """
    cin = x.shape[-1]
    for t in range(9):
        sel = s_ref[t].astype(jnp.float32)       # 0/1: exact in any dtype
        patch_ref[:, t * cin:(t + 1) * cin] = jnp.dot(
            sel, x, preferred_element_type=jnp.float32)
    # One deep-K matmul per layer (K = 9*Cin = 288/576/1152).
    return jnp.dot(patch_ref[...], w_flat, preferred_element_type=jnp.float32)


def encoder_kernel(p1_ref, w1_ref, s2_ref, w2_ref, s3_ref, w3_hbm_ref,
                   s4_ref, w4_hbm_ref, gb1_ref, gb2_ref, gb3_ref, gb4_ref,
                   o_ref,
                   patch2_ref, patch3_ref, patch4_ref,
                   w3_vmem_ref, w4_vmem_ref, dma_sem):
    # Prefetch the two big weight matrices; their DMA overlaps layers 1-2.
    w3_cp = pltpu.make_async_copy(w3_hbm_ref, w3_vmem_ref, dma_sem.at[0])
    w4_cp = pltpu.make_async_copy(w4_hbm_ref, w4_vmem_ref, dma_sem.at[1])
    w3_cp.start()
    w4_cp.start()

    # Layer 1: conv as one matmul over (host-built, 14 KB) im2col patches.
    y = jnp.dot(p1_ref[...], w1_ref[...], preferred_element_type=jnp.float32)
    x = _bn_relu(y, gb1_ref[...])

    # Layer 2: fully in-kernel; activations never leave VMEM/vregs.
    y = _conv3x3(x, s2_ref, w2_ref[...], patch2_ref)
    x = _bn_relu(y, gb2_ref[...])

    # Layer 3 (manually prefetched weights).
    w3_cp.wait()
    y = _conv3x3(x, s3_ref, w3_vmem_ref[...], patch3_ref)
    x = _bn_relu(y, gb3_ref[...])

    # Layer 4 (manually prefetched weights).
    w4_cp.wait()
    y = _conv3x3(x, s4_ref, w4_vmem_ref[...], patch4_ref)
    o_ref[...] = _bn_relu(y, gb4_ref[...]).astype(o_ref.dtype)


# --------------------------------------------------------------------------- #
# One-time parameter preparation (hoisted out of the per-call forward)
# --------------------------------------------------------------------------- #
def _selectors(N, H, W):
    """0/1 matrices [9, N*Ho*Wo, N*H*W] for a 3x3/stride-2/pad-1 conv.

    Tap t=(ky,kx): output row (n,oy,ox) reads input row (n, 2oy+ky-1, 2ox+kx-1);
    out-of-bounds (zero padding) rows stay all-zero.  Shape-only -> numpy.
    """
    Ho, Wo = (H + 2 - 3) // 2 + 1, (W + 2 - 3) // 2 + 1
    S = np.zeros((9, N * Ho * Wo, N * H * W), np.float32)
    for ky in range(3):
        for kx in range(3):
            t = ky * 3 + kx
            for n in range(N):
                for oy in range(Ho):
                    iy = 2 * oy + ky - 1
                    if iy < 0 or iy >= H:
                        continue
                    for ox in range(Wo):
                        ix = 2 * ox + kx - 1
                        if ix < 0 or ix >= W:
                            continue
                        S[t, (n * Ho + oy) * Wo + ox, (n * H + iy) * W + ix] = 1.0
    return S, Ho, Wo


def prepare_params(params, batch, height, width):
    """One-time layout work: conv weights -> [9*Cin, Cout], selectors -> bf16,
    gamma/beta -> [2, C].  Conv bias is dropped (no-op under batch-stat BN)."""
    N = batch
    c1o, c1i, _, _ = params[0][0].shape
    w1 = jnp.transpose(params[0][0], (2, 3, 1, 0)).reshape(9 * c1i, c1o)
    w1 = w1.astype(jnp.float32)

    h = (height + 2 - 3) // 2 + 1
    w = (width + 2 - 3) // 2 + 1
    sels, wts = [], []
    for (wgt, _bias, _g, _bt) in params[1:]:
        cout, cin, _, _ = wgt.shape
        s_np, h, w = _selectors(N, h, w)
        sels.append(jnp.asarray(s_np, dtype=jnp.bfloat16))      # exact 0/1 gather
        wts.append(jnp.transpose(wgt, (2, 3, 1, 0)).reshape(9 * cin, cout)
                   .astype(jnp.float32))

    gbs = [jnp.stack([g, bt]).astype(jnp.float32) for (_w, _b, g, bt) in params]
    return (w1, sels[0], wts[0], sels[1], wts[1], sels[2], wts[2],
            gbs[0], gbs[1], gbs[2], gbs[3])


# --------------------------------------------------------------------------- #
# Forward (jitted): im2col of the raw 6 KB input + one fused pallas_call
# --------------------------------------------------------------------------- #
def _full_block(shape):
    nd = len(shape)
    return pl.BlockSpec(shape, lambda i: (0,) * nd)


def _im2col_s2_p1_k3(x_nhwc):
    """Host-side im2col (layer 1 only).  Returns [N*Ho*Wo, 9*C]."""
    N, H, W, C = x_nhwc.shape
    Ho, Wo = (H + 2 - 3) // 2 + 1, (W + 2 - 3) // 2 + 1
    xp = jnp.pad(x_nhwc, ((0, 0), (1, 1), (1, 1), (0, 0)))
    cols = []
    for ky in range(3):
        for kx in range(3):
            cols.append(xp[:, ky:ky + 2 * Ho:2, kx:kx + 2 * Wo:2, :])
    patches = jnp.stack(cols, axis=3)                       # [N, Ho, Wo, 9, C]
    return patches.reshape(N * Ho * Wo, 9 * C)


def encoder_forward(x_nchw, prepped):
    """Full fused Encoder forward.  Input/output follow PyTorch NCHW."""
    (w1, s2, w2, s3, w3, s4, w4, gb1, gb2, gb3, gb4) = prepped
    N, _, H, W = x_nchw.shape

    x = jnp.transpose(x_nchw, (0, 2, 3, 1))                 # NCHW -> NHWC, once
    p1 = _im2col_s2_p1_k3(x).astype(jnp.float32)            # [N*H1*W1, 27]

    h, w_sp = H, W
    for _ in range(4):
        h, w_sp = (h - 1) // 2 + 1, (w_sp - 1) // 2 + 1
    cout_last = w4.shape[1]
    m_out = N * h * w_sp
    assert m_out == s4.shape[1]

    args = (p1, w1, s2, w2, s3, w3, s4, w4, gb1, gb2, gb3, gb4)
    manual_dma = {5, 7}                                     # w3, w4 -> pl.ANY + manual copy
    in_specs = [pl.BlockSpec(memory_space=pl.ANY) if i in manual_dma
                else _full_block(a.shape) for i, a in enumerate(args)]

    # Advisory cost estimate (gather + weight matmul FLOPs).
    flops = 2 * p1.shape[0] * p1.shape[1] * w1.shape[1]
    for s, wf in ((s2, w2), (s3, w3), (s4, w4)):
        _, mo, mi = s.shape
        kk, co = wf.shape
        flops += 2 * 9 * mo * mi * (kk // 9) + 2 * mo * kk * co
    bytes_accessed = sum(int(a.size) * a.dtype.itemsize for a in args) \
        + m_out * cout_last * 4
    cost = pl.CostEstimate(flops=flops, transcendentals=480,
                           bytes_accessed=bytes_accessed)

    out = pl.pallas_call(
        encoder_kernel,
        out_shape=jax.ShapeDtypeStruct((m_out, cout_last), jnp.float32),
        grid=(1,),
        in_specs=in_specs,
        out_specs=_full_block((m_out, cout_last)),
        scratch_shapes=[
            pltpu.VMEM((s2.shape[1], w2.shape[0]), jnp.float32),   # patch2 [32, 288]
            pltpu.VMEM((s3.shape[1], w3.shape[0]), jnp.float32),   # patch3 [8, 576]
            pltpu.VMEM((s4.shape[1], w4.shape[0]), jnp.float32),   # patch4 [2, 1152]
            pltpu.VMEM(w3.shape, jnp.float32),                     # w3 landing buffer
            pltpu.VMEM(w4.shape, jnp.float32),                     # w4 landing buffer
            pltpu.SemaphoreType.DMA((2,)),
        ],
        compiler_params=pltpu.CompilerParams(
            dimension_semantics=("arbitrary",)),
        cost_estimate=cost,
    )(*args)

    # Rows are ordered (n, oy, ox): NHWC -> NCHW only at the module boundary.
    return out.reshape(N, h, w_sp, cout_last).transpose(0, 3, 1, 2)


# --------------------------------------------------------------------------- #
# Parameters / reference
# --------------------------------------------------------------------------- #
def init_params(key):
    """Deterministic synthetic parameters with the shapes from Encoder.__init__."""
    specs = [(3, 32), (32, 64), (64, 128), (128, 256)]
    params = []
    for i, (cin, cout) in enumerate(specs):
        kw, kb, kg, kbt = jax.random.split(jax.random.fold_in(key, i), 4)
        fan_in = cin * 9
        wgt = jax.random.normal(kw, (cout, cin, 3, 3), jnp.float32) / jnp.sqrt(fan_in)
        b = 0.1 * jax.random.normal(kb, (cout,), jnp.float32)
        gamma = 1.0 + 0.1 * jax.random.normal(kg, (cout,), jnp.float32)
        beta = 0.1 * jax.random.normal(kbt, (cout,), jnp.float32)
        params.append((wgt, b, gamma, beta))
    return params


def reference_forward(x_nchw, params):
    """Pure-JAX reference (same math as the PyTorch module in training mode,
    including the conv bias the kernel provably drops)."""
    x = x_nchw
    for (wgt, b, g, bt) in params:
        y = lax.conv_general_dilated(
            x, wgt, window_strides=(2, 2), padding=((1, 1), (1, 1)),
            dimension_numbers=("NCHW", "OIHW", "NCHW"),
            precision=lax.Precision.HIGHEST)
        y = y + b[None, :, None, None]
        mu = jnp.mean(y, axis=(0, 2, 3), keepdims=True)
        var = jnp.mean((y - mu) ** 2, axis=(0, 2, 3), keepdims=True)
        y = (y - mu) * lax.rsqrt(var + BN_EPS) * g[None, :, None, None] \
            + bt[None, :, None, None]
        x = jnp.maximum(y, 0.0)
    return x


if __name__ == "__main__":
    key = jax.random.PRNGKey(0)
    params = init_params(key)
    x = jax.random.normal(jax.random.fold_in(key, 123), (2, 3, 16, 16),
                          jnp.float32)  # NCHW, like the PyTorch module

    # One-time layout work (review item 1): no per-call weight re-layout.
    prepped = prepare_params(params, batch=2, height=16, width=16)

    fwd = jax.jit(encoder_forward)
    out = jax.block_until_ready(fwd(x, prepped))
    assert out.shape == (2, 256, 1, 1), out.shape

    ref = jax.block_until_ready(reference_forward(x, params))
    max_err = float(jnp.max(jnp.abs(out - ref)))
    assert jnp.allclose(out, ref, atol=5e-3, rtol=5e-3), max_err

    # TODO(synk): BatchNorm running_mean/running_var buffer updates (a training-
    # mode side effect that does not affect the returned tensor) are not modeled.
    print("KERNEL_OK")
</pallas_src>

<mosaic_0001>
module attributes {stable_mosaic.version = 11 : i64} {
  func.func @encoder_kernel(%arg0: i32, %arg1: memref<128x27xf32, #tpu.memory_space<vmem>>, %arg2: memref<27x32xf32, #tpu.memory_space<vmem>>, %arg3: memref<9x32x128xbf16, #tpu.memory_space<vmem>>, %arg4: memref<288x64xf32, #tpu.memory_space<vmem>>, %arg5: memref<9x8x32xbf16, #tpu.memory_space<vmem>>, %arg6: memref<576x128xf32, #tpu.memory_space<any>>, %arg7: memref<9x2x8xbf16, #tpu.memory_space<vmem>>, %arg8: memref<1152x256xf32, #tpu.memory_space<any>>, %arg9: memref<2x32xf32, #tpu.memory_space<vmem>>, %arg10: memref<2x64xf32, #tpu.memory_space<vmem>>, %arg11: memref<2x128xf32, #tpu.memory_space<vmem>>, %arg12: memref<2x256xf32, #tpu.memory_space<vmem>>, %arg13: memref<2x256xf32, #tpu.memory_space<vmem>>, %arg14: memref<32x288xf32, #tpu.memory_space<vmem>>, %arg15: memref<8x576xf32, #tpu.memory_space<vmem>>, %arg16: memref<2x1152xf32, #tpu.memory_space<vmem>>, %arg17: memref<576x128xf32, #tpu.memory_space<vmem>>, %arg18: memref<1152x256xf32, #tpu.memory_space<vmem>>, %arg19: memref<2x!tpu.dma_semaphore, #tpu.memory_space<semaphore_mem>>) attributes {dimension_semantics = [#tpu.dimension_semantics<arbitrary>], iteration_bounds = array<i64: 1>, scalar_prefetch = 0 : i64, scratch_operands = 6 : i64, tpu.core_type = #tpu.core_type<tc>, window_params = [{pipeline_mode = #tpu.pipeline_mode<synchronous>, transform_indices = @transform_0, window_bounds = array<i64: 128, 27>}, {pipeline_mode = #tpu.pipeline_mode<synchronous>, transform_indices = @transform_1, window_bounds = array<i64: 27, 32>}, {pipeline_mode = #tpu.pipeline_mode<synchronous>, transform_indices = @transform_2, window_bounds = array<i64: 9, 32, 128>}, {pipeline_mode = #tpu.pipeline_mode<synchronous>, transform_indices = @transform_3, window_bounds = array<i64: 288, 64>}, {pipeline_mode = #tpu.pipeline_mode<synchronous>, transform_indices = @transform_4, window_bounds = array<i64: 9, 8, 32>}, {}, {pipeline_mode = #tpu.pipeline_mode<synchronous>, transform_indices = @transform_6, window_bounds = array<i64: 9, 2, 8>}, {}, {pipeline_mode = #tpu.pipeline_mode<synchronous>, transform_indices = @transform_8, window_bounds = array<i64: 2, 32>}, {pipeline_mode = #tpu.pipeline_mode<synchronous>, transform_indices = @transform_9, window_bounds = array<i64: 2, 64>}, {pipeline_mode = #tpu.pipeline_mode<synchronous>, transform_indices = @transform_10, window_bounds = array<i64: 2, 128>}, {pipeline_mode = #tpu.pipeline_mode<synchronous>, transform_indices = @transform_11, window_bounds = array<i64: 2, 256>}, {pipeline_mode = #tpu.pipeline_mode<synchronous>, transform_indices = @transform_12, window_bounds = array<i64: 2, 256>}]} {
    %c0_i32 = arith.constant 0 : i32
    %0 = tpu.memref_slice %arg19[%c0_i32] : memref<2x!tpu.dma_semaphore, #tpu.memory_space<semaphore_mem>> -> memref<1x!tpu.dma_semaphore, #tpu.memory_space<semaphore_mem>>
    %1 = tpu.memref_squeeze %0 : memref<1x!tpu.dma_semaphore, #tpu.memory_space<semaphore_mem>> -> memref<!tpu.dma_semaphore, #tpu.memory_space<semaphore_mem>>
    tpu.enqueue_dma source(%arg6 : memref<576x128xf32, #tpu.memory_space<any>>) target(%arg17 : memref<576x128xf32, #tpu.memory_space<vmem>>) target_semaphore(%1 : memref<!tpu.dma_semaphore, #tpu.memory_space<semaphore_mem>>)
    %c1_i32 = arith.constant 1 : i32
    %2 = tpu.memref_slice %arg19[%c1_i32] : memref<2x!tpu.dma_semaphore, #tpu.memory_space<semaphore_mem>> -> memref<1x!tpu.dma_semaphore, #tpu.memory_space<semaphore_mem>>
    %3 = tpu.memref_squeeze %2 : memref<1x!tpu.dma_semaphore, #tpu.memory_space<semaphore_mem>> -> memref<!tpu.dma_semaphore, #tpu.memory_space<semaphore_mem>>
    tpu.enqueue_dma source(%arg8 : memref<1152x256xf32, #tpu.memory_space<any>>) target(%arg18 : memref<1152x256xf32, #tpu.memory_space<vmem>>) target_semaphore(%3 : memref<!tpu.dma_semaphore, #tpu.memory_space<semaphore_mem>>)
    %c0 = arith.constant 0 : index
    %c0_0 = arith.constant 0 : index
    %4 = vector.load %arg1[%c0, %c0_0] : memref<128x27xf32, #tpu.memory_space<vmem>>, vector<128x27xf32>
    %c0_1 = arith.constant 0 : index
    %c0_2 = arith.constant 0 : index
    %5 = vector.load %arg2[%c0_1, %c0_2] : memref<27x32xf32, #tpu.memory_space<vmem>>, vector<27x32xf32>
    %cst = arith.constant dense<0.000000e+00> : vector<128x32xf32>
    %6 = tpu.matmul %4, %5, %cst {dimension_numbers = #tpu.dot_dimension_numbers<[1], [0], [0], [1], [0, 0, 1, 1], [], []>} : vector<128x27xf32>, vector<27x32xf32>, vector<128x32xf32> -> vector<128x32xf32>
    %c0_3 = arith.constant 0 : index
    %c0_4 = arith.constant 0 : index
    %7 = vector.load %arg9[%c0_3, %c0_4] : memref<2x32xf32, #tpu.memory_space<vmem>>, vector<2x32xf32>
    %cst_5 = arith.constant dense<0.000000e+00> : vector<32xf32>
    %8 = vector.multi_reduction <add>, %6, %cst_5 [0] : vector<128x32xf32> to vector<32xf32>
    %9 = vector.shape_cast %8 : vector<32xf32> to vector<1x32xf32>
    %cst_6 = arith.constant 1.280000e+02 : f32
    %10 = vector.broadcast %cst_6 : f32 to vector<1x32xf32>
    %11 = arith.divf %9, %10 : vector<1x32xf32>
    %12 = vector.broadcast %11 : vector<1x32xf32> to vector<128x32xf32>
    %13 = arith.subf %6, %12 : vector<128x32xf32>
    %14 = arith.mulf %13, %13 : vector<128x32xf32>
    %cst_7 = arith.constant dense<0.000000e+00> : vector<32xf32>
    %15 = vector.multi_reduction <add>, %14, %cst_7 [0] : vector<128x32xf32> to vector<32xf32>
    %16 = vector.shape_cast %15 : vector<32xf32> to vector<1x32xf32>
    %cst_8 = arith.constant 1.280000e+02 : f32
    %17 = vector.broadcast %cst_8 : f32 to vector<1x32xf32>
    %18 = arith.divf %16, %17 : vector<1x32xf32>
    %cst_9 = arith.constant 9.99999974E-6 : f32
    %19 = vector.broadcast %cst_9 : f32 to vector<1x32xf32>
    %20 = arith.addf %18, %19 : vector<1x32xf32>
    %21 = math.rsqrt %20 : vector<1x32xf32>
    %22 = vector.broadcast %11 : vector<1x32xf32> to vector<128x32xf32>
    %23 = arith.subf %6, %22 : vector<128x32xf32>
    %24 = vector.broadcast %21 : vector<1x32xf32> to vector<128x32xf32>
    %25 = arith.mulf %23, %24 : vector<128x32xf32>
    %26 = vector.extract_strided_slice %7 {offsets = [0, 0], sizes = [1, 32], strides = [1, 1]} : vector<2x32xf32> to vector<1x32xf32>
    %27 = vector.broadcast %26 : vector<1x32xf32> to vector<128x32xf32>
    %28 = arith.mulf %25, %27 : vector<128x32xf32>
    %29 = vector.extract_strided_slice %7 {offsets = [1, 0], sizes = [1, 32], strides = [1, 1]} : vector<2x32xf32> to vector<1x32xf32>
    %30 = vector.broadcast %29 : vector<1x32xf32> to vector<128x32xf32>
    %31 = arith.addf %28, %30 : vector<128x32xf32>
    %cst_10 = arith.constant 0.000000e+00 : f32
    %32 = vector.broadcast %cst_10 : f32 to vector<128x32xf32>
    %33 = arith.maximumf %31, %32 : vector<128x32xf32>
    %c0_11 = arith.constant 0 : index
    %c0_12 = arith.constant 0 : index
    %34 = vector.load %arg4[%c0_11, %c0_12] : memref<288x64xf32, #tpu.memory_space<vmem>>, vector<288x64xf32>
    %c0_13 = arith.constant 0 : index
    %c0_14 = arith.constant 0 : index
    %c0_15 = arith.constant 0 : index
    %35 = vector.load %arg3[%c0_13, %c0_14, %c0_15] : memref<9x32x128xbf16, #tpu.memory_space<vmem>>, vector<1x32x128xbf16>
    %36 = vector.shape_cast %35 : vector<1x32x128xbf16> to vector<32x128xbf16>
    %37 = arith.extf %36 : vector<32x128xbf16> to vector<32x128xf32>
    %cst_16 = arith.constant dense<0.000000e+00> : vector<32x32xf32>
    %38 = tpu.matmul %37, %33, %cst_16 {dimension_numbers = #tpu.dot_dimension_numbers<[1], [0], [0], [1], [0, 0, 1, 1], [], []>} : vector<32x128xf32>, vector<128x32xf32>, vector<32x32xf32> -> vector<32x32xf32>
    %c0_17 = arith.constant 0 : index
    %c0_18 = arith.constant 0 : index
    %39 = vector.load %arg14[%c0_17, %c0_18] : memref<32x288xf32, #tpu.memory_space<vmem>>, vector<32x32xf32>
    tpu.vector_store %arg14[%c0_17, %c0_18], %38 {strides = array<i32>} : memref<32x288xf32, #tpu.memory_space<vmem>>, vector<32x32xf32>,
    %c1 = arith.constant 1 : index
    %c0_19 = arith.constant 0 : index
    %c0_20 = arith.constant 0 : index
    %40 = vector.load %arg3[%c1, %c0_19, %c0_20] : memref<9x32x128xbf16, #tpu.memory_space<vmem>>, vector<1x32x128xbf16>
    %41 = vector.shape_cast %40 : vector<1x32x128xbf16> to vector<32x128xbf16>
    %42 = arith.extf %41 : vector<32x128xbf16> to vector<32x128xf32>
    %cst_21 = arith.constant dense<0.000000e+00> : vector<32x32xf32>
    %43 = tpu.matmul %42, %33, %cst_21 {dimension_numbers = #tpu.dot_dimension_numbers<[1], [0], [0], [1], [0, 0, 1, 1], [], []>} : vector<32x128xf32>, vector<128x32xf32>, vector<32x32xf32> -> vector<32x32xf32>
    %c0_22 = arith.constant 0 : index
    %c32 = arith.constant 32 : index
    %44 = vector.load %arg14[%c0_22, %c32] : memref<32x288xf32, #tpu.memory_space<vmem>>, vector<32x32xf32>
    tpu.vector_store %arg14[%c0_22, %c32], %43 {strides = array<i32>} : memref<32x288xf32, #tpu.memory_space<vmem>>, vector<32x32xf32>,
    %c2 = arith.constant 2 : index
    %c0_23 = arith.constant 0 : index
    %c0_24 = arith.constant 0 : index
    %45 = vector.load %arg3[%c2, %c0_23, %c0_24] : memref<9x32x128xbf16, #tpu.memory_space<vmem>>, vector<1x32x128xbf16>
    %46 = vector.shape_cast %45 : vector<1x32x128xbf16> to vector<32x128xbf16>
    %47 = arith.extf %46 : vector<32x128xbf16> to vector<32x128xf32>
    %cst_25 = arith.constant dense<0.000000e+00> : vector<32x32xf32>
    %48 = tpu.matmul %47, %33, %cst_25 {dimension_numbers = #tpu.dot_dimension_numbers<[1], [0], [0], [1], [0, 0, 1, 1], [], []>} : vector<32x128xf32>, vector<128x32xf32>, vector<32x32xf32> -> vector<32x32xf32>
    %c0_26 = arith.constant 0 : index
    %c64 = arith.constant 64 : index
    %49 = vector.load %arg14[%c0_26, %c64] : memref<32x288xf32, #tpu.memory_space<vmem>>, vector<32x32xf32>
    tpu.vector_store %arg14[%c0_26, %c64], %48 {strides = array<i32>} : memref<32x288xf32, #tpu.memory_space<vmem>>, vector<32x32xf32>,
    %c3 = arith.constant 3 : index
    %c0_27 = arith.constant 0 : index
    %c0_28 = arith.constant 0 : index
    %50 = vector.load %arg3[%c3, %c0_27, %c0_28] : memref<9x32x128xbf16, #tpu.memory_space<vmem>>, vector<1x32x128xbf16>
    %51 = vector.shape_cast %50 : vector<1x32x128xbf16> to vector<32x128xbf16>
    %52 = arith.extf %51 : vector<32x128xbf16> to vector<32x128xf32>
    %cst_29 = arith.constant dense<0.000000e+00> : vector<32x32xf32>
    %53 = tpu.matmul %52, %33, %cst_29 {dimension_numbers = #tpu.dot_dimension_numbers<[1], [0], [0], [1], [0, 0, 1, 1], [], []>} : vector<32x128xf32>, vector<128x32xf32>, vector<32x32xf32> -> vector<32x32xf32>
    %c0_30 = arith.constant 0 : index
    %c96 = arith.constant 96 : index
    %54 = vector.load %arg14[%c0_30, %c96] : memref<32x288xf32, #tpu.memory_space<vmem>>, vector<32x32xf32>
    tpu.vector_store %arg14[%c0_30, %c96], %53 {strides = array<i32>} : memref<32x288xf32, #tpu.memory_space<vmem>>, vector<32x32xf32>,
    %c4 = arith.constant 4 : index
    %c0_31 = arith.constant 0 : index
    %c0_32 = arith.constant 0 : index
    %55 = vector.load %arg3[%c4, %c0_31, %c0_32] : memref<9x32x128xbf16, #tpu.memory_space<vmem>>, vector<1x32x128xbf16>
    %56 = vector.shape_cast %55 : vector<1x32x128xbf16> to vector<32x128xbf16>
    %57 = arith.extf %56 : vector<32x128xbf16> to vector<32x128xf32>
    %cst_33 = arith.constant dense<0.000000e+00> : vector<32x32xf32>
    %58 = tpu.matmul %57, %33, %cst_33 {dimension_numbers = #tpu.dot_dimension_numbers<[1], [0], [0], [1], [0, 0, 1, 1], [], []>} : vector<32x128xf32>, vector<128x32xf32>, vector<32x32xf32> -> vector<32x32xf32>
    %c0_34 = arith.constant 0 : index
    %c128 = arith.constant 128 : index
    %59 = vector.load %arg14[%c0_34, %c128] : memref<32x288xf32, #tpu.memory_space<vmem>>, vector<32x32xf32>
    tpu.vector_store %arg14[%c0_34, %c128], %58 {strides = array<i32>} : memref<32x288xf32, #tpu.memory_space<vmem>>, vector<32x32xf32>,
    %c5 = arith.constant 5 : index
    %c0_35 = arith.constant 0 : index
    %c0_36 = arith.constant 0 : index
    %60 = vector.load %arg3[%c5, %c0_35, %c0_36] : memref<9x32x128xbf16, #tpu.memory_space<vmem>>, vector<1x32x128xbf16>
    %61 = vector.shape_cast %60 : vector<1x32x128xbf16> to vector<32x128xbf16>
    %62 = arith.extf %61 : vector<32x128xbf16> to vector<32x128xf32>
    %cst_37 = arith.constant dense<0.000000e+00> : vector<32x32xf32>
    %63 = tpu.matmul %62, %33, %cst_37 {dimension_numbers = #tpu.dot_dimension_numbers<[1], [0], [0], [1], [0, 0, 1, 1], [], []>} : vector<32x128xf32>, vector<128x32xf32>, vector<32x32xf32> -> vector<32x32xf32>
    %c0_38 = arith.constant 0 : index
    %c160 = arith.constant 160 : index
    %64 = vector.load %arg14[%c0_38, %c160] : memref<32x288xf32, #tpu.memory_space<vmem>>, vector<32x32xf32>
    tpu.vector_store %arg14[%c0_38, %c160], %63 {strides = array<i32>} : memref<32x288xf32, #tpu.memory_space<vmem>>, vector<32x32xf32>,
    %c6 = arith.constant 6 : index
    %c0_39 = arith.constant 0 : index
    %c0_40 = arith.constant 0 : index
    %65 = vector.load %arg3[%c6, %c0_39, %c0_40] : memref<9x32x128xbf16, #tpu.memory_space<vmem>>, vector<1x32x128xbf16>
    %66 = vector.shape_cast %65 : vector<1x32x128xbf16> to vector<32x128xbf16>
    %67 = arith.extf %66 : vector<32x128xbf16> to vector<32x128xf32>
    %cst_41 = arith.constant dense<0.000000e+00> : vector<32x32xf32>
    %68 = tpu.matmul %67, %33, %cst_41 {dimension_numbers = #tpu.dot_dimension_numbers<[1], [0], [0], [1], [0, 0, 1, 1], [], []>} : vector<32x128xf32>, vector<128x32xf32>, vector<32x32xf32> -> vector<32x32xf32>
    %c0_42 = arith.constant 0 : index
    %c192 = arith.constant 192 : index
    %69 = vector.load %arg14[%c0_42, %c192] : memref<32x288xf32, #tpu.memory_space<vmem>>, vector<32x32xf32>
    tpu.vector_store %arg14[%c0_42, %c192], %68 {strides = array<i32>} : memref<32x288xf32, #tpu.memory_space<vmem>>, vector<32x32xf32>,
    %c7 = arith.constant 7 : index
    %c0_43 = arith.constant 0 : index
    %c0_44 = arith.constant 0 : index
    %70 = vector.load %arg3[%c7, %c0_43, %c0_44] : memref<9x32x128xbf16, #tpu.memory_space<vmem>>, vector<1x32x128xbf16>
    %71 = vector.shape_cast %70 : vector<1x32x128xbf16> to vector<32x128xbf16>
    %72 = arith.extf %71 : vector<32x128xbf16> to vector<32x128xf32>
    %cst_45 = arith.constant dense<0.000000e+00> : vector<32x32xf32>
    %73 = tpu.matmul %72, %33, %cst_45 {dimension_numbers = #tpu.dot_dimension_numbers<[1], [0], [0], [1], [0, 0, 1, 1], [], []>} : vector<32x128xf32>, vector<128x32xf32>, vector<32x32xf32> -> vector<32x32xf32>
    %c0_46 = arith.constant 0 : index
    %c224 = arith.constant 224 : index
    %74 = vector.load %arg14[%c0_46, %c224] : memref<32x288xf32, #tpu.memory_space<vmem>>, vector<32x32xf32>
    tpu.vector_store %arg14[%c0_46, %c224], %73 {strides = array<i32>} : memref<32x288xf32, #tpu.memory_space<vmem>>, vector<32x32xf32>,
    %c8 = arith.constant 8 : index
    %c0_47 = arith.constant 0 : index
    %c0_48 = arith.constant 0 : index
    %75 = vector.load %arg3[%c8, %c0_47, %c0_48] : memref<9x32x128xbf16, #tpu.memory_space<vmem>>, vector<1x32x128xbf16>
    %76 = vector.shape_cast %75 : vector<1x32x128xbf16> to vector<32x128xbf16>
    %77 = arith.extf %76 : vector<32x128xbf16> to vector<32x128xf32>
    %cst_49 = arith.constant dense<0.000000e+00> : vector<32x32xf32>
    %78 = tpu.matmul %77, %33, %cst_49 {dimension_numbers = #tpu.dot_dimension_numbers<[1], [0], [0], [1], [0, 0, 1, 1], [], []>} : vector<32x128xf32>, vector<128x32xf32>, vector<32x32xf32> -> vector<32x32xf32>
    %c0_50 = arith.constant 0 : index
    %c256 = arith.constant 256 : index
    %79 = vector.load %arg14[%c0_50, %c256] : memref<32x288xf32, #tpu.memory_space<vmem>>, vector<32x32xf32>
    tpu.vector_store %arg14[%c0_50, %c256], %78 {strides = array<i32>} : memref<32x288xf32, #tpu.memory_space<vmem>>, vector<32x32xf32>,
    %c0_51 = arith.constant 0 : index
    %c0_52 = arith.constant 0 : index
    %80 = vector.load %arg14[%c0_51, %c0_52] : memref<32x288xf32, #tpu.memory_space<vmem>>, vector<32x288xf32>
    %cst_53 = arith.constant dense<0.000000e+00> : vector<32x64xf32>
    %81 = tpu.matmul %80, %34, %cst_53 {dimension_numbers = #tpu.dot_dimension_numbers<[1], [0], [0], [1], [0, 0, 1, 1], [], []>} : vector<32x288xf32>, vector<288x64xf32>, vector<32x64xf32> -> vector<32x64xf32>
    %c0_54 = arith.constant 0 : index
    %c0_55 = arith.constant 0 : index
    %82 = vector.load %arg10[%c0_54, %c0_55] : memref<2x64xf32, #tpu.memory_space<vmem>>, vector<2x64xf32>
    %cst_56 = arith.constant dense<0.000000e+00> : vector<64xf32>
    %83 = vector.multi_reduction <add>, %81, %cst_56 [0] : vector<32x64xf32> to vector<64xf32>
    %84 = vector.shape_cast %83 : vector<64xf32> to vector<1x64xf32>
    %cst_57 = arith.constant 3.200000e+01 : f32
    %85 = vector.broadcast %cst_57 : f32 to vector<1x64xf32>
    %86 = arith.divf %84, %85 : vector<1x64xf32>
    %87 = vector.broadcast %86 : vector<1x64xf32> to vector<32x64xf32>
    %88 = arith.subf %81, %87 : vector<32x64xf32>
    %89 = arith.mulf %88, %88 : vector<32x64xf32>
    %cst_58 = arith.constant dense<0.000000e+00> : vector<64xf32>
    %90 = vector.multi_reduction <add>, %89, %cst_58 [0] : vector<32x64xf32> to vector<64xf32>
    %91 = vector.shape_cast %90 : vector<64xf32> to vector<1x64xf32>
    %cst_59 = arith.constant 3.200000e+01 : f32
    %92 = vector.broadcast %cst_59 : f32 to vector<1x64xf32>
    %93 = arith.divf %91, %92 : vector<1x64xf32>
    %cst_60 = arith.constant 9.99999974E-6 : f32
    %94 = vector.broadcast %cst_60 : f32 to vector<1x64xf32>
    %95 = arith.addf %93, %94 : vector<1x64xf32>
    %96 = math.rsqrt %95 : vector<1x64xf32>
    %97 = vector.broadcast %86 : vector<1x64xf32> to vector<32x64xf32>
    %98 = arith.subf %81, %97 : vector<32x64xf32>
    %99 = vector.broadcast %96 : vector<1x64xf32> to vector<32x64xf32>
    %100 = arith.mulf %98, %99 : vector<32x64xf32>
    %101 = vector.extract_strided_slice %82 {offsets = [0, 0], sizes = [1, 64], strides = [1, 1]} : vector<2x64xf32> to vector<1x64xf32>
    %102 = vector.broadcast %101 : vector<1x64xf32> to vector<32x64xf32>
    %103 = arith.mulf %100, %102 : vector<32x64xf32>
    %104 = vector.extract_strided_slice %82 {offsets = [1, 0], sizes = [1, 64], strides = [1, 1]} : vector<2x64xf32> to vector<1x64xf32>
    %105 = vector.broadcast %104 : vector<1x64xf32> to vector<32x64xf32>
    %106 = arith.addf %103, %105 : vector<32x64xf32>
    %cst_61 = arith.constant 0.000000e+00 : f32
    %107 = vector.broadcast %cst_61 : f32 to vector<32x64xf32>
    %108 = arith.maximumf %106, %107 : vector<32x64xf32>
    %c0_i32_62 = arith.constant 0 : i32
    %109 = tpu.memref_slice %arg19[%c0_i32_62] : memref<2x!tpu.dma_semaphore, #tpu.memory_space<semaphore_mem>> -> memref<1x!tpu.dma_semaphore, #tpu.memory_space<semaphore_mem>>
    %110 = tpu.memref_squeeze %109 : memref<1x!tpu.dma_semaphore, #tpu.memory_space<semaphore_mem>> -> memref<!tpu.dma_semaphore, #tpu.memory_space<semaphore_mem>>
    tpu.wait_dma2 semaphore(%110 : memref<!tpu.dma_semaphore, #tpu.memory_space<semaphore_mem>>) src(%arg6 : memref<576x128xf32, #tpu.memory_space<any>>) dst(%arg17 : memref<576x128xf32, #tpu.memory_space<vmem>>)
    %c0_63 = arith.constant 0 : index
    %c0_64 = arith.constant 0 : index
    %111 = vector.load %arg17[%c0_63, %c0_64] : memref<576x128xf32, #tpu.memory_space<vmem>>, vector<576x128xf32>
    %c0_65 = arith.constant 0 : index
    %c0_66 = arith.constant 0 : index
    %c0_67 = arith.constant 0 : index
    %112 = vector.load %arg5[%c0_65, %c0_66, %c0_67] : memref<9x8x32xbf16, #tpu.memory_space<vmem>>, vector<1x8x32xbf16>
    %113 = vector.shape_cast %112 : vector<1x8x32xbf16> to vector<8x32xbf16>
    %114 = arith.extf %113 : vector<8x32xbf16> to vector<8x32xf32>
    %cst_68 = arith.constant dense<0.000000e+00> : vector<8x64xf32>
    %115 = tpu.matmul %114, %108, %cst_68 {dimension_numbers = #tpu.dot_dimension_numbers<[1], [0], [0], [1], [0, 0, 1, 1], [], []>} : vector<8x32xf32>, vector<32x64xf32>, vector<8x64xf32> -> vector<8x64xf32>
    %c0_69 = arith.constant 0 : index
    %c0_70 = arith.constant 0 : index
    %116 = vector.load %arg15[%c0_69, %c0_70] : memref<8x576xf32, #tpu.memory_space<vmem>>, vector<8x64xf32>
    tpu.vector_store %arg15[%c0_69, %c0_70], %115 {strides = array<i32>} : memref<8x576xf32, #tpu.memory_space<vmem>>, vector<8x64xf32>,
    %c1_71 = arith.constant 1 : index
    %c0_72 = arith.constant 0 : index
    %c0_73 = arith.constant 0 : index
    %117 = vector.load %arg5[%c1_71, %c0_72, %c0_73] : memref<9x8x32xbf16, #tpu.memory_space<vmem>>, vector<1x8x32xbf16>
    %118 = vector.shape_cast %117 : vector<1x8x32xbf16> to vector<8x32xbf16>
    %119 = arith.extf %118 : vector<8x32xbf16> to vector<8x32xf32>
    %cst_74 = arith.constant dense<0.000000e+00> : vector<8x64xf32>
    %120 = tpu.matmul %119, %108, %cst_74 {dimension_numbers = #tpu.dot_dimension_numbers<[1], [0], [0], [1], [0, 0, 1, 1], [], []>} : vector<8x32xf32>, vector<32x64xf32>, vector<8x64xf32> -> vector<8x64xf32>
    %c0_75 = arith.constant 0 : index
    %c64_76 = arith.constant 64 : index
    %121 = vector.load %arg15[%c0_75, %c64_76] : memref<8x576xf32, #tpu.memory_space<vmem>>, vector<8x64xf32>
    tpu.vector_store %arg15[%c0_75, %c64_76], %120 {strides = array<i32>} : memref<8x576xf32, #tpu.memory_space<vmem>>, vector<8x64xf32>,
    %c2_77 = arith.constant 2 : index
    %c0_78 = arith.constant 0 : index
    %c0_79 = arith.constant 0 : index
    %122 = vector.load %arg5[%c2_77, %c0_78, %c0_79] : memref<9x8x32xbf16, #tpu.memory_space<vmem>>, vector<1x8x32xbf16>
    %123 = vector.shape_cast %122 : vector<1x8x32xbf16> to vector<8x32xbf16>
    %124 = arith.extf %123 : vector<8x32xbf16> to vector<8x32xf32>
    %cst_80 = arith.constant dense<0.000000e+00> : vector<8x64xf32>
    %125 = tpu.matmul %124, %108, %cst_80 {dimension_numbers = #tpu.dot_dimension_numbers<[1], [0], [0], [1], [0, 0, 1, 1], [], []>} : vector<8x32xf32>, vector<32x64xf32>, vector<8x64xf32> -> vector<8x64xf32>
    %c0_81 = arith.constant 0 : index
    %c128_82 = arith.constant 128 : index
    %126 = vector.load %arg15[%c0_81, %c128_82] : memref<8x576xf32, #tpu.memory_space<vmem>>, vector<8x64xf32>
    tpu.vector_store %arg15[%c0_81, %c128_82], %125 {strides = array<i32>} : memref<8x576xf32, #tpu.memory_space<vmem>>, vector<8x64xf32>,
    %c3_83 = arith.constant 3 : index
    %c0_84 = arith.constant 0 : index
    %c0_85 = arith.constant 0 : index
    %127 = vector.load %arg5[%c3_83, %c0_84, %c0_85] : memref<9x8x32xbf16, #tpu.memory_space<vmem>>, vector<1x8x32xbf16>
    %128 = vector.shape_cast %127 : vector<1x8x32xbf16> to vector<8x32xbf16>
    %129 = arith.extf %128 : vector<8x32xbf16> to vector<8x32xf32>
    %cst_86 = arith.constant dense<0.000000e+00> : vector<8x64xf32>
    %130 = tpu.matmul %129, %108, %cst_86 {dimension_numbers = #tpu.dot_dimension_numbers<[1], [0], [0], [1], [0, 0, 1, 1], [], []>} : vector<8x32xf32>, vector<32x64xf32>, vector<8x64xf32> -> vector<8x64xf32>
    %c0_87 = arith.constant 0 : index
    %c192_88 = arith.constant 192 : index
    %131 = vector.load %arg15[%c0_87, %c192_88] : memref<8x576xf32, #tpu.memory_space<vmem>>, vector<8x64xf32>
    tpu.vector_store %arg15[%c0_87, %c192_88], %130 {strides = array<i32>} : memref<8x576xf32, #tpu.memory_space<vmem>>, vector<8x64xf32>,
    %c4_89 = arith.constant 4 : index
    %c0_90 = arith.constant 0 : index
    %c0_91 = arith.constant 0 : index
    %132 = vector.load %arg5[%c4_89, %c0_90, %c0_91] : memref<9x8x32xbf16, #tpu.memory_space<vmem>>, vector<1x8x32xbf16>
    %133 = vector.shape_cast %132 : vector<1x8x32xbf16> to vector<8x32xbf16>
    %134 = arith.extf %133 : vector<8x32xbf16> to vector<8x32xf32>
    %cst_92 = arith.constant dense<0.000000e+00> : vector<8x64xf32>
    %135 = tpu.matmul %134, %108, %cst_92 {dimension_numbers = #tpu.dot_dimension_numbers<[1], [0], [0], [1], [0, 0, 1, 1], [], []>} : vector<8x32xf32>, vector<32x64xf32>, vector<8x64xf32> -> vector<8x64xf32>
    %c0_93 = arith.constant 0 : index
    %c256_94 = arith.constant 256 : index
    %136 = vector.load %arg15[%c0_93, %c256_94] : memref<8x576xf32, #tpu.memory_space<vmem>>, vector<8x64xf32>
    tpu.vector_store %arg15[%c0_93, %c256_94], %135 {strides = array<i32>} : memref<8x576xf32, #tpu.memory_space<vmem>>, vector<8x64xf32>,
    %c5_95 = arith.constant 5 : index
    %c0_96 = arith.constant 0 : index
    %c0_97 = arith.constant 0 : index
    %137 = vector.load %arg5[%c5_95, %c0_96, %c0_97] : memref<9x8x32xbf16, #tpu.memory_space<vmem>>, vector<1x8x32xbf16>
    %138 = vector.shape_cast %137 : vector<1x8x32xbf16> to vector<8x32xbf16>
    %139 = arith.extf %138 : vector<8x32xbf16> to vector<8x32xf32>
    %cst_98 = arith.constant dense<0.000000e+00> : vector<8x64xf32>
    %140 = tpu.matmul %139, %108, %cst_98 {dimension_numbers = #tpu.dot_dimension_numbers<[1], [0], [0], [1], [0, 0, 1, 1], [], []>} : vector<8x32xf32>, vector<32x64xf32>, vector<8x64xf32> -> vector<8x64xf32>
    %c0_99 = arith.constant 0 : index
    %c320 = arith.constant 320 : index
    %141 = vector.load %arg15[%c0_99, %c320] : memref<8x576xf32, #tpu.memory_space<vmem>>, vector<8x64xf32>
    tpu.vector_store %arg15[%c0_99, %c320], %140 {strides = array<i32>} : memref<8x576xf32, #tpu.memory_space<vmem>>, vector<8x64xf32>,
    %c6_100 = arith.constant 6 : index
    %c0_101 = arith.constant 0 : index
    %c0_102 = arith.constant 0 : index
    %142 = vector.load %arg5[%c6_100, %c0_101, %c0_102] : memref<9x8x32xbf16, #tpu.memory_space<vmem>>, vector<1x8x32xbf16>
    %143 = vector.shape_cast %142 : vector<1x8x32xbf16> to vector<8x32xbf16>
    %144 = arith.extf %143 : vector<8x32xbf16> to vector<8x32xf32>
    %cst_103 = arith.constant dense<0.000000e+00> : vector<8x64xf32>
    %145 = tpu.matmul %144, %108, %cst_103 {dimension_numbers = #tpu.dot_dimension_numbers<[1], [0], [0], [1], [0, 0, 1, 1], [], []>} : vector<8x32xf32>, vector<32x64xf32>, vector<8x64xf32> -> vector<8x64xf32>
    %c0_104 = arith.constant 0 : index
    %c384 = arith.constant 384 : index
    %146 = vector.load %arg15[%c0_104, %c384] : memref<8x576xf32, #tpu.memory_space<vmem>>, vector<8x64xf32>
    tpu.vector_store %arg15[%c0_104, %c384], %145 {strides = array<i32>} : memref<8x576xf32, #tpu.memory_space<vmem>>, vector<8x64xf32>,
    %c7_105 = arith.constant 7 : index
    %c0_106 = arith.constant 0 : index
    %c0_107 = arith.constant 0 : index
    %147 = vector.load %arg5[%c7_105, %c0_106, %c0_107] : memref<9x8x32xbf16, #tpu.memory_space<vmem>>, vector<1x8x32xbf16>
    %148 = vector.shape_cast %147 : vector<1x8x32xbf16> to vector<8x32xbf16>
    %149 = arith.extf %148 : vector<8x32xbf16> to vector<8x32xf32>
    %cst_108 = arith.constant dense<0.000000e+00> : vector<8x64xf32>
    %150 = tpu.matmul %149, %108, %cst_108 {dimension_numbers = #tpu.dot_dimension_numbers<[1], [0], [0], [1], [0, 0, 1, 1], [], []>} : vector<8x32xf32>, vector<32x64xf32>, vector<8x64xf32> -> vector<8x64xf32>
    %c0_109 = arith.constant 0 : index
    %c448 = arith.constant 448 : index
    %151 = vector.load %arg15[%c0_109, %c448] : memref<8x576xf32, #tpu.memory_space<vmem>>, vector<8x64xf32>
    tpu.vector_store %arg15[%c0_109, %c448], %150 {strides = array<i32>} : memref<8x576xf32, #tpu.memory_space<vmem>>, vector<8x64xf32>,
    %c8_110 = arith.constant 8 : index
    %c0_111 = arith.constant 0 : index
    %c0_112 = arith.constant 0 : index
    %152 = vector.load %arg5[%c8_110, %c0_111, %c0_112] : memref<9x8x32xbf16, #tpu.memory_space<vmem>>, vector<1x8x32xbf16>
    %153 = vector.shape_cast %152 : vector<1x8x32xbf16> to vector<8x32xbf16>
    %154 = arith.extf %153 : vector<8x32xbf16> to vector<8x32xf32>
    %cst_113 = arith.constant dense<0.000000e+00> : vector<8x64xf32>
    %155 = tpu.matmul %154, %108, %cst_113 {dimension_numbers = #tpu.dot_dimension_numbers<[1], [0], [0], [1], [0, 0, 1, 1], [], []>} : vector<8x32xf32>, vector<32x64xf32>, vector<8x64xf32> -> vector<8x64xf32>
    %c0_114 = arith.constant 0 : index
    %c512 = arith.constant 512 : index
    %156 = vector.load %arg15[%c0_114, %c512] : memref<8x576xf32, #tpu.memory_space<vmem>>, vector<8x64xf32>
    tpu.vector_store %arg15[%c0_114, %c512], %155 {strides = array<i32>} : memref<8x576xf32, #tpu.memory_space<vmem>>, vector<8x64xf32>,
    %c0_115 = arith.constant 0 : index
    %c0_116 = arith.constant 0 : index
    %157 = vector.load %arg15[%c0_115, %c0_116] : memref<8x576xf32, #tpu.memory_space<vmem>>, vector<8x576xf32>
    %cst_117 = arith.constant dense<0.000000e+00> : vector<8x128xf32>
    %158 = tpu.matmul %157, %111, %cst_117 {dimension_numbers = #tpu.dot_dimension_numbers<[1], [0], [0], [1], [0, 0, 1, 1], [], []>} : vector<8x576xf32>, vector<576x128xf32>, vector<8x128xf32> -> vector<8x128xf32>
    %c0_118 = arith.constant 0 : index
    %c0_119 = arith.constant 0 : index
    %159 = vector.load %arg11[%c0_118, %c0_119] : memref<2x128xf32, #tpu.memory_space<vmem>>, vector<2x128xf32>
    %cst_120 = arith.constant dense<0.000000e+00> : vector<128xf32>
    %160 = vector.multi_reduction <add>, %158, %cst_120 [0] : vector<8x128xf32> to vector<128xf32>
    %161 = vector.shape_cast %160 : vector<128xf32> to vector<1x128xf32>
    %cst_121 = arith.constant 8.000000e+00 : f32
    %162 = vector.broadcast %cst_121 : f32 to vector<1x128xf32>
    %163 = arith.divf %161, %162 : vector<1x128xf32>
    %164 = vector.broadcast %163 : vector<1x128xf32> to vector<8x128xf32>
    %165 = arith.subf %158, %164 : vector<8x128xf32>
    %166 = arith.mulf %165, %165 : vector<8x128xf32>
    %cst_122 = arith.constant dense<0.000000e+00> : vector<128xf32>
    %167 = vector.multi_reduction <add>, %166, %cst_122 [0] : vector<8x128xf32> to vector<128xf32>
    %168 = vector.shape_cast %167 : vector<128xf32> to vector<1x128xf32>
    %cst_123 = arith.constant 8.000000e+00 : f32
    %169 = vector.broadcast %cst_123 : f32 to vector<1x128xf32>
    %170 = arith.divf %168, %169 : vector<1x128xf32>
    %cst_124 = arith.constant 9.99999974E-6 : f32
    %171 = vector.broadcast %cst_124 : f32 to vector<1x128xf32>
    %172 = arith.addf %170, %171 : vector<1x128xf32>
    %173 = math.rsqrt %172 : vector<1x128xf32>
    %174 = vector.broadcast %163 : vector<1x128xf32> to vector<8x128xf32>
    %175 = arith.subf %158, %174 : vector<8x128xf32>
    %176 = vector.broadcast %173 : vector<1x128xf32> to vector<8x128xf32>
    %177 = arith.mulf %175, %176 : vector<8x128xf32>
    %178 = vector.extract_strided_slice %159 {offsets = [0, 0], sizes = [1, 128], strides = [1, 1]} : vector<2x128xf32> to vector<1x128xf32>
    %179 = vector.broadcast %178 : vector<1x128xf32> to vector<8x128xf32>
    %180 = arith.mulf %177, %179 : vector<8x128xf32>
    %181 = vector.extract_strided_slice %159 {offsets = [1, 0], sizes = [1, 128], strides = [1, 1]} : vector<2x128xf32> to vector<1x128xf32>
    %182 = vector.broadcast %181 : vector<1x128xf32> to vector<8x128xf32>
    %183 = arith.addf %180, %182 : vector<8x128xf32>
    %cst_125 = arith.constant 0.000000e+00 : f32
    %184 = vector.broadcast %cst_125 : f32 to vector<8x128xf32>
    %185 = arith.maximumf %183, %184 : vector<8x128xf32>
    %c1_i32_126 = arith.constant 1 : i32
    %186 = tpu.memref_slice %arg19[%c1_i32_126] : memref<2x!tpu.dma_semaphore, #tpu.memory_space<semaphore_mem>> -> memref<1x!tpu.dma_semaphore, #tpu.memory_space<semaphore_mem>>
    %187 = tpu.memref_squeeze %186 : memref<1x!tpu.dma_semaphore, #tpu.memory_space<semaphore_mem>> -> memref<!tpu.dma_semaphore, #tpu.memory_space<semaphore_mem>>
    tpu.wait_dma2 semaphore(%187 : memref<!tpu.dma_semaphore, #tpu.memory_space<semaphore_mem>>) src(%arg8 : memref<1152x256xf32, #tpu.memory_space<any>>) dst(%arg18 : memref<1152x256xf32, #tpu.memory_space<vmem>>)
    %c0_127 = arith.constant 0 : index
    %c0_128 = arith.constant 0 : index
    %188 = vector.load %arg18[%c0_127, %c0_128] : memref<1152x256xf32, #tpu.memory_space<vmem>>, vector<1152x256xf32>
    %c0_129 = arith.constant 0 : index
    %c0_130 = arith.constant 0 : index
    %c0_131 = arith.constant 0 : index
    %189 = vector.load %arg7[%c0_129, %c0_130, %c0_131] : memref<9x2x8xbf16, #tpu.memory_space<vmem>>, vector<1x2x8xbf16>
    %190 = vector.shape_cast %189 : vector<1x2x8xbf16> to vector<2x8xbf16>
    %191 = arith.extf %190 : vector<2x8xbf16> to vector<2x8xf32>
    %cst_132 = arith.constant dense<0.000000e+00> : vector<2x128xf32>
    %192 = tpu.matmul %191, %185, %cst_132 {dimension_numbers = #tpu.dot_dimension_numbers<[1], [0], [0], [1], [0, 0, 1, 1], [], []>} : vector<2x8xf32>, vector<8x128xf32>, vector<2x128xf32> -> vector<2x128xf32>
    %c0_133 = arith.constant 0 : index
    %c0_134 = arith.constant 0 : index
    %193 = vector.load %arg16[%c0_133, %c0_134] : memref<2x1152xf32, #tpu.memory_space<vmem>>, vector<2x128xf32>
    tpu.vector_store %arg16[%c0_133, %c0_134], %192 {strides = array<i32>} : memref<2x1152xf32, #tpu.memory_space<vmem>>, vector<2x128xf32>,
    %c1_135 = arith.constant 1 : index
    %c0_136 = arith.constant 0 : index
    %c0_137 = arith.constant 0 : index
    %194 = vector.load %arg7[%c1_135, %c0_136, %c0_137] : memref<9x2x8xbf16, #tpu.memory_space<vmem>>, vector<1x2x8xbf16>
    %195 = vector.shape_cast %194 : vector<1x2x8xbf16> to vector<2x8xbf16>
    %196 = arith.extf %195 : vector<2x8xbf16> to vector<2x8xf32>
    %cst_138 = arith.constant dense<0.000000e+00> : vector<2x128xf32>
    %197 = tpu.matmul %196, %185, %cst_138 {dimension_numbers = #tpu.dot_dimension_numbers<[1], [0], [0], [1], [0, 0, 1, 1], [], []>} : vector<2x8xf32>, vector<8x128xf32>, vector<2x128xf32> -> vector<2x128xf32>
    %c0_139 = arith.constant 0 : index
    %c128_140 = arith.constant 128 : index
    %198 = vector.load %arg16[%c0_139, %c128_140] : memref<2x1152xf32, #tpu.memory_space<vmem>>, vector<2x128xf32>
    tpu.vector_store %arg16[%c0_139, %c128_140], %197 {strides = array<i32>} : memref<2x1152xf32, #tpu.memory_space<vmem>>, vector<2x128xf32>,
    %c2_141 = arith.constant 2 : index
    %c0_142 = arith.constant 0 : index
    %c0_143 = arith.constant 0 : index
    %199 = vector.load %arg7[%c2_141, %c0_142, %c0_143] : memref<9x2x8xbf16, #tpu.memory_space<vmem>>, vector<1x2x8xbf16>
    %200 = vector.shape_cast %199 : vector<1x2x8xbf16> to vector<2x8xbf16>
    %201 = arith.extf %200 : vector<2x8xbf16> to vector<2x8xf32>
    %cst_144 = arith.constant dense<0.000000e+00> : vector<2x128xf32>
    %202 = tpu.matmul %201, %185, %cst_144 {dimension_numbers = #tpu.dot_dimension_numbers<[1], [0], [0], [1], [0, 0, 1, 1], [], []>} : vector<2x8xf32>, vector<8x128xf32>, vector<2x128xf32> -> vector<2x128xf32>
    %c0_145 = arith.constant 0 : index
    %c256_146 = arith.constant 256 : index
    %203 = vector.load %arg16[%c0_145, %c256_146] : memref<2x1152xf32, #tpu.memory_space<vmem>>, vector<2x128xf32>
    tpu.vector_store %arg16[%c0_145, %c256_146], %202 {strides = array<i32>} : memref<2x1152xf32, #tpu.memory_space<vmem>>, vector<2x128xf32>,
    %c3_147 = arith.constant 3 : index
    %c0_148 = arith.constant 0 : index
    %c0_149 = arith.constant 0 : index
    %204 = vector.load %arg7[%c3_147, %c0_148, %c0_149] : memref<9x2x8xbf16, #tpu.memory_space<vmem>>, vector<1x2x8xbf16>
    %205 = vector.shape_cast %204 : vector<1x2x8xbf16> to vector<2x8xbf16>
    %206 = arith.extf %205 : vector<2x8xbf16> to vector<2x8xf32>
    %cst_150 = arith.constant dense<0.000000e+00> : vector<2x128xf32>
    %207 = tpu.matmul %206, %185, %cst_150 {dimension_numbers = #tpu.dot_dimension_numbers<[1], [0], [0], [1], [0, 0, 1, 1], [], []>} : vector<2x8xf32>, vector<8x128xf32>, vector<2x128xf32> -> vector<2x128xf32>
    %c0_151 = arith.constant 0 : index
    %c384_152 = arith.constant 384 : index
    %208 = vector.load %arg16[%c0_151, %c384_152] : memref<2x1152xf32, #tpu.memory_space<vmem>>, vector<2x128xf32>
    tpu.vector_store %arg16[%c0_151, %c384_152], %207 {strides = array<i32>} : memref<2x1152xf32, #tpu.memory_space<vmem>>, vector<2x128xf32>,
    %c4_153 = arith.constant 4 : index
    %c0_154 = arith.constant 0 : index
    %c0_155 = arith.constant 0 : index
    %209 = vector.load %arg7[%c4_153, %c0_154, %c0_155] : memref<9x2x8xbf16, #tpu.memory_space<vmem>>, vector<1x2x8xbf16>
    %210 = vector.shape_cast %209 : vector<1x2x8xbf16> to vector<2x8xbf16>
    %211 = arith.extf %210 : vector<2x8xbf16> to vector<2x8xf32>
    %cst_156 = arith.constant dense<0.000000e+00> : vector<2x128xf32>
    %212 = tpu.matmul %211, %185, %cst_156 {dimension_numbers = #tpu.dot_dimension_numbers<[1], [0], [0], [1], [0, 0, 1, 1], [], []>} : vector<2x8xf32>, vector<8x128xf32>, vector<2x128xf32> -> vector<2x128xf32>
    %c0_157 = arith.constant 0 : index
    %c512_158 = arith.constant 512 : index
    %213 = vector.load %arg16[%c0_157, %c512_158] : memref<2x1152xf32, #tpu.memory_space<vmem>>, vector<2x128xf32>
    tpu.vector_store %arg16[%c0_157, %c512_158], %212 {strides = array<i32>} : memref<2x1152xf32, #tpu.memory_space<vmem>>, vector<2x128xf32>,
    %c5_159 = arith.constant 5 : index
    %c0_160 = arith.constant 0 : index
    %c0_161 = arith.constant 0 : index
    %214 = vector.load %arg7[%c5_159, %c0_160, %c0_161] : memref<9x2x8xbf16, #tpu.memory_space<vmem>>, vector<1x2x8xbf16>
    %215 = vector.shape_cast %214 : vector<1x2x8xbf16> to vector<2x8xbf16>
    %216 = arith.extf %215 : vector<2x8xbf16> to vector<2x8xf32>
    %cst_162 = arith.constant dense<0.000000e+00> : vector<2x128xf32>
    %217 = tpu.matmul %216, %185, %cst_162 {dimension_numbers = #tpu.dot_dimension_numbers<[1], [0], [0], [1], [0, 0, 1, 1], [], []>} : vector<2x8xf32>, vector<8x128xf32>, vector<2x128xf32> -> vector<2x128xf32>
    %c0_163 = arith.constant 0 : index
    %c640 = arith.constant 640 : index
    %218 = vector.load %arg16[%c0_163, %c640] : memref<2x1152xf32, #tpu.memory_space<vmem>>, vector<2x128xf32>
    tpu.vector_store %arg16[%c0_163, %c640], %217 {strides = array<i32>} : memref<2x1152xf32, #tpu.memory_space<vmem>>, vector<2x128xf32>,
    %c6_164 = arith.constant 6 : index
    %c0_165 = arith.constant 0 : index
    %c0_166 = arith.constant 0 : index
    %219 = vector.load %arg7[%c6_164, %c0_165, %c0_166] : memref<9x2x8xbf16, #tpu.memory_space<vmem>>, vector<1x2x8xbf16>
    %220 = vector.shape_cast %219 : vector<1x2x8xbf16> to vector<2x8xbf16>
    %221 = arith.extf %220 : vector<2x8xbf16> to vector<2x8xf32>
    %cst_167 = arith.constant dense<0.000000e+00> : vector<2x128xf32>
    %222 = tpu.matmul %221, %185, %cst_167 {dimension_numbers = #tpu.dot_dimension_numbers<[1], [0], [0], [1], [0, 0, 1, 1], [], []>} : vector<2x8xf32>, vector<8x128xf32>, vector<2x128xf32> -> vector<2x128xf32>
    %c0_168 = arith.constant 0 : index
    %c768 = arith.constant 768 : index
    %223 = vector.load %arg16[%c0_168, %c768] : memref<2x1152xf32, #tpu.memory_space<vmem>>, vector<2x128xf32>
    tpu.vector_store %arg16[%c0_168, %c768], %222 {strides = array<i32>} : memref<2x1152xf32, #tpu.memory_space<vmem>>, vector<2x128xf32>,
    %c7_169 = arith.constant 7 : index
    %c0_170 = arith.constant 0 : index
    %c0_171 = arith.constant 0 : index
    %224 = vector.load %arg7[%c7_169, %c0_170, %c0_171] : memref<9x2x8xbf16, #tpu.memory_space<vmem>>, vector<1x2x8xbf16>
    %225 = vector.shape_cast %224 : vector<1x2x8xbf16> to vector<2x8xbf16>
    %226 = arith.extf %225 : vector<2x8xbf16> to vector<2x8xf32>
    %cst_172 = arith.constant dense<0.000000e+00> : vector<2x128xf32>
    %227 = tpu.matmul %226, %185, %cst_172 {dimension_numbers = #tpu.dot_dimension_numbers<[1], [0], [0], [1], [0, 0, 1, 1], [], []>} : vector<2x8xf32>, vector<8x128xf32>, vector<2x128xf32> -> vector<2x128xf32>
    %c0_173 = arith.constant 0 : index
    %c896 = arith.constant 896 : index
    %228 = vector.load %arg16[%c0_173, %c896] : memref<2x1152xf32, #tpu.memory_space<vmem>>, vector<2x128xf32>
    tpu.vector_store %arg16[%c0_173, %c896], %227 {strides = array<i32>} : memref<2x1152xf32, #tpu.memory_space<vmem>>, vector<2x128xf32>,
    %c8_174 = arith.constant 8 : index
    %c0_175 = arith.constant 0 : index
    %c0_176 = arith.constant 0 : index
    %229 = vector.load %arg7[%c8_174, %c0_175, %c0_176] : memref<9x2x8xbf16, #tpu.memory_space<vmem>>, vector<1x2x8xbf16>
    %230 = vector.shape_cast %229 : vector<1x2x8xbf16> to vector<2x8xbf16>
    %231 = arith.extf %230 : vector<2x8xbf16> to vector<2x8xf32>
    %cst_177 = arith.constant dense<0.000000e+00> : vector<2x128xf32>
    %232 = tpu.matmul %231, %185, %cst_177 {dimension_numbers = #tpu.dot_dimension_numbers<[1], [0], [0], [1], [0, 0, 1, 1], [], []>} : vector<2x8xf32>, vector<8x128xf32>, vector<2x128xf32> -> vector<2x128xf32>
    %c0_178 = arith.constant 0 : index
    %c1024 = arith.constant 1024 : index
    %233 = vector.load %arg16[%c0_178, %c1024] : memref<2x1152xf32, #tpu.memory_space<vmem>>, vector<2x128xf32>
    tpu.vector_store %arg16[%c0_178, %c1024], %232 {strides = array<i32>} : memref<2x1152xf32, #tpu.memory_space<vmem>>, vector<2x128xf32>,
    %c0_179 = arith.constant 0 : index
    %c0_180 = arith.constant 0 : index
    %234 = vector.load %arg16[%c0_179, %c0_180] : memref<2x1152xf32, #tpu.memory_space<vmem>>, vector<2x1152xf32>
    %cst_181 = arith.constant dense<0.000000e+00> : vector<2x256xf32>
    %235 = tpu.matmul %234, %188, %cst_181 {dimension_numbers = #tpu.dot_dimension_numbers<[1], [0], [0], [1], [0, 0, 1, 1], [], []>} : vector<2x1152xf32>, vector<1152x256xf32>, vector<2x256xf32> -> vector<2x256xf32>
    %c0_182 = arith.constant 0 : index
    %c0_183 = arith.constant 0 : index
    %236 = vector.load %arg12[%c0_182, %c0_183] : memref<2x256xf32, #tpu.memory_space<vmem>>, vector<2x256xf32>
    %cst_184 = arith.constant dense<0.000000e+00> : vector<256xf32>
    %237 = vector.multi_reduction <add>, %235, %cst_184 [0] : vector<2x256xf32> to vector<256xf32>
    %238 = vector.shape_cast %237 : vector<256xf32> to vector<1x256xf32>
    %cst_185 = arith.constant 2.000000e+00 : f32
    %239 = vector.broadcast %cst_185 : f32 to vector<1x256xf32>
    %240 = arith.divf %238, %239 : vector<1x256xf32>
    %241 = vector.broadcast %240 : vector<1x256xf32> to vector<2x256xf32>
    %242 = arith.subf %235, %241 : vector<2x256xf32>
    %243 = arith.mulf %242, %242 : vector<2x256xf32>
    %cst_186 = arith.constant dense<0.000000e+00> : vector<256xf32>
    %244 = vector.multi_reduction <add>, %243, %cst_186 [0] : vector<2x256xf32> to vector<256xf32>
    %245 = vector.shape_cast %244 : vector<256xf32> to vector<1x256xf32>
    %cst_187 = arith.constant 2.000000e+00 : f32
    %246 = vector.broadcast %cst_187 : f32 to vector<1x256xf32>
    %247 = arith.divf %245, %246 : vector<1x256xf32>
    %cst_188 = arith.constant 9.99999974E-6 : f32
    %248 = vector.broadcast %cst_188 : f32 to vector<1x256xf32>
    %249 = arith.addf %247, %248 : vector<1x256xf32>
    %250 = math.rsqrt %249 : vector<1x256xf32>
    %251 = vector.broadcast %240 : vector<1x256xf32> to vector<2x256xf32>
    %252 = arith.subf %235, %251 : vector<2x256xf32>
    %253 = vector.broadcast %250 : vector<1x256xf32> to vector<2x256xf32>
    %254 = arith.mulf %252, %253 : vector<2x256xf32>
    %255 = vector.extract_strided_slice %236 {offsets = [0, 0], sizes = [1, 256], strides = [1, 1]} : vector<2x256xf32> to vector<1x256xf32>
    %256 = vector.broadcast %255 : vector<1x256xf32> to vector<2x256xf32>
    %257 = arith.mulf %254, %256 : vector<2x256xf32>
    %258 = vector.extract_strided_slice %236 {offsets = [1, 0], sizes = [1, 256], strides = [1, 1]} : vector<2x256xf32> to vector<1x256xf32>
    %259 = vector.broadcast %258 : vector<1x256xf32> to vector<2x256xf32>
    %260 = arith.addf %257, %259 : vector<2x256xf32>
    %cst_189 = arith.constant 0.000000e+00 : f32
    %261 = vector.broadcast %cst_189 : f32 to vector<2x256xf32>
    %262 = arith.maximumf %260, %261 : vector<2x256xf32>
    %c0_190 = arith.constant 0 : index
    %c0_191 = arith.constant 0 : index
    %263 = vector.load %arg13[%c0_190, %c0_191] : memref<2x256xf32, #tpu.memory_space<vmem>>, vector<2x256xf32>
    tpu.vector_store %arg13[%c0_190, %c0_191], %262 {strides = array<i32>} : memref<2x256xf32, #tpu.memory_space<vmem>>, vector<2x256xf32>,
    return
  }
  func.func @transform_0(%arg0: i32) -> (i32, i32) {
    %c0_i32 = arith.constant 0 : i32
    %c0_i32_0 = arith.constant 0 : i32
    %c0_i32_1 = arith.constant 0 : i32
    return %c0_i32, %c0_i32_0 : i32, i32
  }
  func.func @transform_1(%arg0: i32) -> (i32, i32) {
    %c0_i32 = arith.constant 0 : i32
    %c0_i32_0 = arith.constant 0 : i32
    %c0_i32_1 = arith.constant 0 : i32
    return %c0_i32, %c0_i32_0 : i32, i32
  }
  func.func @transform_2(%arg0: i32) -> (i32, i32, i32) {
    %c0_i32 = arith.constant 0 : i32
    %c0_i32_0 = arith.constant 0 : i32
    %c0_i32_1 = arith.constant 0 : i32
    %c0_i32_2 = arith.constant 0 : i32
    return %c0_i32, %c0_i32_0, %c0_i32_1 : i32, i32, i32
  }
  func.func @transform_3(%arg0: i32) -> (i32, i32) {
    %c0_i32 = arith.constant 0 : i32
    %c0_i32_0 = arith.constant 0 : i32
    %c0_i32_1 = arith.constant 0 : i32
    return %c0_i32, %c0_i32_0 : i32, i32
  }
  func.func @transform_4(%arg0: i32) -> (i32, i32, i32) {
    %c0_i32 = arith.constant 0 : i32
    %c0_i32_0 = arith.constant 0 : i32
    %c0_i32_1 = arith.constant 0 : i32
    %c0_i32_2 = arith.constant 0 : i32
    return %c0_i32, %c0_i32_0, %c0_i32_1 : i32, i32, i32
  }
  func.func @transform_6(%arg0: i32) -> (i32, i32, i32) {
    %c0_i32 = arith.constant 0 : i32
    %c0_i32_0 = arith.constant 0 : i32
    %c0_i32_1 = arith.constant 0 : i32
    %c0_i32_2 = arith.constant 0 : i32
    return %c0_i32, %c0_i32_0, %c0_i32_1 : i32, i32, i32
  }
  func.func @transform_8(%arg0: i32) -> (i32, i32) {
    %c0_i32 = arith.constant 0 : i32
    %c0_i32_0 = arith.constant 0 : i32
    %c0_i32_1 = arith.constant 0 : i32
    return %c0_i32, %c0_i32_0 : i32, i32
  }
  func.func @transform_9(%arg0: i32) -> (i32, i32) {
    %c0_i32 = arith.constant 0 : i32
    %c0_i32_0 = arith.constant 0 : i32
    %c0_i32_1 = arith.constant 0 : i32
    return %c0_i32, %c0_i32_0 : i32, i32
  }
  func.func @transform_10(%arg0: i32) -> (i32, i32) {
    %c0_i32 = arith.constant 0 : i32
    %c0_i32_0 = arith.constant 0 : i32
    %c0_i32_1 = arith.constant 0 : i32
    return %c0_i32, %c0_i32_0 : i32, i32
  }
  func.func @transform_11(%arg0: i32) -> (i32, i32) {
    %c0_i32 = arith.constant 0 : i32
    %c0_i32_0 = arith.constant 0 : i32
    %c0_i32_1 = arith.constant 0 : i32
    return %c0_i32, %c0_i32_0 : i32, i32
  }
  func.func @transform_12(%arg0: i32) -> (i32, i32) {
    %c0_i32 = arith.constant 0 : i32
    %c0_i32_0 = arith.constant 0 : i32
    %c0_i32_1 = arith.constant 0 : i32
    return %c0_i32, %c0_i32_0 : i32, i32
  }
}

</mosaic_0001>

<bundles_post_ra>
// kernel: encoder_forward.1
= control target key start
LH: loop header
LB: loop body
LE: loop exit
PB: predicated region body
PF: predicated region fallthrough
CT: control target
= control target key end

     0   :  { %s6666_s0 = inlined_call_operand.vmem [shape: f32[128,27], index: 0, kind: input, shape index: {}]   ;;  %s6667_s1 = inlined_call_operand.vmem [shape: f32[27,32], index: 1, kind: input, shape index: {}]   ;;  %s6668_s2 = inlined_call_operand.vmem [shape: bf16[9,32,128], index: 2, kind: input, shape index: {}]   ;;  %s6669_s3 = inlined_call_operand.vmem [shape: f32[288,64], index: 3, kind: input, shape index: {}]   ;;  %s6670_s4 = inlined_call_operand.vmem [shape: bf16[9,8,32], index: 4, kind: input, shape index: {}]   ;;  %s6671_s5 = inlined_call_operand.vmem [shape: f32[576,128], index: 5, kind: input, shape index: {}]   ;;  %s6672_s6 = inlined_call_operand.vmem [shape: bf16[9,2,8], index: 6, kind: input, shape index: {}]   ;;  %s6673_s7 = inlined_call_operand.vmem [shape: f32[1152,256], index: 7, kind: input, shape index: {}]   ;;  %s6674_s8 = inlined_call_operand.vmem [shape: f32[2,32], index: 8, kind: input, shape index: {}]   ;;  %s6675_s9 = inlined_call_operand.vmem [shape: f32[2,64], index: 9, kind: input, shape index: {}]   ;;  %s6676_s10 = inlined_call_operand.vmem [shape: f32[2,128], index: 10, kind: input, shape index: {}]   ;;  %s6677_s11 = inlined_call_operand.vmem [shape: f32[2,256], index: 11, kind: input, shape index: {}]   ;;  %s6678_s12 = inlined_call_operand.vmem [shape: f32[2,256], index: 12, kind: output, shape index: {}]  }
   0x1   :  { %v3643_v0 = vld [vmem:[%s6671_s5] sm:$0xff]  ;;  %v3648_v1 = vld [vmem:[%s6671_s5 + $0x8] sm:$0xff]  ;;  %v3653_v2 = vld [vmem:[%s6671_s5 + $0x10] sm:$0xff] }
   0x2   :  { %v3658_v3 = vld [vmem:[%s6671_s5 + $0x18] sm:$0xff]  ;;  %v3663_v4 = vld [vmem:[%s6671_s5 + $0x20] sm:$0xff]  ;;  %v3668_v5 = vld [vmem:[%s6671_s5 + $0x28] sm:$0xff] }
   0x3   :  { %v3673_v6 = vld [vmem:[%s6671_s5 + $0x30] sm:$0xff]  ;;  %v3678_v7 = vld [vmem:[%s6671_s5 + $0x38] sm:$0xff]  ;;  %v3683_v8 = vld [vmem:[%s6671_s5 + $0x40] sm:$0xff] }
   0x4   :  { %v3688_v9 = vld [vmem:[%s6671_s5 + $0x48] sm:$0xff]  ;;  %v3693_v10 = vld [vmem:[%s6671_s5 + $0x50] sm:$0xff]  ;;  %v3698_v11 = vld [vmem:[%s6671_s5 + $0x58] sm:$0xff] }
   0x5   :  { %v3703_v12 = vld [vmem:[%s6671_s5 + $0x60] sm:$0xff]  ;;  %v3708_v13 = vld [vmem:[%s6671_s5 + $0x68] sm:$0xff]  ;;  %v3713_v14 = vld [vmem:[%s6671_s5 + $0x70] sm:$0xff] }
   0x6   :  { %v3718_v15 = vld [vmem:[%s6671_s5 + $0x78] sm:$0xff]  ;;  %v3723_v16 = vld [vmem:[%s6671_s5 + $0x80] sm:$0xff]  ;;  %v3728_v17 = vld [vmem:[%s6671_s5 + $0x88] sm:$0xff] }
   0x7   :  { %6679 = vst [vmem:[#allocation12_spill] sm:$0xff] %v3723_v16  ;;  %v3733_v18 = vld [vmem:[%s6671_s5 + $0x90] sm:$0xff]  ;;  %v3738_v19 = vld [vmem:[%s6671_s5 + $0x98] sm:$0xff]  ;;  %v3743_v20 = vld [vmem:[%s6671_s5 + $0xa0] sm:$0xff] }
   0x8   :  { %6680 = vst [vmem:[#allocation13_spill] sm:$0xff] %v3728_v17  ;;  %v3748_v21 = vld [vmem:[%s6671_s5 + $0xa8] sm:$0xff]  ;;  %v3753_v22 = vld [vmem:[%s6671_s5 + $0xb0] sm:$0xff]  ;;  %v3758_v23 = vld [vmem:[%s6671_s5 + $0xb8] sm:$0xff] }
   0x9   :  { %6681 = vst [vmem:[#allocation14_spill] sm:$0xff] %v3733_v18  ;;  %v3763_v24 = vld [vmem:[%s6671_s5 + $0xc0] sm:$0xff]  ;;  %v3768_v25 = vld [vmem:[%s6671_s5 + $0xc8] sm:$0xff]  ;;  %v3773_v26 = vld [vmem:[%s6671_s5 + $0xd0] sm:$0xff] }
   0xa   :  { %6682 = vst [vmem:[#allocation15_spill] sm:$0xff] %v3738_v19  ;;  %v3778_v27 = vld [vmem:[%s6671_s5 + $0xd8] sm:$0xff]  ;;  %v3783_v28 = vld [vmem:[%s6671_s5 + $0xe0] sm:$0xff]  ;;  %v3788_v29 = vld [vmem:[%s6671_s5 + $0xe8] sm:$0xff] }
   0xb   :  { %6683 = vst [vmem:[#allocation16_spill] sm:$0xff] %v3743_v20  ;;  %v3793_v30 = vld [vmem:[%s6671_s5 + $0xf0] sm:$0xff]  ;;  %v3798_v31 = vld [vmem:[%s6671_s5 + $0xf8] sm:$0xff]  ;;  %v3803_v32 = vld [vmem:[%s6671_s5 + $0x100] sm:$0xff] }
   0xc   :  { %6684 = vst [vmem:[#allocation17_spill] sm:$0xff] %v3803_v32  ;;  %v3808_v33 = vld [vmem:[%s6671_s5 + $0x108] sm:$0xff]  ;;  %v3813_v34 = vld [vmem:[%s6671_s5 + $0x110] sm:$0xff]  ;;  %v3818_v35 = vld [vmem:[%s6671_s5 + $0x118] sm:$0xff] }
   0xd   :  { %6685 = vst [vmem:[#allocation18_spill] sm:$0xff] %v3808_v33  ;;  %v3823_v36 = vld [vmem:[%s6671_s5 + $0x120] sm:$0xff]  ;;  %v3828_v37 = vld [vmem:[%s6671_s5 + $0x128] sm:$0xff]  ;;  %v3833_v38 = vld [vmem:[%s6671_s5 + $0x130] sm:$0xff] }
   0xe   :  { %6686 = vst [vmem:[#allocation19_spill] sm:$0xff] %v3813_v34  ;;  %v3838_v39 = vld [vmem:[%s6671_s5 + $0x138] sm:$0xff]  ;;  %v3843_v40 = vld [vmem:[%s6671_s5 + $0x140] sm:$0xff]  ;;  %v3848_v41 = vld [vmem:[%s6671_s5 + $0x148] sm:$0xff] }
   0xf   :  { %6687 = vst [vmem:[#allocation20_spill] sm:$0xff] %v3818_v35  ;;  %v3853_v42 = vld [vmem:[%s6671_s5 + $0x150] sm:$0xff]  ;;  %v3858_v43 = vld [vmem:[%s6671_s5 + $0x158] sm:$0xff]  ;;  %v3863_v44 = vld [vmem:[%s6671_s5 + $0x160] sm:$0xff] }
  0x10   :  { %6688 = vst [vmem:[#allocation21_spill] sm:$0xff] %v3823_v36  ;;  %v3868_v45 = vld [vmem:[%s6671_s5 + $0x168] sm:$0xff]  ;;  %v3873_v46 = vld [vmem:[%s6671_s5 + $0x170] sm:$0xff]  ;;  %v3878_v47 = vld [vmem:[%s6671_s5 + $0x178] sm:$0xff] }
  0x11   :  { %6689 = vst [vmem:[#allocation22_spill] sm:$0xff] %v3828_v37  ;;  %v3883_v48 = vld [vmem:[%s6671_s5 + $0x180] sm:$0xff]  ;;  %v3888_v49 = vld [vmem:[%s6671_s5 + $0x188] sm:$0xff]  ;;  %v3893_v50 = vld [vmem:[%s6671_s5 + $0x190] sm:$0xff] }
  0x12   :  { %6690 = vst [vmem:[#allocation23_spill] sm:$0xff] %v3833_v38  ;;  %v3898_v51 = vld [vmem:[%s6671_s5 + $0x198] sm:$0xff]  ;;  %v3903_v52 = vld [vmem:[%s6671_s5 + $0x1a0] sm:$0xff]  ;;  %v3908_v53 = vld [vmem:[%s6671_s5 + $0x1a8] sm:$0xff] }
  0x13   :  { %6691 = vst [vmem:[#allocation24_spill] sm:$0xff] %v3838_v39  ;;  %v3913_v54 = vld [vmem:[%s6671_s5 + $0x1b0] sm:$0xff]  ;;  %v3918_v55 = vld [vmem:[%s6671_s5 + $0x1b8] sm:$0xff]  ;;  %v3923_v56 = vld [vmem:[%s6671_s5 + $0x1c0] sm:$0xff] }
  0x14   :  { %6692 = vst [vmem:[#allocation25_spill] sm:$0xff] %v3843_v40  ;;  %v3928_v57 = vld [vmem:[%s6671_s5 + $0x1c8] sm:$0xff]  ;;  %v3933_v58 = vld [vmem:[%s6671_s5 + $0x1d0] sm:$0xff]  ;;  %v3938_v59 = vld [vmem:[%s6671_s5 + $0x1d8] sm:$0xff] }
  0x15   :  { %6693 = vst [vmem:[#allocation26_spill] sm:$0xff] %v3848_v41  ;;  %v3943_v60 = vld [vmem:[%s6671_s5 + $0x1e0] sm:$0xff]  ;;  %v3948_v61 = vld [vmem:[%s6671_s5 + $0x1e8] sm:$0xff]  ;;  %v3953_v62 = vld [vmem:[%s6671_s5 + $0x1f0] sm:$0xff] }
  0x16   :  { %6694 = vst [vmem:[#allocation27_spill] sm:$0xff] %v3853_v42  ;;  %v3958_v63 = vld [vmem:[%s6671_s5 + $0x1f8] sm:$0xff] }
  0x17   :  { %6695 = vst [vmem:[#allocation28_spill] sm:$0xff] %v3858_v43 }
  0x18   :  { %6696 = vst [vmem:[#allocation29_spill] sm:$0xff] %v3863_v44 }
  0x19   :  { %6697 = vst [vmem:[#allocation30_spill] sm:$0xff] %v3868_v45 }
  0x1a   :  { %6698 = vst [vmem:[#allocation31_spill] sm:$0xff] %v3873_v46 }
  0x1b   :  { %6699 = vst [vmem:[#allocation32_spill] sm:$0xff] %v3878_v47 }
  0x1c   :  { %6700 = vst [vmem:[#allocation33_spill] sm:$0xff] %v3883_v48  ;;  %v3963_v48 = vld [vmem:[%s6671_s5 + $0x200] sm:$0xff] }
  0x1d   :  { %6701 = vst [vmem:[#allocation34_spill] sm:$0xff] %v3888_v49  ;;  %v3968_v49 = vld [vmem:[%s6671_s5 + $0x208] sm:$0xff] }
  0x1e   :  { %6702 = vst [vmem:[#allocation35_spill] sm:$0xff] %v3893_v50  ;;  %v3973_v50 = vld [vmem:[%s6671_s5 + $0x210] sm:$0xff] }
  0x1f   :  { %6703 = vst [vmem:[#allocation36_spill] sm:$0xff] %v3898_v51  ;;  %v3978_v51 = vld [vmem:[%s6671_s5 + $0x218] sm:$0xff] }
  0x20   :  { %6704 = vst [vmem:[#allocation37_spill] sm:$0xff] %v3903_v52  ;;  %v3983_v52 = vld [vmem:[%s6671_s5 + $0x220] sm:$0xff] }
  0x21   :  { %6705 = vst [vmem:[#allocation38_spill] sm:$0xff] %v3908_v53  ;;  %v3988_v53 = vld [vmem:[%s6671_s5 + $0x228] sm:$0xff] }
  0x22   :  { %6706 = vst [vmem:[#allocation39_spill] sm:$0xff] %v3913_v54  ;;  %v3993_v54 = vld [vmem:[%s6671_s5 + $0x230] sm:$0xff] }
  0x23   :  { %6707 = vst [vmem:[#allocation40_spill] sm:$0xff] %v3918_v55  ;;  %v3998_v55 = vld [vmem:[%s6671_s5 + $0x238] sm:$0xff] }
  0x24   :  { %6708 = vst [vmem:[#allocation41_spill] sm:$0xff] %v3923_v56 }
  0x25   :  { %6709 = vst [vmem:[#allocation42_spill] sm:$0xff] %v3928_v57 }
  0x26   :  { %6710 = vst [vmem:[#allocation43_spill] sm:$0xff] %v3933_v58 }
  0x27   :  { %6711 = vst [vmem:[#allocation44_spill] sm:$0xff] %v3938_v59 }
  0x28   :  { %6712 = vst [vmem:[#allocation45_spill] sm:$0xff] %v3943_v60 }
  0x29   :  { %6713 = vst [vmem:[#allocation46_spill] sm:$0xff] %v3948_v61 }
  0x2a   :  { %6714 = vst [vmem:[#allocation47_spill] sm:$0xff] %v3953_v62 }
  0x2b   :  { %6715 = vst [vmem:[#allocation48_spill] sm:$0xff] %v3958_v63 }
  0x2c   :  { %6716 = vst [vmem:[#allocation49_spill] sm:$0xff] %v3963_v48 }
  0x2d   :  { %6717 = vst [vmem:[#allocation50_spill] sm:$0xff] %v3968_v49 }
  0x2e   :  { %6718 = vst [vmem:[#allocation51_spill] sm:$0xff] %v3973_v50 }
  0x2f   :  { %6719 = vst [vmem:[#allocation52_spill] sm:$0xff] %v3978_v51 }
  0x30   :  { %6720 = vst [vmem:[#allocation53_spill] sm:$0xff] %v3983_v52 }
  0x31   :  { %6721 = vst [vmem:[#allocation54_spill] sm:$0xff] %v3988_v53 }
  0x32   :  { %6722 = vst [vmem:[#allocation55_spill] sm:$0xff] %v3993_v54 }
  0x33   :  { %6723 = vst [vmem:[#allocation56_spill] sm:$0xff] %v3998_v55 }
  0x34   :  { %196 = vsyncadd [#allocation7], 9216  ;;  %v4003_v56 = vld [vmem:[%s6673_s7] sm:$0xff]  ;;  %v4008_v57 = vld [vmem:[%s6673_s7 + $0x8] sm:$0xff] }
  0x35   :  { %6724 = vst [vmem:[#allocation57_spill] sm:$0xff] %v4003_v56  ;;  %v4013_v58 = vld [vmem:[%s6673_s7 + $0x10] sm:$0xff]  ;;  %v4018_v59 = vld [vmem:[%s6673_s7 + $0x18] sm:$0xff]  ;;  %v4023_v60 = vld [vmem:[%s6673_s7 + $0x20] sm:$0xff] }
  0x36   :  { %6725 = vst [vmem:[#allocation58_spill] sm:$0xff] %v4008_v57  ;;  %v4028_v56 = vld [vmem:[%s6673_s7 + $0x28] sm:$0xff]  ;;  %v4033_v57 = vld [vmem:[%s6673_s7 + $0x30] sm:$0xff] }
  0x37   :  { %6726 = vst [vmem:[#allocation59_spill] sm:$0xff] %v4013_v58  ;;  %v4038_v58 = vld [vmem:[%s6673_s7 + $0x38] sm:$0xff] }
  0x38   :  { %6727 = vst [vmem:[#allocation60_spill] sm:$0xff] %v4018_v59  ;;  %v4043_v59 = vld [vmem:[%s6673_s7 + $0x40] sm:$0xff] }
  0x39   :  { %6728 = vst [vmem:[#allocation61_spill] sm:$0xff] %v4023_v60  ;;  %v4048_v60 = vld [vmem:[%s6673_s7 + $0x48] sm:$0xff] }
  0x3a   :  { %6729 = vst [vmem:[#allocation62_spill] sm:$0xff] %v4028_v56  ;;  %v4053_v56 = vld [vmem:[%s6673_s7 + $0x50] sm:$0xff] }
  0x3b   :  { %6730 = vst [vmem:[#allocation63_spill] sm:$0xff] %v4033_v57  ;;  %v4058_v57 = vld [vmem:[%s6673_s7 + $0x58] sm:$0xff] }
  0x3c   :  { %6731 = vst [vmem:[#allocation64_spill] sm:$0xff] %v4038_v58  ;;  %v4063_v58 = vld [vmem:[%s6673_s7 + $0x60] sm:$0xff] }
  0x3d   :  { %6732 = vst [vmem:[#allocation65_spill] sm:$0xff] %v4043_v59  ;;  %v4068_v59 = vld [vmem:[%s6673_s7 + $0x68] sm:$0xff] }
  0x3e   :  { %6733 = vst [vmem:[#allocation66_spill] sm:$0xff] %v4048_v60  ;;  %v4073_v60 = vld [vmem:[%s6673_s7 + $0x70] sm:$0xff] }
  0x3f   :  { %6734 = vst [vmem:[#allocation67_spill] sm:$0xff] %v4053_v56  ;;  %v4078_v56 = vld [vmem:[%s6673_s7 + $0x78] sm:$0xff] }
  0x40   :  { %6735 = vst [vmem:[#allocation68_spill] sm:$0xff] %v4058_v57  ;;  %v4083_v57 = vld [vmem:[%s6673_s7 + $0x80] sm:$0xff] }
  0x41   :  { %6736 = vst [vmem:[#allocation69_spill] sm:$0xff] %v4063_v58  ;;  %v4088_v58 = vld [vmem:[%s6673_s7 + $0x88] sm:$0xff] }
  0x42   :  { %6737 = vst [vmem:[#allocation70_spill] sm:$0xff] %v4068_v59  ;;  %v4093_v59 = vld [vmem:[%s6673_s7 + $0x90] sm:$0xff] }
  0x43   :  { %6738 = vst [vmem:[#allocation71_spill] sm:$0xff] %v4073_v60  ;;  %v4098_v60 = vld [vmem:[%s6673_s7 + $0x98] sm:$0xff] }
  0x44   :  { %6739 = vst [vmem:[#allocation72_spill] sm:$0xff] %v4078_v56  ;;  %v4103_v56 = vld [vmem:[%s6673_s7 + $0xa0] sm:$0xff] }
  0x45   :  { %6740 = vst [vmem:[#allocation73_spill] sm:$0xff] %v4083_v57  ;;  %v4108_v57 = vld [vmem:[%s6673_s7 + $0xa8] sm:$0xff] }
  0x46   :  { %6741 = vst [vmem:[#allocation74_spill] sm:$0xff] %v4088_v58  ;;  %v4113_v58 = vld [vmem:[%s6673_s7 + $0xb0] sm:$0xff] }
  0x47   :  { %6742 = vst [vmem:[#allocation75_spill] sm:$0xff] %v4093_v59  ;;  %v4118_v59 = vld [vmem:[%s6673_s7 + $0xb8] sm:$0xff] }
  0x48   :  { %6743 = vst [vmem:[#allocation76_spill] sm:$0xff] %v4098_v60  ;;  %v4123_v60 = vld [vmem:[%s6673_s7 + $0xc0] sm:$0xff] }
  0x49   :  { %6744 = vst [vmem:[#allocation77_spill] sm:$0xff] %v4103_v56  ;;  %v4128_v56 = vld [vmem:[%s6673_s7 + $0xc8] sm:$0xff] }
  0x4a   :  { %6745 = vst [vmem:[#allocation78_spill] sm:$0xff] %v4108_v57  ;;  %v4133_v57 = vld [vmem:[%s6673_s7 + $0xd0] sm:$0xff] }
  0x4b   :  { %6746 = vst [vmem:[#allocation79_spill] sm:$0xff] %v4113_v58  ;;  %v4138_v58 = vld [vmem:[%s6673_s7 + $0xd8] sm:$0xff] }
  0x4c   :  { %6747 = vst [vmem:[#allocation80_spill] sm:$0xff] %v4118_v59  ;;  %v4143_v59 = vld [vmem:[%s6673_s7 + $0xe0] sm:$0xff] }
  0x4d   :  { %6748 = vst [vmem:[#allocation81_spill] sm:$0xff] %v4123_v60  ;;  %v4148_v60 = vld [vmem:[%s6673_s7 + $0xe8] sm:$0xff] }
  0x4e   :  { %6749 = vst [vmem:[#allocation82_spill] sm:$0xff] %v4128_v56  ;;  %v4153_v56 = vld [vmem:[%s6673_s7 + $0xf0] sm:$0xff] }
  0x4f   :  { %6750 = vst [vmem:[#allocation83_spill] sm:$0xff] %v4133_v57  ;;  %v4158_v57 = vld [vmem:[%s6673_s7 + $0xf8] sm:$0xff] }
  0x50   :  { %6751 = vst [vmem:[#allocation84_spill] sm:$0xff] %v4138_v58  ;;  %v4163_v58 = vld [vmem:[%s6673_s7 + $0x100] sm:$0xff] }
  0x51   :  { %6752 = vst [vmem:[#allocation85_spill] sm:$0xff] %v4143_v59  ;;  %v4168_v59 = vld [vmem:[%s6673_s7 + $0x108] sm:$0xff] }
  0x52   :  { %6753 = vst [vmem:[#allocation86_spill] sm:$0xff] %v4148_v60  ;;  %v4173_v60 = vld [vmem:[%s6673_s7 + $0x110] sm:$0xff] }
  0x53   :  { %6754 = vst [vmem:[#allocation87_spill] sm:$0xff] %v4153_v56  ;;  %v4178_v56 = vld [vmem:[%s6673_s7 + $0x118] sm:$0xff] }
  0x54   :  { %6755 = vst [vmem:[#allocation88_spill] sm:$0xff] %v4158_v57  ;;  %v4183_v57 = vld [vmem:[%s6673_s7 + $0x120] sm:$0xff] }
  0x55   :  { %6756 = vst [vmem:[#allocation89_spill] sm:$0xff] %v4163_v58  ;;  %v4188_v58 = vld [vmem:[%s6673_s7 + $0x128] sm:$0xff] }
  0x56   :  { %6757 = vst [vmem:[#allocation90_spill] sm:$0xff] %v4168_v59  ;;  %v4193_v59 = vld [vmem:[%s6673_s7 + $0x130] sm:$0xff] }
  0x57   :  { %6758 = vst [vmem:[#allocation91_spill] sm:$0xff] %v4173_v60  ;;  %v4198_v60 = vld [vmem:[%s6673_s7 + $0x138] sm:$0xff] }
  0x58   :  { %6759 = vst [vmem:[#allocation92_spill] sm:$0xff] %v4178_v56  ;;  %v4203_v56 = vld [vmem:[%s6673_s7 + $0x140] sm:$0xff] }
  0x59   :  { %6760 = vst [vmem:[#allocation93_spill] sm:$0xff] %v4183_v57  ;;  %v4208_v57 = vld [vmem:[%s6673_s7 + $0x148] sm:$0xff] }
  0x5a   :  { %6761 = vst [vmem:[#allocation94_spill] sm:$0xff] %v4188_v58  ;;  %v4213_v58 = vld [vmem:[%s6673_s7 + $0x150] sm:$0xff] }
  0x5b   :  { %6762 = vst [vmem:[#allocation95_spill] sm:$0xff] %v4193_v59  ;;  %v4218_v59 = vld [vmem:[%s6673_s7 + $0x158] sm:$0xff] }
  0x5c   :  { %6763 = vst [vmem:[#allocation96_spill] sm:$0xff] %v4198_v60  ;;  %v4223_v60 = vld [vmem:[%s6673_s7 + $0x160] sm:$0xff] }
  0x5d   :  { %6764 = vst [vmem:[#allocation97_spill] sm:$0xff] %v4203_v56  ;;  %v4228_v56 = vld [vmem:[%s6673_s7 + $0x168] sm:$0xff] }
  0x5e   :  { %6765 = vst [vmem:[#allocation98_spill] sm:$0xff] %v4208_v57  ;;  %v4233_v57 = vld [vmem:[%s6673_s7 + $0x170] sm:$0xff] }
  0x5f   :  { %6766 = vst [vmem:[#allocation99_spill] sm:$0xff] %v4213_v58  ;;  %v4238_v58 = vld [vmem:[%s6673_s7 + $0x178] sm:$0xff] }
  0x60   :  { %6767 = vst [vmem:[#allocation100_spill] sm:$0xff] %v4218_v59  ;;  %v4243_v59 = vld [vmem:[%s6673_s7 + $0x180] sm:$0xff] }
  0x61   :  { %6768 = vst [vmem:[#allocation101_spill] sm:$0xff] %v4223_v60  ;;  %v4248_v60 = vld [vmem:[%s6673_s7 + $0x188] sm:$0xff] }
  0x62   :  { %6769 = vst [vmem:[#allocation102_spill] sm:$0xff] %v4228_v56  ;;  %v4253_v56 = vld [vmem:[%s6673_s7 + $0x190] sm:$0xff] }
  0x63   :  { %6770 = vst [vmem:[#allocation103_spill] sm:$0xff] %v4233_v57  ;;  %v4258_v57 = vld [vmem:[%s6673_s7 + $0x198] sm:$0xff] }
  0x64   :  { %6771 = vst [vmem:[#allocation104_spill] sm:$0xff] %v4238_v58  ;;  %v4263_v58 = vld [vmem:[%s6673_s7 + $0x1a0] sm:$0xff] }
  0x65   :  { %6772 = vst [vmem:[#allocation105_spill] sm:$0xff] %v4243_v59  ;;  %v4268_v59 = vld [vmem:[%s6673_s7 + $0x1a8] sm:$0xff] }
  0x66   :  { %6773 = vst [vmem:[#allocation106_spill] sm:$0xff] %v4248_v60  ;;  %v4273_v60 = vld [vmem:[%s6673_s7 + $0x1b0] sm:$0xff] }
  0x67   :  { %6774 = vst [vmem:[#allocation107_spill] sm:$0xff] %v4253_v56  ;;  %v4278_v56 = vld [vmem:[%s6673_s7 + $0x1b8] sm:$0xff] }
  0x68   :  { %6775 = vst [vmem:[#allocation108_spill] sm:$0xff] %v4258_v57  ;;  %v4283_v57 = vld [vmem:[%s6673_s7 + $0x1c0] sm:$0xff] }
  0x69   :  { %6776 = vst [vmem:[#allocation109_spill] sm:$0xff] %v4263_v58  ;;  %v4288_v58 = vld [vmem:[%s6673_s7 + $0x1c8] sm:$0xff] }
  0x6a   :  { %6777 = vst [vmem:[#allocation110_spill] sm:$0xff] %v4268_v59  ;;  %v4293_v59 = vld [vmem:[%s6673_s7 + $0x1d0] sm:$0xff] }
  0x6b   :  { %6778 = vst [vmem:[#allocation111_spill] sm:$0xff] %v4273_v60  ;;  %v4298_v60 = vld [vmem:[%s6673_s7 + $0x1d8] sm:$0xff] }
  0x6c   :  { %6779 = vst [vmem:[#allocation112_spill] sm:$0xff] %v4278_v56  ;;  %v4303_v56 = vld [vmem:[%s6673_s7 + $0x1e0] sm:$0xff] }
  0x6d   :  { %6780 = vst [vmem:[#allocation113_spill] sm:$0xff] %v4283_v57  ;;  %v4308_v57 = vld [vmem:[%s6673_s7 + $0x1e8] sm:$0xff] }
  0x6e   :  { %6781 = vst [vmem:[#allocation114_spill] sm:$0xff] %v4288_v58  ;;  %v4313_v58 = vld [vmem:[%s6673_s7 + $0x1f0] sm:$0xff] }
  0x6f   :  { %6782 = vst [vmem:[#allocation115_spill] sm:$0xff] %v4293_v59  ;;  %v4318_v59 = vld [vmem:[%s6673_s7 + $0x1f8] sm:$0xff] }
  0x70   :  { %6783 = vst [vmem:[#allocation116_spill] sm:$0xff] %v4298_v60  ;;  %v4323_v60 = vld [vmem:[%s6673_s7 + $0x200] sm:$0xff] }
  0x71   :  { %6784 = vst [vmem:[#allocation117_spill] sm:$0xff] %v4303_v56  ;;  %v4328_v56 = vld [vmem:[%s6673_s7 + $0x208] sm:$0xff] }
  0x72   :  { %6785 = vst [vmem:[#allocation118_spill] sm:$0xff] %v4308_v57  ;;  %v4333_v57 = vld [vmem:[%s6673_s7 + $0x210] sm:$0xff] }
  0x73   :  { %6786 = vst [vmem:[#allocation119_spill] sm:$0xff] %v4313_v58  ;;  %v4338_v58 = vld [vmem:[%s6673_s7 + $0x218] sm:$0xff] }
  0x74   :  { %6787 = vst [vmem:[#allocation120_spill] sm:$0xff] %v4318_v59  ;;  %v4343_v59 = vld [vmem:[%s6673_s7 + $0x220] sm:$0xff] }
  0x75   :  { %6788 = vst [vmem:[#allocation121_spill] sm:$0xff] %v4323_v60  ;;  %v4348_v60 = vld [vmem:[%s6673_s7 + $0x228] sm:$0xff] }
  0x76   :  { %6789 = vst [vmem:[#allocation122_spill] sm:$0xff] %v4328_v56  ;;  %v4353_v56 = vld [vmem:[%s6673_s7 + $0x230] sm:$0xff] }
  0x77   :  { %6790 = vst [vmem:[#allocation123_spill] sm:$0xff] %v4333_v57  ;;  %v4358_v57 = vld [vmem:[%s6673_s7 + $0x238] sm:$0xff] }
  0x78   :  { %6791 = vst [vmem:[#allocation124_spill] sm:$0xff] %v4338_v58  ;;  %v4363_v58 = vld [vmem:[%s6673_s7 + $0x240] sm:$0xff] }
  0x79   :  { %6792 = vst [vmem:[#allocation125_spill] sm:$0xff] %v4343_v59  ;;  %v4368_v59 = vld [vmem:[%s6673_s7 + $0x248] sm:$0xff] }
  0x7a   :  { %6793 = vst [vmem:[#allocation126_spill] sm:$0xff] %v4348_v60  ;;  %v4373_v60 = vld [vmem:[%s6673_s7 + $0x250] sm:$0xff] }
  0x7b   :  { %6794 = vst [vmem:[#allocation127_spill] sm:$0xff] %v4353_v56  ;;  %v4378_v56 = vld [vmem:[%s6673_s7 + $0x258] sm:$0xff] }
  0x7c   :  { %6795 = vst [vmem:[#allocation128_spill] sm:$0xff] %v4358_v57  ;;  %v4383_v57 = vld [vmem:[%s6673_s7 + $0x260] sm:$0xff] }
  0x7d   :  { %6796 = vst [vmem:[#allocation129_spill] sm:$0xff] %v4363_v58  ;;  %v4388_v58 = vld [vmem:[%s6673_s7 + $0x268] sm:$0xff] }
  0x7e   :  { %6797 = vst [vmem:[#allocation130_spill] sm:$0xff] %v4368_v59  ;;  %v4393_v59 = vld [vmem:[%s6673_s7 + $0x270] sm:$0xff] }
  0x7f   :  { %6798 = vst [vmem:[#allocation131_spill] sm:$0xff] %v4373_v60  ;;  %v4398_v60 = vld [vmem:[%s6673_s7 + $0x278] sm:$0xff] }
  0x80   :  { %6799 = vst [vmem:[#allocation132_spill] sm:$0xff] %v4378_v56  ;;  %v4403_v56 = vld [vmem:[%s6673_s7 + $0x280] sm:$0xff] }
  0x81   :  { %6800 = vst [vmem:[#allocation133_spill] sm:$0xff] %v4383_v57  ;;  %v4408_v57 = vld [vmem:[%s6673_s7 + $0x288] sm:$0xff] }
  0x82   :  { %6801 = vst [vmem:[#allocation134_spill] sm:$0xff] %v4388_v58  ;;  %v4413_v58 = vld [vmem:[%s6673_s7 + $0x290] sm:$0xff] }
  0x83   :  { %6802 = vst [vmem:[#allocation135_spill] sm:$0xff] %v4393_v59  ;;  %v4418_v59 = vld [vmem:[%s6673_s7 + $0x298] sm:$0xff] }
  0x84   :  { %6803 = vst [vmem:[#allocation136_spill] sm:$0xff] %v4398_v60  ;;  %v4423_v60 = vld [vmem:[%s6673_s7 + $0x2a0] sm:$0xff] }
  0x85   :  { %6804 = vst [vmem:[#allocation137_spill] sm:$0xff] %v4403_v56  ;;  %v4428_v56 = vld [vmem:[%s6673_s7 + $0x2a8] sm:$0xff] }
  0x86   :  { %6805 = vst [vmem:[#allocation138_spill] sm:$0xff] %v4408_v57  ;;  %v4433_v57 = vld [vmem:[%s6673_s7 + $0x2b0] sm:$0xff] }
  0x87   :  { %6806 = vst [vmem:[#allocation139_spill] sm:$0xff] %v4413_v58  ;;  %v4438_v58 = vld [vmem:[%s6673_s7 + $0x2b8] sm:$0xff] }
  0x88   :  { %6807 = vst [vmem:[#allocation140_spill] sm:$0xff] %v4418_v59  ;;  %v4443_v59 = vld [vmem:[%s6673_s7 + $0x2c0] sm:$0xff] }
  0x89   :  { %6808 = vst [vmem:[#allocation141_spill] sm:$0xff] %v4423_v60  ;;  %v4448_v60 = vld [vmem:[%s6673_s7 + $0x2c8] sm:$0xff] }
  0x8a   :  { %6809 = vst [vmem:[#allocation142_spill] sm:$0xff] %v4428_v56  ;;  %v4453_v56 = vld [vmem:[%s6673_s7 + $0x2d0] sm:$0xff] }
  0x8b   :  { %6810 = vst [vmem:[#allocation143_spill] sm:$0xff] %v4433_v57  ;;  %v4458_v57 = vld [vmem:[%s6673_s7 + $0x2d8] sm:$0xff] }
  0x8c   :  { %6811 = vst [vmem:[#allocation144_spill] sm:$0xff] %v4438_v58  ;;  %v4463_v58 = vld [vmem:[%s6673_s7 + $0x2e0] sm:$0xff] }
  0x8d   :  { %6812 = vst [vmem:[#allocation145_spill] sm:$0xff] %v4443_v59  ;;  %v4468_v59 = vld [vmem:[%s6673_s7 + $0x2e8] sm:$0xff] }
  0x8e   :  { %6813 = vst [vmem:[#allocation146_spill] sm:$0xff] %v4448_v60  ;;  %v4473_v60 = vld [vmem:[%s6673_s7 + $0x2f0] sm:$0xff] }
  0x8f   :  { %6814 = vst [vmem:[#allocation147_spill] sm:$0xff] %v4453_v56  ;;  %v4478_v56 = vld [vmem:[%s6673_s7 + $0x2f8] sm:$0xff] }
  0x90   :  { %6815 = vst [vmem:[#allocation148_spill] sm:$0xff] %v4458_v57  ;;  %v4483_v57 = vld [vmem:[%s6673_s7 + $0x300] sm:$0xff] }
  0x91   :  { %6816 = vst [vmem:[#allocation149_spill] sm:$0xff] %v4463_v58  ;;  %v4488_v58 = vld [vmem:[%s6673_s7 + $0x308] sm:$0xff] }
  0x92   :  { %6817 = vst [vmem:[#allocation150_spill] sm:$0xff] %v4468_v59  ;;  %v4493_v59 = vld [vmem:[%s6673_s7 + $0x310] sm:$0xff] }
  0x93   :  { %6818 = vst [vmem:[#allocation151_spill] sm:$0xff] %v4473_v60  ;;  %v4498_v60 = vld [vmem:[%s6673_s7 + $0x318] sm:$0xff] }
  0x94   :  { %6819 = vst [vmem:[#allocation152_spill] sm:$0xff] %v4478_v56  ;;  %v4503_v56 = vld [vmem:[%s6673_s7 + $0x320] sm:$0xff] }
  0x95   :  { %6820 = vst [vmem:[#allocation153_spill] sm:$0xff] %v4483_v57  ;;  %v4508_v57 = vld [vmem:[%s6673_s7 + $0x328] sm:$0xff] }
  0x96   :  { %6821 = vst [vmem:[#allocation154_spill] sm:$0xff] %v4488_v58  ;;  %v4513_v58 = vld [vmem:[%s6673_s7 + $0x330] sm:$0xff] }
  0x97   :  { %6822 = vst [vmem:[#allocation155_spill] sm:$0xff] %v4493_v59  ;;  %v4518_v59 = vld [vmem:[%s6673_s7 + $0x338] sm:$0xff] }
  0x98   :  { %6823 = vst [vmem:[#allocation156_spill] sm:$0xff] %v4498_v60  ;;  %v4523_v60 = vld [vmem:[%s6673_s7 + $0x340] sm:$0xff] }
  0x99   :  { %6824 = vst [vmem:[#allocation157_spill] sm:$0xff] %v4503_v56  ;;  %v4528_v56 = vld [vmem:[%s6673_s7 + $0x348] sm:$0xff] }
  0x9a   :  { %6825 = vst [vmem:[#allocation158_spill] sm:$0xff] %v4508_v57  ;;  %v4533_v57 = vld [vmem:[%s6673_s7 + $0x350] sm:$0xff] }
  0x9b   :  { %6826 = vst [vmem:[#allocation159_spill] sm:$0xff] %v4513_v58  ;;  %v4538_v58 = vld [vmem:[%s6673_s7 + $0x358] sm:$0xff] }
  0x9c   :  { %6827 = vst [vmem:[#allocation160_spill] sm:$0xff] %v4518_v59  ;;  %v4543_v59 = vld [vmem:[%s6673_s7 + $0x360] sm:$0xff] }
  0x9d   :  { %6828 = vst [vmem:[#allocation161_spill] sm:$0xff] %v4523_v60  ;;  %v4548_v60 = vld [vmem:[%s6673_s7 + $0x368] sm:$0xff] }
  0x9e   :  { %6829 = vst [vmem:[#allocation162_spill] sm:$0xff] %v4528_v56  ;;  %v4553_v56 = vld [vmem:[%s6673_s7 + $0x370] sm:$0xff] }
  0x9f   :  { %6830 = vst [vmem:[#allocation163_spill] sm:$0xff] %v4533_v57  ;;  %v4558_v57 = vld [vmem:[%s6673_s7 + $0x378] sm:$0xff] }
  0xa0   :  { %6831 = vst [vmem:[#allocation164_spill] sm:$0xff] %v4538_v58  ;;  %v4563_v58 = vld [vmem:[%s6673_s7 + $0x380] sm:$0xff] }
  0xa1   :  { %6832 = vst [vmem:[#allocation165_spill] sm:$0xff] %v4543_v59  ;;  %v4568_v59 = vld [vmem:[%s6673_s7 + $0x388] sm:$0xff] }
  0xa2   :  { %6833 = vst [vmem:[#allocation166_spill] sm:$0xff] %v4548_v60  ;;  %v4573_v60 = vld [vmem:[%s6673_s7 + $0x390] sm:$0xff] }
  0xa3   :  { %6834 = vst [vmem:[#allocation167_spill] sm:$0xff] %v4553_v56  ;;  %v4578_v56 = vld [vmem:[%s6673_s7 + $0x398] sm:$0xff] }
  0xa4   :  { %6835 = vst [vmem:[#allocation168_spill] sm:$0xff] %v4558_v57  ;;  %v4583_v57 = vld [vmem:[%s6673_s7 + $0x3a0] sm:$0xff] }
  0xa5   :  { %6836 = vst [vmem:[#allocation169_spill] sm:$0xff] %v4563_v58  ;;  %v4588_v58 = vld [vmem:[%s6673_s7 + $0x3a8] sm:$0xff] }
  0xa6   :  { %6837 = vst [vmem:[#allocation170_spill] sm:$0xff] %v4568_v59  ;;  %v4593_v59 = vld [vmem:[%s6673_s7 + $0x3b0] sm:$0xff] }
  0xa7   :  { %6838 = vst [vmem:[#allocation171_spill] sm:$0xff] %v4573_v60  ;;  %v4598_v60 = vld [vmem:[%s6673_s7 + $0x3b8] sm:$0xff] }
  0xa8   :  { %6839 = vst [vmem:[#allocation172_spill] sm:$0xff] %v4578_v56  ;;  %v4603_v56 = vld [vmem:[%s6673_s7 + $0x3c0] sm:$0xff] }
  0xa9   :  { %6840 = vst [vmem:[#allocation173_spill] sm:$0xff] %v4583_v57  ;;  %v4608_v57 = vld [vmem:[%s6673_s7 + $0x3c8] sm:$0xff] }
  0xaa   :  { %6841 = vst [vmem:[#allocation174_spill] sm:$0xff] %v4588_v58  ;;  %v4613_v58 = vld [vmem:[%s6673_s7 + $0x3d0] sm:$0xff] }
  0xab   :  { %6842 = vst [vmem:[#allocation175_spill] sm:$0xff] %v4593_v59  ;;  %v4618_v59 = vld [vmem:[%s6673_s7 + $0x3d8] sm:$0xff] }
  0xac   :  { %6843 = vst [vmem:[#allocation176_spill] sm:$0xff] %v4598_v60  ;;  %v4623_v60 = vld [vmem:[%s6673_s7 + $0x3e0] sm:$0xff] }
  0xad   :  { %6844 = vst [vmem:[#allocation177_spill] sm:$0xff] %v4603_v56  ;;  %v4628_v56 = vld [vmem:[%s6673_s7 + $0x3e8] sm:$0xff] }
  0xae   :  { %6845 = vst [vmem:[#allocation178_spill] sm:$0xff] %v4608_v57  ;;  %v4633_v57 = vld [vmem:[%s6673_s7 + $0x3f0] sm:$0xff] }
  0xaf   :  { %6846 = vst [vmem:[#allocation179_spill] sm:$0xff] %v4613_v58  ;;  %v4638_v58 = vld [vmem:[%s6673_s7 + $0x3f8] sm:$0xff] }
  0xb0   :  { %6847 = vst [vmem:[#allocation180_spill] sm:$0xff] %v4618_v59  ;;  %v4643_v59 = vld [vmem:[%s6673_s7 + $0x400] sm:$0xff] }
  0xb1   :  { %6848 = vst [vmem:[#allocation181_spill] sm:$0xff] %v4623_v60  ;;  %v4648_v60 = vld [vmem:[%s6673_s7 + $0x408] sm:$0xff] }
  0xb2   :  { %6849 = vst [vmem:[#allocation182_spill] sm:$0xff] %v4628_v56  ;;  %v4653_v56 = vld [vmem:[%s6673_s7 + $0x410] sm:$0xff] }
  0xb3   :  { %6850 = vst [vmem:[#allocation183_spill] sm:$0xff] %v4633_v57  ;;  %v4658_v57 = vld [vmem:[%s6673_s7 + $0x418] sm:$0xff] }
  0xb4   :  { %6851 = vst [vmem:[#allocation184_spill] sm:$0xff] %v4638_v58  ;;  %v4663_v58 = vld [vmem:[%s6673_s7 + $0x420] sm:$0xff] }
  0xb5   :  { %6852 = vst [vmem:[#allocation185_spill] sm:$0xff] %v4643_v59  ;;  %v4668_v59 = vld [vmem:[%s6673_s7 + $0x428] sm:$0xff] }
  0xb6   :  { %6853 = vst [vmem:[#allocation186_spill] sm:$0xff] %v4648_v60  ;;  %v4673_v60 = vld [vmem:[%s6673_s7 + $0x430] sm:$0xff] }
  0xb7   :  { %6854 = vst [vmem:[#allocation187_spill] sm:$0xff] %v4653_v56  ;;  %v4678_v56 = vld [vmem:[%s6673_s7 + $0x438] sm:$0xff] }
  0xb8   :  { %6855 = vst [vmem:[#allocation188_spill] sm:$0xff] %v4658_v57  ;;  %v4683_v57 = vld [vmem:[%s6673_s7 + $0x440] sm:$0xff] }
  0xb9   :  { %6856 = vst [vmem:[#allocation189_spill] sm:$0xff] %v4663_v58  ;;  %v4688_v58 = vld [vmem:[%s6673_s7 + $0x448] sm:$0xff] }
  0xba   :  { %6857 = vst [vmem:[#allocation190_spill] sm:$0xff] %v4668_v59  ;;  %v4693_v59 = vld [vmem:[%s6673_s7 + $0x450] sm:$0xff] }
  0xbb   :  { %6858 = vst [vmem:[#allocation191_spill] sm:$0xff] %v4673_v60  ;;  %v4698_v60 = vld [vmem:[%s6673_s7 + $0x458] sm:$0xff] }
  0xbc   :  { %6859 = vst [vmem:[#allocation192_spill] sm:$0xff] %v4678_v56  ;;  %v4703_v56 = vld [vmem:[%s6673_s7 + $0x460] sm:$0xff] }
  0xbd   :  { %6860 = vst [vmem:[#allocation193_spill] sm:$0xff] %v4683_v57  ;;  %v4708_v57 = vld [vmem:[%s6673_s7 + $0x468] sm:$0xff] }
  0xbe   :  { %6861 = vst [vmem:[#allocation194_spill] sm:$0xff] %v4688_v58  ;;  %v4713_v58 = vld [vmem:[%s6673_s7 + $0x470] sm:$0xff] }
  0xbf   :  { %6862 = vst [vmem:[#allocation195_spill] sm:$0xff] %v4693_v59  ;;  %v4718_v59 = vld [vmem:[%s6673_s7 + $0x478] sm:$0xff] }
  0xc0   :  { %6863 = vst [vmem:[#allocation196_spill] sm:$0xff] %v4698_v60  ;;  %v4723_v60 = vld [vmem:[%s6673_s7 + $0x480] sm:$0xff] }
  0xc1   :  { %6864 = vst [vmem:[#allocation197_spill] sm:$0xff] %v4703_v56  ;;  %v4728_v56 = vld [vmem:[%s6673_s7 + $0x488] sm:$0xff] }
  0xc2   :  { %6865 = vst [vmem:[#allocation198_spill] sm:$0xff] %v4708_v57  ;;  %v4733_v57 = vld [vmem:[%s6673_s7 + $0x490] sm:$0xff] }
  0xc3   :  { %6866 = vst [vmem:[#allocation199_spill] sm:$0xff] %v4713_v58  ;;  %v4738_v58 = vld [vmem:[%s6673_s7 + $0x498] sm:$0xff] }
  0xc4   :  { %6867 = vst [vmem:[#allocation200_spill] sm:$0xff] %v4718_v59  ;;  %v4743_v59 = vld [vmem:[%s6673_s7 + $0x4a0] sm:$0xff] }
  0xc5   :  { %6868 = vst [vmem:[#allocation201_spill] sm:$0xff] %v4723_v60  ;;  %v4748_v60 = vld [vmem:[%s6673_s7 + $0x4a8] sm:$0xff] }
  0xc6   :  { %6869 = vst [vmem:[#allocation202_spill] sm:$0xff] %v4728_v56  ;;  %v4753_v56 = vld [vmem:[%s6673_s7 + $0x4b0] sm:$0xff] }
  0xc7   :  { %6870 = vst [vmem:[#allocation203_spill] sm:$0xff] %v4733_v57  ;;  %v4758_v57 = vld [vmem:[%s6673_s7 + $0x4b8] sm:$0xff] }
  0xc8   :  { %6871 = vst [vmem:[#allocation204_spill] sm:$0xff] %v4738_v58  ;;  %v4763_v58 = vld [vmem:[%s6673_s7 + $0x4c0] sm:$0xff] }
  0xc9   :  { %6872 = vst [vmem:[#allocation205_spill] sm:$0xff] %v4743_v59  ;;  %v4768_v59 = vld [vmem:[%s6673_s7 + $0x4c8] sm:$0xff] }
  0xca   :  { %6873 = vst [vmem:[#allocation206_spill] sm:$0xff] %v4748_v60  ;;  %v4773_v60 = vld [vmem:[%s6673_s7 + $0x4d0] sm:$0xff] }
  0xcb   :  { %6874 = vst [vmem:[#allocation207_spill] sm:$0xff] %v4753_v56  ;;  %v4778_v56 = vld [vmem:[%s6673_s7 + $0x4d8] sm:$0xff] }
  0xcc   :  { %6875 = vst [vmem:[#allocation208_spill] sm:$0xff] %v4758_v57  ;;  %v4783_v57 = vld [vmem:[%s6673_s7 + $0x4e0] sm:$0xff] }
  0xcd   :  { %6876 = vst [vmem:[#allocation209_spill] sm:$0xff] %v4763_v58  ;;  %v4788_v58 = vld [vmem:[%s6673_s7 + $0x4e8] sm:$0xff] }
  0xce   :  { %6877 = vst [vmem:[#allocation210_spill] sm:$0xff] %v4768_v59  ;;  %v4793_v59 = vld [vmem:[%s6673_s7 + $0x4f0] sm:$0xff] }
  0xcf   :  { %6878 = vst [vmem:[#allocation211_spill] sm:$0xff] %v4773_v60  ;;  %v4798_v60 = vld [vmem:[%s6673_s7 + $0x4f8] sm:$0xff] }
  0xd0   :  { %6879 = vst [vmem:[#allocation212_spill] sm:$0xff] %v4778_v56  ;;  %v4803_v56 = vld [vmem:[%s6673_s7 + $0x500] sm:$0xff] }
  0xd1   :  { %6880 = vst [vmem:[#allocation213_spill] sm:$0xff] %v4783_v57  ;;  %v4808_v57 = vld [vmem:[%s6673_s7 + $0x508] sm:$0xff] }
  0xd2   :  { %6881 = vst [vmem:[#allocation214_spill] sm:$0xff] %v4788_v58  ;;  %v4813_v58 = vld [vmem:[%s6673_s7 + $0x510] sm:$0xff] }
  0xd3   :  { %6882 = vst [vmem:[#allocation215_spill] sm:$0xff] %v4793_v59  ;;  %v4818_v59 = vld [vmem:[%s6673_s7 + $0x518] sm:$0xff] }
  0xd4   :  { %6883 = vst [vmem:[#allocation216_spill] sm:$0xff] %v4798_v60  ;;  %v4823_v60 = vld [vmem:[%s6673_s7 + $0x520] sm:$0xff] }
  0xd5   :  { %6884 = vst [vmem:[#allocation217_spill] sm:$0xff] %v4803_v56  ;;  %v4828_v56 = vld [vmem:[%s6673_s7 + $0x528] sm:$0xff] }
  0xd6   :  { %6885 = vst [vmem:[#allocation218_spill] sm:$0xff] %v4808_v57  ;;  %v4833_v57 = vld [vmem:[%s6673_s7 + $0x530] sm:$0xff] }
  0xd7   :  { %6886 = vst [vmem:[#allocation219_spill] sm:$0xff] %v4813_v58  ;;  %v4838_v58 = vld [vmem:[%s6673_s7 + $0x538] sm:$0xff] }
  0xd8   :  { %6887 = vst [vmem:[#allocation220_spill] sm:$0xff] %v4818_v59  ;;  %v4843_v59 = vld [vmem:[%s6673_s7 + $0x540] sm:$0xff] }
  0xd9   :  { %6888 = vst [vmem:[#allocation221_spill] sm:$0xff] %v4823_v60  ;;  %v4848_v60 = vld [vmem:[%s6673_s7 + $0x548] sm:$0xff] }
  0xda   :  { %6889 = vst [vmem:[#allocation222_spill] sm:$0xff] %v4828_v56  ;;  %v4853_v56 = vld [vmem:[%s6673_s7 + $0x550] sm:$0xff] }
  0xdb   :  { %6890 = vst [vmem:[#allocation223_spill] sm:$0xff] %v4833_v57  ;;  %v4858_v57 = vld [vmem:[%s6673_s7 + $0x558] sm:$0xff] }
  0xdc   :  { %6891 = vst [vmem:[#allocation224_spill] sm:$0xff] %v4838_v58  ;;  %v4863_v58 = vld [vmem:[%s6673_s7 + $0x560] sm:$0xff] }
  0xdd   :  { %6892 = vst [vmem:[#allocation225_spill] sm:$0xff] %v4843_v59  ;;  %v4868_v59 = vld [vmem:[%s6673_s7 + $0x568] sm:$0xff] }
  0xde   :  { %6893 = vst [vmem:[#allocation226_spill] sm:$0xff] %v4848_v60  ;;  %v4873_v60 = vld [vmem:[%s6673_s7 + $0x570] sm:$0xff] }
  0xdf   :  { %6894 = vst [vmem:[#allocation227_spill] sm:$0xff] %v4853_v56  ;;  %v4878_v56 = vld [vmem:[%s6673_s7 + $0x578] sm:$0xff] }
  0xe0   :  { %6895 = vst [vmem:[#allocation228_spill] sm:$0xff] %v4858_v57  ;;  %v4883_v57 = vld [vmem:[%s6673_s7 + $0x580] sm:$0xff] }
  0xe1   :  { %6896 = vst [vmem:[#allocation229_spill] sm:$0xff] %v4863_v58  ;;  %v4888_v58 = vld [vmem:[%s6673_s7 + $0x588] sm:$0xff] }
  0xe2   :  { %6897 = vst [vmem:[#allocation230_spill] sm:$0xff] %v4868_v59  ;;  %v4893_v59 = vld [vmem:[%s6673_s7 + $0x590] sm:$0xff] }
  0xe3   :  { %6898 = vst [vmem:[#allocation231_spill] sm:$0xff] %v4873_v60  ;;  %v4898_v60 = vld [vmem:[%s6673_s7 + $0x598] sm:$0xff] }
  0xe4   :  { %6899 = vst [vmem:[#allocation232_spill] sm:$0xff] %v4878_v56  ;;  %v4903_v56 = vld [vmem:[%s6673_s7 + $0x5a0] sm:$0xff] }
  0xe5   :  { %6900 = vst [vmem:[#allocation233_spill] sm:$0xff] %v4883_v57  ;;  %v4908_v57 = vld [vmem:[%s6673_s7 + $0x5a8] sm:$0xff] }
  0xe6   :  { %6901 = vst [vmem:[#allocation234_spill] sm:$0xff] %v4888_v58  ;;  %v4913_v58 = vld [vmem:[%s6673_s7 + $0x5b0] sm:$0xff] }
  0xe7   :  { %6902 = vst [vmem:[#allocation235_spill] sm:$0xff] %v4893_v59  ;;  %v4918_v59 = vld [vmem:[%s6673_s7 + $0x5b8] sm:$0xff] }
  0xe8   :  { %6903 = vst [vmem:[#allocation236_spill] sm:$0xff] %v4898_v60  ;;  %v4923_v60 = vld [vmem:[%s6673_s7 + $0x5c0] sm:$0xff] }
  0xe9   :  { %6904 = vst [vmem:[#allocation237_spill] sm:$0xff] %v4903_v56  ;;  %v4928_v56 = vld [vmem:[%s6673_s7 + $0x5c8] sm:$0xff] }
  0xea   :  { %6905 = vst [vmem:[#allocation238_spill] sm:$0xff] %v4908_v57  ;;  %v4933_v57 = vld [vmem:[%s6673_s7 + $0x5d0] sm:$0xff] }
  0xeb   :  { %6906 = vst [vmem:[#allocation239_spill] sm:$0xff] %v4913_v58  ;;  %v4938_v58 = vld [vmem:[%s6673_s7 + $0x5d8] sm:$0xff] }
  0xec   :  { %6907 = vst [vmem:[#allocation240_spill] sm:$0xff] %v4918_v59  ;;  %v4943_v59 = vld [vmem:[%s6673_s7 + $0x5e0] sm:$0xff] }
  0xed   :  { %6908 = vst [vmem:[#allocation241_spill] sm:$0xff] %v4923_v60  ;;  %v4948_v60 = vld [vmem:[%s6673_s7 + $0x5e8] sm:$0xff] }
  0xee   :  { %6909 = vst [vmem:[#allocation242_spill] sm:$0xff] %v4928_v56  ;;  %v4953_v56 = vld [vmem:[%s6673_s7 + $0x5f0] sm:$0xff] }
  0xef   :  { %6910 = vst [vmem:[#allocation243_spill] sm:$0xff] %v4933_v57  ;;  %v4958_v57 = vld [vmem:[%s6673_s7 + $0x5f8] sm:$0xff] }
  0xf0   :  { %6911 = vst [vmem:[#allocation244_spill] sm:$0xff] %v4938_v58  ;;  %v4963_v58 = vld [vmem:[%s6673_s7 + $0x600] sm:$0xff] }
  0xf1   :  { %6912 = vst [vmem:[#allocation245_spill] sm:$0xff] %v4943_v59  ;;  %v4968_v59 = vld [vmem:[%s6673_s7 + $0x608] sm:$0xff] }
  0xf2   :  { %6913 = vst [vmem:[#allocation246_spill] sm:$0xff] %v4948_v60  ;;  %v4973_v60 = vld [vmem:[%s6673_s7 + $0x610] sm:$0xff] }
  0xf3   :  { %6914 = vst [vmem:[#allocation247_spill] sm:$0xff] %v4953_v56  ;;  %v4978_v56 = vld [vmem:[%s6673_s7 + $0x618] sm:$0xff] }
  0xf4   :  { %6915 = vst [vmem:[#allocation248_spill] sm:$0xff] %v4958_v57  ;;  %v4983_v57 = vld [vmem:[%s6673_s7 + $0x620] sm:$0xff] }
  0xf5   :  { %6916 = vst [vmem:[#allocation249_spill] sm:$0xff] %v4963_v58  ;;  %v4988_v58 = vld [vmem:[%s6673_s7 + $0x628] sm:$0xff] }
  0xf6   :  { %6917 = vst [vmem:[#allocation250_spill] sm:$0xff] %v4968_v59  ;;  %v4993_v59 = vld [vmem:[%s6673_s7 + $0x630] sm:$0xff] }
  0xf7   :  { %6918 = vst [vmem:[#allocation251_spill] sm:$0xff] %v4973_v60  ;;  %v4998_v60 = vld [vmem:[%s6673_s7 + $0x638] sm:$0xff] }
  0xf8   :  { %6919 = vst [vmem:[#allocation252_spill] sm:$0xff] %v4978_v56  ;;  %v5003_v56 = vld [vmem:[%s6673_s7 + $0x640] sm:$0xff] }
  0xf9   :  { %6920 = vst [vmem:[#allocation253_spill] sm:$0xff] %v4983_v57  ;;  %v5008_v57 = vld [vmem:[%s6673_s7 + $0x648] sm:$0xff] }
  0xfa   :  { %6921 = vst [vmem:[#allocation254_spill] sm:$0xff] %v4988_v58  ;;  %v5013_v58 = vld [vmem:[%s6673_s7 + $0x650] sm:$0xff] }
  0xfb   :  { %6922 = vst [vmem:[#allocation255_spill] sm:$0xff] %v4993_v59  ;;  %v5018_v59 = vld [vmem:[%s6673_s7 + $0x658] sm:$0xff] }
  0xfc   :  { %6923 = vst [vmem:[#allocation256_spill] sm:$0xff] %v4998_v60  ;;  %v5023_v60 = vld [vmem:[%s6673_s7 + $0x660] sm:$0xff] }
  0xfd   :  { %6924 = vst [vmem:[#allocation257_spill] sm:$0xff] %v5003_v56  ;;  %v5028_v56 = vld [vmem:[%s6673_s7 + $0x668] sm:$0xff] }
  0xfe   :  { %6925 = vst [vmem:[#allocation258_spill] sm:$0xff] %v5008_v57  ;;  %v5033_v57 = vld [vmem:[%s6673_s7 + $0x670] sm:$0xff] }
  0xff   :  { %6926 = vst [vmem:[#allocation259_spill] sm:$0xff] %v5013_v58  ;;  %v5038_v58 = vld [vmem:[%s6673_s7 + $0x678] sm:$0xff] }
 0x100   :  { %6927 = vst [vmem:[#allocation260_spill] sm:$0xff] %v5018_v59  ;;  %v5043_v59 = vld [vmem:[%s6673_s7 + $0x680] sm:$0xff] }
 0x101   :  { %6928 = vst [vmem:[#allocation261_spill] sm:$0xff] %v5023_v60  ;;  %v5048_v60 = vld [vmem:[%s6673_s7 + $0x688] sm:$0xff] }
 0x102   :  { %6929 = vst [vmem:[#allocation262_spill] sm:$0xff] %v5028_v56  ;;  %v5053_v56 = vld [vmem:[%s6673_s7 + $0x690] sm:$0xff] }
 0x103   :  { %6930 = vst [vmem:[#allocation263_spill] sm:$0xff] %v5033_v57  ;;  %v5058_v57 = vld [vmem:[%s6673_s7 + $0x698] sm:$0xff] }
 0x104   :  { %6931 = vst [vmem:[#allocation264_spill] sm:$0xff] %v5038_v58  ;;  %v5063_v58 = vld [vmem:[%s6673_s7 + $0x6a0] sm:$0xff] }
 0x105   :  { %6932 = vst [vmem:[#allocation265_spill] sm:$0xff] %v5043_v59  ;;  %v5068_v59 = vld [vmem:[%s6673_s7 + $0x6a8] sm:$0xff] }
 0x106   :  { %6933 = vst [vmem:[#allocation266_spill] sm:$0xff] %v5048_v60  ;;  %v5073_v60 = vld [vmem:[%s6673_s7 + $0x6b0] sm:$0xff] }
 0x107   :  { %6934 = vst [vmem:[#allocation267_spill] sm:$0xff] %v5053_v56  ;;  %v5078_v56 = vld [vmem:[%s6673_s7 + $0x6b8] sm:$0xff] }
 0x108   :  { %6935 = vst [vmem:[#allocation268_spill] sm:$0xff] %v5058_v57  ;;  %v5083_v57 = vld [vmem:[%s6673_s7 + $0x6c0] sm:$0xff] }
 0x109   :  { %6936 = vst [vmem:[#allocation269_spill] sm:$0xff] %v5063_v58  ;;  %v5088_v58 = vld [vmem:[%s6673_s7 + $0x6c8] sm:$0xff] }
 0x10a   :  { %6937 = vst [vmem:[#allocation270_spill] sm:$0xff] %v5068_v59  ;;  %v5093_v59 = vld [vmem:[%s6673_s7 + $0x6d0] sm:$0xff] }
 0x10b   :  { %6938 = vst [vmem:[#allocation271_spill] sm:$0xff] %v5073_v60  ;;  %v5098_v60 = vld [vmem:[%s6673_s7 + $0x6d8] sm:$0xff] }
 0x10c   :  { %6939 = vst [vmem:[#allocation272_spill] sm:$0xff] %v5078_v56  ;;  %v5103_v56 = vld [vmem:[%s6673_s7 + $0x6e0] sm:$0xff] }
 0x10d   :  { %6940 = vst [vmem:[#allocation273_spill] sm:$0xff] %v5083_v57  ;;  %v5108_v57 = vld [vmem:[%s6673_s7 + $0x6e8] sm:$0xff] }
 0x10e   :  { %6941 = vst [vmem:[#allocation274_spill] sm:$0xff] %v5088_v58  ;;  %v5113_v58 = vld [vmem:[%s6673_s7 + $0x6f0] sm:$0xff] }
 0x10f   :  { %6942 = vst [vmem:[#allocation275_spill] sm:$0xff] %v5093_v59  ;;  %v5118_v59 = vld [vmem:[%s6673_s7 + $0x6f8] sm:$0xff] }
 0x110   :  { %6943 = vst [vmem:[#allocation276_spill] sm:$0xff] %v5098_v60  ;;  %v5123_v60 = vld [vmem:[%s6673_s7 + $0x700] sm:$0xff] }
 0x111   :  { %6944 = vst [vmem:[#allocation277_spill] sm:$0xff] %v5103_v56  ;;  %v5128_v56 = vld [vmem:[%s6673_s7 + $0x708] sm:$0xff] }
 0x112   :  { %6945 = vst [vmem:[#allocation278_spill] sm:$0xff] %v5108_v57  ;;  %v5133_v57 = vld [vmem:[%s6673_s7 + $0x710] sm:$0xff] }
 0x113   :  { %6946 = vst [vmem:[#allocation279_spill] sm:$0xff] %v5113_v58  ;;  %v5138_v58 = vld [vmem:[%s6673_s7 + $0x718] sm:$0xff] }
 0x114   :  { %6947 = vst [vmem:[#allocation280_spill] sm:$0xff] %v5118_v59  ;;  %v5143_v59 = vld [vmem:[%s6673_s7 + $0x720] sm:$0xff] }
 0x115   :  { %6948 = vst [vmem:[#allocation281_spill] sm:$0xff] %v5123_v60  ;;  %v5148_v60 = vld [vmem:[%s6673_s7 + $0x728] sm:$0xff] }
 0x116   :  { %6949 = vst [vmem:[#allocation282_spill] sm:$0xff] %v5128_v56  ;;  %v5153_v56 = vld [vmem:[%s6673_s7 + $0x730] sm:$0xff] }
 0x117   :  { %6950 = vst [vmem:[#allocation283_spill] sm:$0xff] %v5133_v57  ;;  %v5158_v57 = vld [vmem:[%s6673_s7 + $0x738] sm:$0xff] }
 0x118   :  { %6951 = vst [vmem:[#allocation284_spill] sm:$0xff] %v5138_v58  ;;  %v5163_v58 = vld [vmem:[%s6673_s7 + $0x740] sm:$0xff] }
 0x119   :  { %6952 = vst [vmem:[#allocation285_spill] sm:$0xff] %v5143_v59  ;;  %v5168_v59 = vld [vmem:[%s6673_s7 + $0x748] sm:$0xff] }
 0x11a   :  { %6953 = vst [vmem:[#allocation286_spill] sm:$0xff] %v5148_v60  ;;  %v5173_v60 = vld [vmem:[%s6673_s7 + $0x750] sm:$0xff] }
 0x11b   :  { %6954 = vst [vmem:[#allocation287_spill] sm:$0xff] %v5153_v56  ;;  %v5178_v56 = vld [vmem:[%s6673_s7 + $0x758] sm:$0xff] }
 0x11c   :  { %6955 = vst [vmem:[#allocation288_spill] sm:$0xff] %v5158_v57  ;;  %v5183_v57 = vld [vmem:[%s6673_s7 + $0x760] sm:$0xff] }
 0x11d   :  { %6956 = vst [vmem:[#allocation289_spill] sm:$0xff] %v5163_v58  ;;  %v5188_v58 = vld [vmem:[%s6673_s7 + $0x768] sm:$0xff] }
 0x11e   :  { %6957 = vst [vmem:[#allocation290_spill] sm:$0xff] %v5168_v59  ;;  %v5193_v59 = vld [vmem:[%s6673_s7 + $0x770] sm:$0xff] }
 0x11f   :  { %6958 = vst [vmem:[#allocation291_spill] sm:$0xff] %v5173_v60  ;;  %v5198_v60 = vld [vmem:[%s6673_s7 + $0x778] sm:$0xff] }
 0x120   :  { %6959 = vst [vmem:[#allocation292_spill] sm:$0xff] %v5178_v56  ;;  %v5203_v56 = vld [vmem:[%s6673_s7 + $0x780] sm:$0xff] }
 0x121   :  { %6960 = vst [vmem:[#allocation293_spill] sm:$0xff] %v5183_v57  ;;  %v5208_v57 = vld [vmem:[%s6673_s7 + $0x788] sm:$0xff] }
 0x122   :  { %6961 = vst [vmem:[#allocation294_spill] sm:$0xff] %v5188_v58  ;;  %v5213_v58 = vld [vmem:[%s6673_s7 + $0x790] sm:$0xff] }
 0x123   :  { %6962 = vst [vmem:[#allocation295_spill] sm:$0xff] %v5193_v59  ;;  %v5218_v59 = vld [vmem:[%s6673_s7 + $0x798] sm:$0xff] }
 0x124   :  { %6963 = vst [vmem:[#allocation296_spill] sm:$0xff] %v5198_v60  ;;  %v5223_v60 = vld [vmem:[%s6673_s7 + $0x7a0] sm:$0xff] }
 0x125   :  { %6964 = vst [vmem:[#allocation297_spill] sm:$0xff] %v5203_v56  ;;  %v5228_v56 = vld [vmem:[%s6673_s7 + $0x7a8] sm:$0xff] }
 0x126   :  { %6965 = vst [vmem:[#allocation298_spill] sm:$0xff] %v5208_v57  ;;  %v5233_v57 = vld [vmem:[%s6673_s7 + $0x7b0] sm:$0xff] }
 0x127   :  { %6966 = vst [vmem:[#allocation299_spill] sm:$0xff] %v5213_v58  ;;  %v5238_v58 = vld [vmem:[%s6673_s7 + $0x7b8] sm:$0xff] }
 0x128   :  { %6967 = vst [vmem:[#allocation300_spill] sm:$0xff] %v5218_v59  ;;  %v5243_v59 = vld [vmem:[%s6673_s7 + $0x7c0] sm:$0xff] }
 0x129   :  { %6968 = vst [vmem:[#allocation301_spill] sm:$0xff] %v5223_v60  ;;  %v5248_v60 = vld [vmem:[%s6673_s7 + $0x7c8] sm:$0xff] }
 0x12a   :  { %6969 = vst [vmem:[#allocation302_spill] sm:$0xff] %v5228_v56  ;;  %v5253_v56 = vld [vmem:[%s6673_s7 + $0x7d0] sm:$0xff] }
 0x12b   :  { %6970 = vst [vmem:[#allocation303_spill] sm:$0xff] %v5233_v57  ;;  %v5258_v57 = vld [vmem:[%s6673_s7 + $0x7d8] sm:$0xff] }
 0x12c   :  { %6971 = vst [vmem:[#allocation304_spill] sm:$0xff] %v5238_v58  ;;  %v5263_v58 = vld [vmem:[%s6673_s7 + $0x7e0] sm:$0xff] }
 0x12d   :  { %6972 = vst [vmem:[#allocation305_spill] sm:$0xff] %v5243_v59  ;;  %v5268_v59 = vld [vmem:[%s6673_s7 + $0x7e8] sm:$0xff] }
 0x12e   :  { %6973 = vst [vmem:[#allocation306_spill] sm:$0xff] %v5248_v60  ;;  %v5273_v60 = vld [vmem:[%s6673_s7 + $0x7f0] sm:$0xff] }
 0x12f   :  { %6974 = vst [vmem:[#allocation307_spill] sm:$0xff] %v5253_v56  ;;  %v5278_v56 = vld [vmem:[%s6673_s7 + $0x7f8] sm:$0xff] }
 0x130   :  { %6975 = vst [vmem:[#allocation308_spill] sm:$0xff] %v5258_v57  ;;  %v5283_v57 = vld [vmem:[%s6673_s7 + $0x800] sm:$0xff] }
 0x131   :  { %6976 = vst [vmem:[#allocation309_spill] sm:$0xff] %v5263_v58  ;;  %v5288_v58 = vld [vmem:[%s6673_s7 + $0x808] sm:$0xff] }
 0x132   :  { %6977 = vst [vmem:[#allocation310_spill] sm:$0xff] %v5268_v59  ;;  %v5293_v59 = vld [vmem:[%s6673_s7 + $0x810] sm:$0xff] }
 0x133   :  { %6978 = vst [vmem:[#allocation311_spill] sm:$0xff] %v5273_v60  ;;  %v5298_v60 = vld [vmem:[%s6673_s7 + $0x818] sm:$0xff] }
 0x134   :  { %6979 = vst [vmem:[#allocation312_spill] sm:$0xff] %v5278_v56  ;;  %v5303_v56 = vld [vmem:[%s6673_s7 + $0x820] sm:$0xff] }
 0x135   :  { %6980 = vst [vmem:[#allocation313_spill] sm:$0xff] %v5283_v57  ;;  %v5308_v57 = vld [vmem:[%s6673_s7 + $0x828] sm:$0xff] }
 0x136   :  { %6981 = vst [vmem:[#allocation314_spill] sm:$0xff] %v5288_v58  ;;  %v5313_v58 = vld [vmem:[%s6673_s7 + $0x830] sm:$0xff] }
 0x137   :  { %6982 = vst [vmem:[#allocation315_spill] sm:$0xff] %v5293_v59  ;;  %v5318_v59 = vld [vmem:[%s6673_s7 + $0x838] sm:$0xff] }
 0x138   :  { %6983 = vst [vmem:[#allocation316_spill] sm:$0xff] %v5298_v60  ;;  %v5323_v60 = vld [vmem:[%s6673_s7 + $0x840] sm:$0xff] }
 0x139   :  { %6984 = vst [vmem:[#allocation317_spill] sm:$0xff] %v5303_v56  ;;  %v5328_v56 = vld [vmem:[%s6673_s7 + $0x848] sm:$0xff] }
 0x13a   :  { %6985 = vst [vmem:[#allocation318_spill] sm:$0xff] %v5308_v57  ;;  %v5333_v57 = vld [vmem:[%s6673_s7 + $0x850] sm:$0xff] }
 0x13b   :  { %6986 = vst [vmem:[#allocation319_spill] sm:$0xff] %v5313_v58  ;;  %v5338_v58 = vld [vmem:[%s6673_s7 + $0x858] sm:$0xff] }
 0x13c   :  { %6987 = vst [vmem:[#allocation320_spill] sm:$0xff] %v5318_v59  ;;  %v5343_v59 = vld [vmem:[%s6673_s7 + $0x860] sm:$0xff] }
 0x13d   :  { %6988 = vst [vmem:[#allocation321_spill] sm:$0xff] %v5323_v60  ;;  %v5348_v60 = vld [vmem:[%s6673_s7 + $0x868] sm:$0xff] }
 0x13e   :  { %6989 = vst [vmem:[#allocation322_spill] sm:$0xff] %v5328_v56  ;;  %v5353_v56 = vld [vmem:[%s6673_s7 + $0x870] sm:$0xff] }
 0x13f   :  { %6990 = vst [vmem:[#allocation323_spill] sm:$0xff] %v5333_v57  ;;  %v5358_v57 = vld [vmem:[%s6673_s7 + $0x878] sm:$0xff] }
 0x140   :  { %6991 = vst [vmem:[#allocation324_spill] sm:$0xff] %v5338_v58  ;;  %v5363_v58 = vld [vmem:[%s6673_s7 + $0x880] sm:$0xff] }
 0x141   :  { %6992 = vst [vmem:[#allocation325_spill] sm:$0xff] %v5343_v59  ;;  %v5368_v59 = vld [vmem:[%s6673_s7 + $0x888] sm:$0xff] }
 0x142   :  { %6993 = vst [vmem:[#allocation326_spill] sm:$0xff] %v5348_v60  ;;  %v5373_v60 = vld [vmem:[%s6673_s7 + $0x890] sm:$0xff] }
 0x143   :  { %6994 = vst [vmem:[#allocation327_spill] sm:$0xff] %v5353_v56  ;;  %v5378_v56 = vld [vmem:[%s6673_s7 + $0x898] sm:$0xff] }
 0x144   :  { %6995 = vst [vmem:[#allocation328_spill] sm:$0xff] %v5358_v57  ;;  %v5383_v57 = vld [vmem:[%s6673_s7 + $0x8a0] sm:$0xff] }
 0x145   :  { %6996 = vst [vmem:[#allocation329_spill] sm:$0xff] %v5363_v58  ;;  %v5388_v58 = vld [vmem:[%s6673_s7 + $0x8a8] sm:$0xff] }
 0x146   :  { %6997 = vst [vmem:[#allocation330_spill] sm:$0xff] %v5368_v59  ;;  %v5393_v59 = vld [vmem:[%s6673_s7 + $0x8b0] sm:$0xff] }
 0x147   :  { %6998 = vst [vmem:[#allocation331_spill] sm:$0xff] %v5373_v60  ;;  %v5398_v60 = vld [vmem:[%s6673_s7 + $0x8b8] sm:$0xff] }
 0x148   :  { %6999 = vst [vmem:[#allocation332_spill] sm:$0xff] %v5378_v56  ;;  %v5403_v56 = vld [vmem:[%s6673_s7 + $0x8c0] sm:$0xff] }
 0x149   :  { %7000 = vst [vmem:[#allocation333_spill] sm:$0xff] %v5383_v57  ;;  %v5408_v57 = vld [vmem:[%s6673_s7 + $0x8c8] sm:$0xff] }
 0x14a   :  { %7001 = vst [vmem:[#allocation334_spill] sm:$0xff] %v5388_v58  ;;  %v5413_v58 = vld [vmem:[%s6673_s7 + $0x8d0] sm:$0xff] }
 0x14b   :  { %7002 = vst [vmem:[#allocation335_spill] sm:$0xff] %v5393_v59  ;;  %v5418_v59 = vld [vmem:[%s6673_s7 + $0x8d8] sm:$0xff] }
 0x14c   :  { %7003 = vst [vmem:[#allocation336_spill] sm:$0xff] %v5398_v60  ;;  %v5423_v60 = vld [vmem:[%s6673_s7 + $0x8e0] sm:$0xff] }
 0x14d   :  { %7004 = vst [vmem:[#allocation337_spill] sm:$0xff] %v5403_v56  ;;  %v5428_v56 = vld [vmem:[%s6673_s7 + $0x8e8] sm:$0xff] }
 0x14e   :  { %7005 = vst [vmem:[#allocation338_spill] sm:$0xff] %v5408_v57  ;;  %v5433_v57 = vld [vmem:[%s6673_s7 + $0x8f0] sm:$0xff] }
 0x14f   :  { %7006 = vst [vmem:[#allocation339_spill] sm:$0xff] %v5413_v58  ;;  %v5438_v58 = vld [vmem:[%s6673_s7 + $0x8f8] sm:$0xff] }
 0x150   :  { %7007 = vst [vmem:[#allocation340_spill] sm:$0xff] %v5418_v59 }
 0x151   :  { %7008 = vst [vmem:[#allocation341_spill] sm:$0xff] %v5423_v60 }
 0x152   :  { %7009 = vst [vmem:[#allocation342_spill] sm:$0xff] %v5428_v56 }
 0x153   :  { %7010 = vst [vmem:[#allocation343_spill] sm:$0xff] %v5433_v57 }
 0x154   :  { %7011 = vst [vmem:[#allocation344_spill] sm:$0xff] %v5438_v58 }
 0x155   :  { %789 = vsyncadd [#allocation7 + $0x1], 36864  ;;  %v809_v59 = vld [vmem:[%s6667_s1 + $0x18] sm:$0x7]  ;;  %vm859_vm0 = vcmask 1042432   ;;  %v808_v56 = vld [vmem:[%s6667_s1 + $0x10] sm:$0xff] }
 0x156   :  { %3344 = vmatpush.msk.msra.mxu0 %vm859_vm0, %v809_v59  ;;  %v807_v60 = vld [vmem:[%s6667_s1 + $0x8] sm:$0xff]  ;;  %v806_v58 = vld [vmem:[%s6667_s1] sm:$0xff]  ;;  %vm810_vm1 = vcmask 220160   ;;  %vm929_vm2 = vcmask 261120   ;;  %v3568_v50 = vmov 128.0   ;;  %s3569_s15 = smov 32  }
 0x157   :  { %v790_v57 = vld [vmem:[%s6666_s0] sm:$0xff]  ;;  %v791_v59 = vld [vmem:[%s6666_s0 + $0x8] sm:$0xff]  ;;  %3546 = vrcp.f32 %v3568_v50  ;;  %s3570_s17 = smov 64   ;;  %s3571_s20 = smov 96   ;;  %vm1253_vm7 = vcmask 523520   ;;  %vm1312_vm8 = vcmask 785920  }
 0x158   :  { %876 = vmatpush.msra.mxu0 %v808_v56  ;;  %v792_v56 = vld [vmem:[%s6666_s0 + $0x10] sm:$0xff]  ;;  %vm1371_vm9 = vcmask 1048320   ;;  %vm1746_vm10 = vcmask 523264  }
 0x15a   :  { %877 = vmatpush.msra.mxu0 %v807_v60  ;;  %v793_v60 = vld [vmem:[%s6666_s0 + $0x18] sm:$0xff] }
 0x15c   :  { %878 = vmatpush.msra.mxu0 %v806_v58  ;;  %v795_v58 = vld [vmem:[%s6666_s0 + $0x28] sm:$0xff] }
 0x15d   :  { %3345 = vmatmul.msk.f32.vlgmr.msra.gmra.mxu0 %vm810_vm1, %v790_v57  ;;  %v794_v57 = vld [vmem:[%s6666_s0 + $0x20] sm:$0xff] }
 0x165   :  { %3346 = vmatmul.msk.f32.gmra.mxu0 %vm810_vm1, %v791_v59  ;;  %v796_v59 = vld [vmem:[%s6666_s0 + $0x30] sm:$0xff] }
 0x16d   :  { %3347 = vmatmul.msk.f32.gmra.mxu0 %vm810_vm1, %v792_v56  ;;  %v797_v56 = vld [vmem:[%s6666_s0 + $0x38] sm:$0xff] }
 0x175   :  { %3348 = vmatmul.msk.f32.gmra.mxu0 %vm810_vm1, %v793_v60  ;;  %v798_v60 = vld [vmem:[%s6666_s0 + $0x40] sm:$0xff] }
 0x17d   :  { %3349 = vmatmul.msk.f32.gmra.mxu0 %vm810_vm1, %v794_v57  ;;  %v799_v57 = vld [vmem:[%s6666_s0 + $0x48] sm:$0xff] }
 0x185   :  { %3350 = vmatmul.msk.f32.gmra.mxu0 %vm810_vm1, %v795_v58  ;;  %v800_v58 = vld [vmem:[%s6666_s0 + $0x50] sm:$0xff] }
 0x18d   :  { %3351 = vmatmul.msk.f32.gmra.mxu0 %vm810_vm1, %v796_v59  ;;  %v801_v59 = vld [vmem:[%s6666_s0 + $0x58] sm:$0xff] }
 0x195   :  { %3352 = vmatmul.msk.f32.gmra.mxu0 %vm810_vm1, %v797_v56  ;;  %v802_v56 = vld [vmem:[%s6666_s0 + $0x60] sm:$0xff] }
 0x19d   :  { %3353 = vmatmul.msk.f32.gmra.mxu0 %vm810_vm1, %v798_v60  ;;  %v803_v60 = vld [vmem:[%s6666_s0 + $0x68] sm:$0xff] }
 0x1a5   :  { %3354 = vmatmul.msk.f32.gmra.mxu0 %vm810_vm1, %v799_v57  ;;  %v804_v57 = vld [vmem:[%s6666_s0 + $0x70] sm:$0xff] }
 0x1ad   :  { %3355 = vmatmul.msk.f32.gmra.mxu0 %vm810_vm1, %v800_v58  ;;  %v805_v58 = vld [vmem:[%s6666_s0 + $0x78] sm:$0xff] }
 0x1b5   :  { %3356 = vmatmul.msk.f32.gmra.mxu0 %vm810_vm1, %v801_v59 }
 0x1bd   :  { %3357 = vmatmul.msk.f32.gmra.mxu0 %vm810_vm1, %v802_v56 }
 0x1c5   :  { %3358 = vmatmul.msk.f32.gmra.mxu0 %vm810_vm1, %v803_v60 }
 0x1cd   :  { %3359 = vmatmul.msk.f32.gmra.mxu0 %vm810_vm1, %v804_v57 }
 0x1d5   :  { %3360 = vmatmul.msk.f32.gmra.mxu0 %vm810_vm1, %v805_v58 }
 0x1da   :  { %v5516_v59 = vpop.f32.mrf.mxu0 }
 0x1db   :  { %v930_v37 = vsel %vm929_vm2, %v5516_v59, 0.0 }
 0x1e2   :  { %v5518_v56 = vpop.f32.mrf.mxu0 }
 0x1e3   :  { %v931_v36 = vsel %vm929_vm2, %v5518_v56, 0.0 }
 0x1e4   :  { %v932_v39 = vadd.f32 %v931_v36, %v930_v37 }
 0x1ea   :  { %v5520_v61 = vpop.f32.mrf.mxu0 }
 0x1eb   :  { %v933_v38 = vsel %vm929_vm2, %v5520_v61, 0.0 }
 0x1ec   :  { %v934_v41 = vadd.f32 %v933_v38, %v932_v39 }
 0x1f2   :  { %v5522_v62 = vpop.f32.mrf.mxu0 }
 0x1f3   :  { %v935_v40 = vsel %vm929_vm2, %v5522_v62, 0.0 }
 0x1f4   :  { %v936_v44 = vadd.f32 %v935_v40, %v934_v41 }
 0x1fa   :  { %v5524_v60 = vpop.f32.mrf.mxu0 }
 0x1fb   :  { %v937_v43 = vsel %vm929_vm2, %v5524_v60, 0.0 }
 0x1fc   :  { %v938_v48 = vadd.f32 %v937_v43, %v936_v44 }
 0x202   :  { %v5526_v63 = vpop.f32.mrf.mxu0 }
 0x203   :  { %v939_v45 = vsel %vm929_vm2, %v5526_v63, 0.0 }
 0x204   :  { %v940_v49 = vadd.f32 %v939_v45, %v938_v48 }
 0x20a   :  { %v5528_v32 = vpop.f32.mrf.mxu0 }
 0x20b   :  { %v941_v46 = vsel %vm929_vm2, %v5528_v32, 0.0 }
 0x20c   :  { %v942_v37 = vadd.f32 %v941_v46, %v940_v49 }
 0x212   :  { %v5530_v57 = vpop.f32.mrf.mxu0 }
 0x213   :  { %v943_v36 = vsel %vm929_vm2, %v5530_v57, 0.0 }
 0x214   :  { %v944_v39 = vadd.f32 %v943_v36, %v942_v37  ;;  %v3547_v36 = vpop.eup %3546 }
 0x215   :  { %v968_v16 = vmul.f32 128.0, %v3547_v36  ;;  %vm972_vm3 = vweird.f32 %v3547_v36 }
 0x21a   :  { %v5532_v33 = vpop.f32.mrf.mxu0 }
 0x21b   :  { %v945_v38 = vsel %vm929_vm2, %v5532_v33, 0.0 }
 0x21c   :  { %v946_v41 = vadd.f32 %v945_v38, %v944_v39 }
 0x222   :  { %v5534_v34 = vpop.f32.mrf.mxu0 }
 0x223   :  { %v947_v40 = vsel %vm929_vm2, %v5534_v34, 0.0 }
 0x224   :  { %v948_v44 = vadd.f32 %v947_v40, %v946_v41 }
 0x22a   :  { %v5536_v58 = vpop.f32.mrf.mxu0 }
 0x22b   :  { %v949_v43 = vsel %vm929_vm2, %v5536_v58, 0.0 }
 0x22c   :  { %v950_v46 = vadd.f32 %v949_v43, %v948_v44  ;;  %v969_v44 = vsub.f32 1.0, %v968_v16 }
 0x22e   :  { %v970_v18 = vmul.f32 %v3547_v36, %v969_v44 }
 0x230   :  { %v971_v53 = vadd.f32 %v3547_v36, %v970_v18 }
 0x232   :  { %v5538_v35 = vpop.f32.mrf.mxu0 }
 0x233   :  { %v951_v45 = vsel %vm929_vm2, %v5538_v35, 0.0 }
 0x234   :  { %v952_v37 = vadd.f32 %v951_v45, %v950_v46 }
 0x23a   :  { %v5548_v42 = vpop.f32.mrf.mxu0 }
 0x23b   :  { %v953_v49 = vsel %vm929_vm2, %v5548_v42, 0.0 }
 0x23c   :  { %v954_v39 = vadd.f32 %v953_v49, %v952_v37  ;;  %v5580_v37 = vsel %vm972_vm3, %v3547_v36, %v971_v53 }
 0x242   :  { %v5558_v47 = vpop.f32.mrf.mxu0 }
 0x243   :  { %v955_v38 = vsel %vm929_vm2, %v5558_v47, 0.0 }
 0x244   :  { %v956_v40 = vadd.f32 %v955_v38, %v954_v39 }
 0x24a   :  { %v5568_v48 = vpop.f32.mrf.mxu0 }
 0x24b   :  { %v957_v50 = vsel %vm929_vm2, %v5568_v48, 0.0 }
 0x24c   :  { %v958_v41 = vadd.f32 %v957_v50, %v956_v40 }
 0x252   :  { %v5576_v51 = vpop.f32.mrf.mxu0 }
 0x253   :  { %v959_v43 = vsel %vm929_vm2, %v5576_v51, 0.0 }
 0x254   :  { %v960_v17 = vadd.f32 %v959_v43, %v958_v41 }
 0x256   :  { %v961_v52 = vrot.slane %v960_v17, 4 }
 0x258   :  { %v962_v45 = vadd.f32 %v961_v52, %v960_v17 }
 0x25a   :  { %v963_v46 = vrot.slane %v962_v45, 2 }
 0x25c   :  { %v964_v19 = vadd.f32 %v963_v46, %v962_v45 }
 0x25e   :  { %v965_v49 = vrot.slane %v964_v19, 1 }
 0x260   :  { %v966_v54 = vadd.f32 %v965_v49, %v964_v19 }
 0x262   :  { %v974_v38 = vmul.f32 %v5580_v37, %v966_v54 }
 0x264   :  { %v5584_v39 = vsub.f32 %v5516_v59, %v974_v38  ;;  %v5587_v50 = vsub.f32 %v5518_v56, %v974_v38  ;;  %v5590_v16 = vsub.f32 %v5520_v61, %v974_v38  ;;  %v5593_v17 = vsub.f32 %v5522_v62, %v974_v38 }
 0x265   :  { %v5600_v52 = vsub.f32 %v5524_v60, %v974_v38  ;;  %v5605_v54 = vsub.f32 %v5526_v63, %v974_v38  ;;  %v5612_v36 = vsub.f32 %v5528_v32, %v974_v38  ;;  %v5618_v63 = vsub.f32 %v5530_v57, %v974_v38 }
 0x266   :  { %v991_v18 = vmul.f32 %v5584_v39, %v5584_v39  ;;  %v992_v19 = vmul.f32 %v5587_v50, %v5587_v50  ;;  %v993_v53 = vmul.f32 %v5590_v16, %v5590_v16  ;;  %v994_v61 = vmul.f32 %v5593_v17, %v5593_v17 }
 0x267   :  { %v995_v60 = vmul.f32 %v5600_v52, %v5600_v52  ;;  %v996_v43 = vmul.f32 %v5605_v54, %v5605_v54  ;;  %v5624_v46 = vsub.f32 %v5532_v33, %v974_v38  ;;  %v997_v32 = vmul.f32 %v5612_v36, %v5612_v36 }
 0x268   :  { %v1007_v62 = vsel %vm929_vm2, %v991_v18, 0.0  ;;  %v1008_v59 = vsel %vm929_vm2, %v992_v19, 0.0  ;;  %v1010_v40 = vsel %vm929_vm2, %v993_v53, 0.0  ;;  %v1012_v44 = vsel %vm929_vm2, %v994_v61, 0.0 }
 0x269   :  { %v1009_v56 = vadd.f32 %v1008_v59, %v1007_v62  ;;  %v1014_v49 = vsel %vm929_vm2, %v995_v60, 0.0  ;;  %v984_v19 = vsub.f32 %v5534_v34, %v974_v38  ;;  %v998_v57 = vmul.f32 %v5618_v63, %v5618_v63 }
 0x26a   :  { %v1016_v53 = vsel %vm929_vm2, %v996_v43, 0.0  ;;  %v985_v61 = vsub.f32 %v5536_v58, %v974_v38  ;;  %v999_v33 = vmul.f32 %v5624_v46, %v5624_v46  ;;  %v1018_v59 = vsel %vm929_vm2, %v997_v32, 0.0 }
 0x26b   :  { %v1011_v41 = vadd.f32 %v1010_v40, %v1009_v56  ;;  %v986_v40 = vsub.f32 %v5538_v35, %v974_v38  ;;  %v1000_v60 = vmul.f32 %v984_v19, %v984_v19  ;;  %v988_v58 = vsub.f32 %v5558_v47, %v974_v38 }
 0x26c   :  { %v1022_v43 = vsel %vm929_vm2, %v999_v33, 0.0  ;;  %v989_v32 = vsub.f32 %v5568_v48, %v974_v38 }
 0x26d   :  { %v1013_v45 = vadd.f32 %v1012_v44, %v1011_v41  ;;  %v1020_v41 = vsel %vm929_vm2, %v998_v57, 0.0  ;;  %v987_v44 = vsub.f32 %v5548_v42, %v974_v38  ;;  %v990_v57 = vsub.f32 %v5576_v51, %v974_v38 }
 0x26e   :  { %v1005_v33 = vmul.f32 %v989_v32, %v989_v32 }
 0x26f   :  { %v1015_v18 = vadd.f32 %v1014_v49, %v1013_v45  ;;  %v1001_v45 = vmul.f32 %v985_v61, %v985_v61 }
 0x270   :  { %v1034_v48 = vsel %vm929_vm2, %v1005_v33, 0.0 }
 0x271   :  { %v1017_v62 = vadd.f32 %v1016_v53, %v1015_v18  ;;  %v1002_v18 = vmul.f32 %v986_v40, %v986_v40  ;;  %v1024_v53 = vsel %vm929_vm2, %v1000_v60, 0.0  ;;  %v1026_v35 = vsel %vm929_vm2, %v1001_v45, 0.0 }
 0x273   :  { %v1019_v56 = vadd.f32 %v1018_v59, %v1017_v62  ;;  %v1003_v62 = vmul.f32 %v987_v44, %v987_v44  ;;  %v1028_v42 = vsel %vm929_vm2, %v1002_v18, 0.0 }
 0x275   :  { %v1021_v34 = vadd.f32 %v1020_v41, %v1019_v56  ;;  %v1004_v56 = vmul.f32 %v988_v58, %v988_v58 }
 0x277   :  { %v1023_v49 = vadd.f32 %v1022_v43, %v1021_v34  ;;  %v1030_v34 = vsel %vm929_vm2, %v1003_v62, 0.0  ;;  %v1006_v43 = vmul.f32 %v990_v57, %v990_v57  ;;  %v1032_v60 = vsel %vm929_vm2, %v1004_v56, 0.0 }
 0x279   :  { %v1025_v20 = vadd.f32 %v1024_v53, %v1023_v49  ;;  %v1036_v45 = vsel %vm929_vm2, %v1006_v43, 0.0 }
 0x27b   :  { %v1027_v59 = vadd.f32 %v1026_v35, %v1025_v20 }
 0x27d   :  { %v1029_v41 = vadd.f32 %v1028_v42, %v1027_v59 }
 0x27f   :  { %v1031_v47 = vadd.f32 %v1030_v34, %v1029_v41 }
 0x281   :  { %v1033_v49 = vadd.f32 %v1032_v60, %v1031_v47 }
 0x283   :  { %v1035_v53 = vadd.f32 %v1034_v48, %v1033_v49  ;;  %v928_v49 = vld [vmem:[%s6674_s8] sm:$0x3] }
 0x285   :  { %v1037_v20 = vadd.f32 %v1036_v45, %v1035_v53 }
 0x287   :  { %v1038_v35 = vrot.slane %v1037_v20, 4 }
 0x289   :  { %v1039_v51 = vadd.f32 %v1038_v35, %v1037_v20  ;;  %v5662_v20 = vperm.slane %v928_v49, 0 }
 0x28b   :  { %v1040_v38 = vrot.slane %v1039_v51, 2 }
 0x28d   :  { %v1041_v55 = vadd.f32 %v1040_v38, %v1039_v51  ;;  %v5665_v51 = vperm.slane %v928_v49, 1 }
 0x28f   :  { %v1042_v18 = vrot.slane %v1041_v55, 1 }
 0x291   :  { %v1043_v59 = vadd.f32 %v1042_v18, %v1041_v55 }
 0x293   :  { %v1044_v42 = vmul.f32 %v1043_v59, %v5580_v37 }
 0x295   :  { %v1045_v62 = vadd.f32 1e-05, %v1044_v42 }
 0x297   :  { %3548 = vrsqrt.f32 %v1045_v62  ;;  %vm1052_vm5 = vweird.f32 %v1045_v62 }
 0x29d   :  { %v3549_v41 = vpop.eup %3548 }
 0x29e   :  { %v1047_v34 = vmul.f32 %v3549_v41, %v1045_v62  ;;  %vm1053_vm4 = vweird.f32 %v3549_v41 }
 0x29f   :  { %vm1054_vm6 = vmor %vm1052_vm5, %vm1053_vm4 }
 0x2a0   :  { %v1048_v56 = vmul.f32 %v3549_v41, %v1047_v34 }
 0x2a2   :  { %v1049_v47 = vmul.f32 0.5, %v1048_v56 }
 0x2a4   :  { %v1050_v60 = vsub.f32 1.5, %v1049_v47 }
 0x2a6   :  { %v1051_v33 = vmul.f32 %v3549_v41, %v1050_v60 }
 0x2a8   :  { %v5652_v43 = vsel %vm1054_vm6, %v3549_v41, %v1051_v33 }
 0x2a9   :  { %v1065_v55 = vmul.f32 %v5652_v43, %v984_v19  ;;  %v1066_v37 = vmul.f32 %v5652_v43, %v985_v61  ;;  %v1067_v48 = vmul.f32 %v5652_v43, %v986_v40  ;;  %v1070_v53 = vmul.f32 %v5652_v43, %v989_v32 }
 0x2aa   :  { %v1071_v45 = vmul.f32 %v5652_v43, %v990_v57  ;;  %v1069_v35 = vmul.f32 %v5652_v43, %v988_v58  ;;  %v1068_v38 = vmul.f32 %v5652_v43, %v987_v44  ;;  %v1064_v44 = vmul.f32 %v5652_v43, %v5624_v46 }
 0x2ab   :  { %v1087_v18 = vmul.f32 %v5662_v20, %v1070_v53  ;;  %v1084_v59 = vmul.f32 %v5662_v20, %v1067_v48  ;;  %v1083_v62 = vmul.f32 %v5662_v20, %v1066_v37  ;;  %v1063_v56 = vmul.f32 %v5652_v43, %v5618_v63 }
 0x2ac   :  { %v1088_v19 = vmul.f32 %v5662_v20, %v1071_v45  ;;  %v1086_v61 = vmul.f32 %v5662_v20, %v1069_v35  ;;  %v1085_v32 = vmul.f32 %v5662_v20, %v1068_v38  ;;  %v1082_v47 = vmul.f32 %v5662_v20, %v1065_v55 }
 0x2ad   :  { %v1104_v57 = vadd.f32 %v5665_v51, %v1087_v18  ;;  %v1101_v60 = vadd.f32 %v5665_v51, %v1084_v59  ;;  %v1062_v33 = vmul.f32 %v5652_v43, %v5612_v36  ;;  %v1081_v49 = vmul.f32 %v5662_v20, %v1064_v44 }
 0x2ae   :  { %v1105_v40 = vadd.f32 %v5665_v51, %v1088_v19  ;;  %v1103_v58 = vadd.f32 %v5665_v51, %v1086_v61  ;;  %v1102_v41 = vadd.f32 %v5665_v51, %v1085_v32  ;;  %v1100_v37 = vadd.f32 %v5665_v51, %v1083_v62 }
 0x2af   :  { %v5682_v34 = vmax.f32 %v1104_v57, 0.0  ;;  %v1061_v55 = vmul.f32 %v5652_v43, %v5605_v54  ;;  %v1080_v48 = vmul.f32 %v5662_v20, %v1063_v56  ;;  %v1099_v53 = vadd.f32 %v5665_v51, %v1082_v47 }
 0x2b0   :  { %v5676_v42 = vmax.f32 %v1105_v40, 0.0  ;;  %v5691_v46 = vmax.f32 %v1103_v58, 0.0  ;;  %v5700_v63 = vmax.f32 %v1102_v41, 0.0  ;;  %v5709_v36 = vmax.f32 %v1101_v60, 0.0 }
 0x2b1   :  { %v1060_v45 = vmul.f32 %v5652_v43, %v5600_v52  ;;  %v1079_v35 = vmul.f32 %v5662_v20, %v1062_v33  ;;  %v1098_v38 = vadd.f32 %v5665_v51, %v1081_v49  ;;  %v5718_v54 = vmax.f32 %v1100_v37, 0.0 }
 0x2b2   :  { %1166 = vmatpush.msra.mxu1 %v5676_v42  ;;  %1208 = vmatpush.msra.mxu2 %v5676_v42  ;;  %v1059_v18 = vmul.f32 %v5652_v43, %v5593_v17  ;;  %v1078_v19 = vmul.f32 %v5662_v20, %v1061_v55  ;;  %v1097_v61 = vadd.f32 %v5665_v51, %v1080_v48  ;;  %v5727_v52 = vmax.f32 %v1099_v53, 0.0  ;;  %v3435_v53 = vld [vmem:[%s6668_s2] sm:$0xff]  }
 0x2b3   :  { %1267 = vmatpush.msra.mxu3 %v5676_v42  ;;  %v1058_v40 = vmul.f32 %v5652_v43, %v5590_v16  ;;  %v1077_v32 = vmul.f32 %v5662_v20, %v1060_v45  ;;  %v1096_v57 = vadd.f32 %v5665_v51, %v1079_v35  ;;  %v5736_v17 = vmax.f32 %v1098_v38, 0.0  ;;  %v3507_v45 = vld [vmem:[%s6668_s2 + $0x10] sm:$0xff]  }
 0x2b4   :  { %1167 = vmatpush.msra.mxu1 %v5682_v34  ;;  %1209 = vmatpush.msra.mxu2 %v5682_v34  ;;  %v1057_v59 = vmul.f32 %v5652_v43, %v5587_v50  ;;  %v1076_v58 = vmul.f32 %v5662_v20, %v1059_v18  ;;  %v1095_v44 = vadd.f32 %v5665_v51, %v1078_v19  ;;  %v5745_v16 = vmax.f32 %v1097_v61, 0.0 }
 0x2b5   :  { %1268 = vmatpush.msra.mxu3 %v5682_v34  ;;  %v1056_v62 = vmul.f32 %v5652_v43, %v5584_v39  ;;  %v1075_v41 = vmul.f32 %v5662_v20, %v1058_v40  ;;  %v1094_v56 = vadd.f32 %v5665_v51, %v1077_v32  ;;  %v5754_v50 = vmax.f32 %v1096_v57, 0.0  ;;  %v3506_v57 = vld [vmem:[%s6668_s2 + $0x8] sm:$0xff]  }
 0x2b6   :  { %1168 = vmatpush.msra.mxu1 %v5691_v46  ;;  %1210 = vmatpush.msra.mxu2 %v5691_v46  ;;  %v5759_v47 = vmax.f32 %v1095_v44, 0.0  ;;  %v1093_v39 = vadd.f32 %v5665_v51, %v1076_v58  ;;  %v1074_v43 = vmul.f32 %v5662_v20, %v1057_v59  ;;  %v3436_v38 = vunpack.c.l.bf16 %v3435_v53  ;;  %v3508_v59 = vld [vmem:[%s6668_s2 + $0x18] sm:$0xff]  }
 0x2b7   :  { %1269 = vmatpush.msra.mxu3 %v5691_v46  ;;  %v5766_v60 = vmax.f32 %v1094_v56, 0.0  ;;  %v1092_v33 = vadd.f32 %v5665_v51, %v1075_v41  ;;  %v1073_v49 = vmul.f32 %v5662_v20, %v1056_v62  ;;  %v3444_v19 = vunpack.c.l.bf16 %v3507_v45 }
 0x2b8   :  { %1169 = vmatpush.msra.mxu1 %v5700_v63  ;;  %1211 = vmatpush.msra.mxu2 %v5700_v63  ;;  %v5775_v37 = vmax.f32 %v1093_v39, 0.0  ;;  %v1091_v55 = vadd.f32 %v5665_v51, %v1074_v43  ;;  %v3437_v40 = vunpack.c.h.bf16 %v3435_v53  ;;  %v3445_v32 = vunpack.c.h.bf16 %v3507_v45  ;;  %v3511_v39 = vld [vmem:[%s6668_s2 + $0x30] sm:$0xff]   ;;  %v3513_v43 = vld [vmem:[%s6668_s2 + $0x40] sm:$0xff]  }
 0x2b9   :  { %1270 = vmatpush.msra.mxu3 %v5700_v63  ;;  %v5781_v48 = vmax.f32 %v1092_v33, 0.0  ;;  %v1090_v20 = vadd.f32 %v5665_v51, %v1073_v49  ;;  %v3509_v51 = vld [vmem:[%s6668_s2 + $0x20] sm:$0xff]   ;;  %v3440_v58 = vunpack.c.l.bf16 %v3506_v57  ;;  %v3448_v44 = vunpack.c.l.bf16 %v3508_v59 }
 0x2ba   :  { %1170 = vmatpush.msra.mxu1 %v5709_v36  ;;  %1212 = vmatpush.msra.mxu2 %v5709_v36  ;;  %v5793_v35 = vmax.f32 %v1091_v55, 0.0  ;;  %v3452_v61 = vunpack.c.l.bf16 %v3509_v51  ;;  %v3453_v62 = vunpack.c.h.bf16 %v3509_v51  ;;  %v3441_v41 = vunpack.c.h.bf16 %v3506_v57  ;;  %v3510_v55 = vld [vmem:[%s6668_s2 + $0x28] sm:$0xff]  }
 0x2bb   :  { %1271 = vmatpush.msra.mxu3 %v5709_v36  ;;  %v5801_v18 = vmax.f32 %v1090_v20, 0.0  ;;  %v3449_v56 = vunpack.c.h.bf16 %v3508_v59  ;;  %v3460_v33 = vunpack.c.l.bf16 %v3511_v39  ;;  %v3468_v49 = vunpack.c.l.bf16 %v3513_v43 }
 0x2bc   :  { %1171 = vmatpush.msra.mxu1 %v5718_v54  ;;  %1213 = vmatpush.msra.mxu2 %v5718_v54  ;;  %v3456_v20 = vunpack.c.l.bf16 %v3510_v55  ;;  %v3461_v53 = vunpack.c.h.bf16 %v3511_v39 }
 0x2bd   :  { %1272 = vmatpush.msra.mxu3 %v5718_v54 }
 0x2be   :  { %1172 = vmatpush.msra.mxu1 %v5727_v52  ;;  %1214 = vmatpush.msra.mxu2 %v5727_v52 }
 0x2bf   :  { %1273 = vmatpush.msra.mxu3 %v5727_v52 }
 0x2c0   :  { %1173 = vmatpush.msra.mxu1 %v5736_v17  ;;  %1215 = vmatpush.msra.mxu2 %v5736_v17 }
 0x2c1   :  { %1274 = vmatpush.msra.mxu3 %v5736_v17 }
 0x2c2   :  { %1174 = vmatpush.msra.mxu1 %v5745_v16  ;;  %1216 = vmatpush.msra.mxu2 %v5745_v16 }
 0x2c3   :  { %1275 = vmatpush.msra.mxu3 %v5745_v16 }
 0x2c4   :  { %1175 = vmatpush.msra.mxu1 %v5754_v50  ;;  %1217 = vmatpush.msra.mxu2 %v5754_v50 }
 0x2c5   :  { %1276 = vmatpush.msra.mxu3 %v5754_v50 }
 0x2c6   :  { %1176 = vmatpush.msra.mxu1 %v5759_v47  ;;  %1218 = vmatpush.msra.mxu2 %v5759_v47 }
 0x2c7   :  { %1277 = vmatpush.msra.mxu3 %v5759_v47 }
 0x2c8   :  { %1177 = vmatpush.msra.mxu1 %v5766_v60  ;;  %1219 = vmatpush.msra.mxu2 %v5766_v60 }
 0x2c9   :  { %1278 = vmatpush.msra.mxu3 %v5766_v60 }
 0x2ca   :  { %1178 = vmatpush.msra.mxu1 %v5775_v37  ;;  %1220 = vmatpush.msra.mxu2 %v5775_v37 }
 0x2cb   :  { %1279 = vmatpush.msra.mxu3 %v5775_v37 }
 0x2cc   :  { %1179 = vmatpush.msra.mxu1 %v5781_v48  ;;  %1221 = vmatpush.msra.mxu2 %v5781_v48 }
 0x2cd   :  { %1280 = vmatpush.msra.mxu3 %v5781_v48 }
 0x2ce   :  { %1180 = vmatpush.msra.mxu1 %v5793_v35  ;;  %1222 = vmatpush.msra.mxu2 %v5793_v35 }
 0x2cf   :  { %1281 = vmatpush.msra.mxu3 %v5793_v35 }
 0x2d0   :  { %1181 = vmatpush.msra.mxu1 %v5801_v18  ;;  %1223 = vmatpush.msra.mxu2 %v5801_v18 }
 0x2d1   :  { %1282 = vmatpush.msra.mxu3 %v5801_v18  ;;  %1182 = vmatmul.f32.vlgmr.msra.gmra.mxu1 %v3436_v38 }
 0x2d2   :  { %1224 = vmatmul.f32.vlgmr.msra.gmra.mxu2 %v3444_v19  ;;  %1326 = vmatpush.msrb.mxu1 %v5676_v42 }
 0x2d3   :  { %1385 = vmatpush.msrb.mxu2 %v5676_v42  ;;  %1427 = vmatpush.msrb.mxu3 %v5676_v42 }
 0x2d4   :  { %1327 = vmatpush.msrb.mxu1 %v5682_v34  ;;  %1283 = vmatmul.f32.vlgmr.msra.gmra.mxu3 %v3452_v61 }
 0x2d5   :  { %1386 = vmatpush.msrb.mxu2 %v5682_v34  ;;  %1428 = vmatpush.msrb.mxu3 %v5682_v34 }
 0x2d6   :  { %1328 = vmatpush.msrb.mxu1 %v5691_v46 }
 0x2d7   :  { %1387 = vmatpush.msrb.mxu2 %v5691_v46  ;;  %1429 = vmatpush.msrb.mxu3 %v5691_v46 }
 0x2d8   :  { %1329 = vmatpush.msrb.mxu1 %v5700_v63 }
 0x2d9   :  { %1388 = vmatpush.msrb.mxu2 %v5700_v63  ;;  %1430 = vmatpush.msrb.mxu3 %v5700_v63 }
 0x2da   :  { %1185 = vmatmul.f32.gmra.mxu1 %v3437_v40  ;;  %1227 = vmatmul.f32.gmra.mxu2 %v3445_v32 }
 0x2db   :  { %1330 = vmatpush.msrb.mxu1 %v5709_v36  ;;  %1389 = vmatpush.msrb.mxu2 %v5709_v36 }
 0x2dc   :  { %1431 = vmatpush.msrb.mxu3 %v5709_v36 }
 0x2dd   :  { %1331 = vmatpush.msrb.mxu1 %v5718_v54  ;;  %1390 = vmatpush.msrb.mxu2 %v5718_v54 }
 0x2de   :  { %1432 = vmatpush.msrb.mxu3 %v5718_v54 }
 0x2df   :  { %1332 = vmatpush.msrb.mxu1 %v5727_v52  ;;  %1391 = vmatpush.msrb.mxu2 %v5727_v52 }
 0x2e0   :  { %1433 = vmatpush.msrb.mxu3 %v5727_v52 }
 0x2e1   :  { %1333 = vmatpush.msrb.mxu1 %v5736_v17  ;;  %1392 = vmatpush.msrb.mxu2 %v5736_v17 }
 0x2e2   :  { %1434 = vmatpush.msrb.mxu3 %v5736_v17  ;;  %1188 = vmatmul.f32.gmra.mxu1 %v3440_v58 }
 0x2e3   :  { %1230 = vmatmul.f32.gmra.mxu2 %v3448_v44  ;;  %1334 = vmatpush.msrb.mxu1 %v5745_v16 }
 0x2e4   :  { %1393 = vmatpush.msrb.mxu2 %v5745_v16  ;;  %1435 = vmatpush.msrb.mxu3 %v5745_v16 }
 0x2e5   :  { %1286 = vmatmul.f32.gmra.mxu3 %v3453_v62  ;;  %1335 = vmatpush.msrb.mxu1 %v5754_v50 }
 0x2e6   :  { %1394 = vmatpush.msrb.mxu2 %v5754_v50  ;;  %1436 = vmatpush.msrb.mxu3 %v5754_v50 }
 0x2e7   :  { %1336 = vmatpush.msrb.mxu1 %v5759_v47 }
 0x2e8   :  { %1395 = vmatpush.msrb.mxu2 %v5759_v47  ;;  %1437 = vmatpush.msrb.mxu3 %v5759_v47 }
 0x2e9   :  { %1337 = vmatpush.msrb.mxu1 %v5766_v60 }
 0x2ea   :  { %1396 = vmatpush.msrb.mxu2 %v5766_v60  ;;  %1438 = vmatpush.msrb.mxu3 %v5766_v60 }
 0x2eb   :  { %1191 = vmatmul.f32.gmra.mxu1 %v3441_v41  ;;  %1233 = vmatmul.f32.gmra.mxu2 %v3449_v56 }
 0x2ec   :  { %1338 = vmatpush.msrb.mxu1 %v5775_v37  ;;  %1397 = vmatpush.msrb.mxu2 %v5775_v37 }
 0x2ed   :  { %1439 = vmatpush.msrb.mxu3 %v5775_v37 }
 0x2ee   :  { %1339 = vmatpush.msrb.mxu1 %v5781_v48  ;;  %1398 = vmatpush.msrb.mxu2 %v5781_v48 }
 0x2ef   :  { %1440 = vmatpush.msrb.mxu3 %v5781_v48 }
 0x2f0   :  { %1340 = vmatpush.msrb.mxu1 %v5793_v35  ;;  %1399 = vmatpush.msrb.mxu2 %v5793_v35 }
 0x2f1   :  { %1441 = vmatpush.msrb.mxu3 %v5793_v35 }
 0x2f2   :  { %1341 = vmatpush.msrb.mxu1 %v5801_v18  ;;  %1400 = vmatpush.msrb.mxu2 %v5801_v18 }
 0x2f3   :  { %1442 = vmatpush.msrb.mxu3 %v5801_v18  ;;  %1342 = vmatmul.f32.vlgmr.msrb.gmra.mxu1 %v3460_v33  ;;  %v3521_v33 = vld [vmem:[%s6668_s2 + $0x80] sm:$0xff]  }
 0x2f4   :  { %1485 = vmatpush.msra.mxu1 %v5676_v42  ;;  %1543 = vmatpush.msra.mxu2 %v5676_v42 }
 0x2f5   :  { %1601 = vmatpush.msra.mxu3 %v5676_v42  ;;  %1401 = vmatmul.f32.vlgmr.msrb.gmra.mxu2 %v3468_v49  ;;  %v3469_v42 = vunpack.c.h.bf16 %v3513_v43 }
 0x2f6   :  { %1486 = vmatpush.msra.mxu1 %v5682_v34  ;;  %1544 = vmatpush.msra.mxu2 %v5682_v34 }
 0x2f7   :  { %1602 = vmatpush.msra.mxu3 %v5682_v34  ;;  %v3457_v34 = vunpack.c.h.bf16 %v3510_v55  ;;  %v3500_v55 = vunpack.c.l.bf16 %v3521_v33 }
 0x2f8   :  { %1289 = vmatmul.f32.gmra.mxu3 %v3456_v20  ;;  %1487 = vmatpush.msra.mxu1 %v5691_v46 }
 0x2f9   :  { %1545 = vmatpush.msra.mxu2 %v5691_v46  ;;  %1603 = vmatpush.msra.mxu3 %v5691_v46  ;;  %v3512_v46 = vld [vmem:[%s6668_s2 + $0x38] sm:$0xff]  }
 0x2fa   :  { %1488 = vmatpush.msra.mxu1 %v5700_v63 }
 0x2fb   :  { %1546 = vmatpush.msra.mxu2 %v5700_v63  ;;  %1604 = vmatpush.msra.mxu3 %v5700_v63  ;;  %v3514_v63 = vld [vmem:[%s6668_s2 + $0x48] sm:$0xff]  }
 0x2fc   :  { %1489 = vmatpush.msra.mxu1 %v5709_v36  ;;  %v3472_v45 = vunpack.c.l.bf16 %v3514_v63 }
 0x2fd   :  { %1547 = vmatpush.msra.mxu2 %v5709_v36  ;;  %1605 = vmatpush.msra.mxu3 %v5709_v36  ;;  %v3464_v36 = vunpack.c.l.bf16 %v3512_v46 }
 0x2fe   :  { %1345 = vmatmul.f32.gmra.mxu1 %v3461_v53  ;;  %1404 = vmatmul.f32.gmra.mxu2 %v3469_v42  ;;  %v3501_v42 = vunpack.c.h.bf16 %v3521_v33  ;;  %v1132_v33 = vld [vmem:[%s6669_s3 + $0x50] sm:$0xff] }
 0x2ff   :  { %1490 = vmatpush.msra.mxu1 %v5718_v54  ;;  %1548 = vmatpush.msra.mxu2 %v5718_v54 }
 0x300   :  { %1606 = vmatpush.msra.mxu3 %v5718_v54  ;;  %v3515_v54 = vld [vmem:[%s6668_s2 + $0x50] sm:$0xff]  }
 0x301   :  { %1292 = vmatmul.f32.gmra.mxu3 %v3457_v34  ;;  %1491 = vmatpush.msra.mxu1 %v5727_v52 }
 0x302   :  { %1549 = vmatpush.msra.mxu2 %v5727_v52  ;;  %1607 = vmatpush.msra.mxu3 %v5727_v52  ;;  %v3465_v52 = vunpack.c.h.bf16 %v3512_v46 }
 0x303   :  { %1492 = vmatpush.msra.mxu1 %v5736_v17 }
 0x304   :  { %1550 = vmatpush.msra.mxu2 %v5736_v17  ;;  %1608 = vmatpush.msra.mxu3 %v5736_v17  ;;  %v3473_v17 = vunpack.c.h.bf16 %v3514_v63  ;;  %v3522_v63 = vld [vmem:[%s6668_s2 + $0x88] sm:$0xff]  }
 0x305   :  { %1493 = vmatpush.msra.mxu1 %v5745_v16 }
 0x306   :  { %1551 = vmatpush.msra.mxu2 %v5745_v16  ;;  %1609 = vmatpush.msra.mxu3 %v5745_v16  ;;  %v3476_v16 = vunpack.c.l.bf16 %v3515_v54 }
 0x307   :  { %1348 = vmatmul.f32.gmra.mxu1 %v3464_v36  ;;  %1407 = vmatmul.f32.gmra.mxu2 %v3472_v45  ;;  %v3504_v36 = vunpack.c.l.bf16 %v3522_v63 }
 0x308   :  { %1494 = vmatpush.msra.mxu1 %v5754_v50  ;;  %1552 = vmatpush.msra.mxu2 %v5754_v50 }
 0x309   :  { %1610 = vmatpush.msra.mxu3 %v5754_v50  ;;  %v3517_v50 = vld [vmem:[%s6668_s2 + $0x60] sm:$0xff]  }
 0x30a   :  { %1495 = vmatpush.msra.mxu1 %v5759_v47  ;;  %1553 = vmatpush.msra.mxu2 %v5759_v47  ;;  %v3485_v51 = vunpack.c.h.bf16 %v3517_v50 }
 0x30b   :  { %1611 = vmatpush.msra.mxu3 %v5759_v47  ;;  %v3519_v47 = vld [vmem:[%s6668_s2 + $0x70] sm:$0xff]  }
 0x30c   :  { %1496 = vmatpush.msra.mxu1 %v5766_v60  ;;  %1554 = vmatpush.msra.mxu2 %v5766_v60  ;;  %v3492_v38 = vunpack.c.l.bf16 %v3519_v47  ;;  %v3493_v61 = vunpack.c.h.bf16 %v3519_v47  ;;  %v3505_v47 = vunpack.c.h.bf16 %v3522_v63  ;;  %v1153_v63 = vld [vmem:[%s6669_s3 + $0xf8] sm:$0xff] }
 0x30d   :  { %1612 = vmatpush.msra.mxu3 %v5766_v60  ;;  %v3484_v60 = vunpack.c.l.bf16 %v3517_v50 }
 0x30e   :  { %1497 = vmatpush.msra.mxu1 %v5775_v37  ;;  %1555 = vmatpush.msra.mxu2 %v5775_v37 }
 0x30f   :  { %1613 = vmatpush.msra.mxu3 %v5775_v37  ;;  %1351 = vmatmul.f32.gmra.mxu1 %v3465_v52  ;;  %v3477_v37 = vunpack.c.h.bf16 %v3515_v54 }
 0x310   :  { %1410 = vmatmul.f32.gmra.mxu2 %v3473_v17  ;;  %1443 = vmatmul.f32.vlgmr.msrb.gmra.mxu3 %v3476_v16 }
 0x311   :  { %1498 = vmatpush.msra.mxu1 %v5781_v48  ;;  %1556 = vmatpush.msra.mxu2 %v5781_v48 }
 0x312   :  { %1614 = vmatpush.msra.mxu3 %v5781_v48  ;;  %v3516_v48 = vld [vmem:[%s6668_s2 + $0x58] sm:$0xff]  }
 0x313   :  { %1499 = vmatpush.msra.mxu1 %v5793_v35  ;;  %1557 = vmatpush.msra.mxu2 %v5793_v35  ;;  %v3480_v19 = vunpack.c.l.bf16 %v3516_v48  ;;  %v3481_v32 = vunpack.c.h.bf16 %v3516_v48 }
 0x314   :  { %1615 = vmatpush.msra.mxu3 %v5793_v35  ;;  %v3518_v35 = vld [vmem:[%s6668_s2 + $0x68] sm:$0xff]  }
 0x315   :  { %1500 = vmatpush.msra.mxu1 %v5801_v18  ;;  %1558 = vmatpush.msra.mxu2 %v5801_v18  ;;  %v3488_v40 = vunpack.c.l.bf16 %v3518_v35  ;;  %v3489_v59 = vunpack.c.h.bf16 %v3518_v35 }
 0x316   :  { %1616 = vmatpush.msra.mxu3 %v5801_v18  ;;  %v3520_v18 = vld [vmem:[%s6668_s2 + $0x78] sm:$0xff]  }
 0x317   :  { %1501 = vmatmul.f32.vlgmr.msra.gmra.mxu1 %v3484_v60  ;;  %v3496_v57 = vunpack.c.l.bf16 %v3520_v18  ;;  %v3497_v58 = vunpack.c.h.bf16 %v3520_v18  ;;  %1687 = vmatpush.msrb.mxu2 %v1153_v63 }
 0x318   :  { %1446 = vmatmul.f32.gmra.mxu3 %v3477_v37  ;;  %1559 = vmatmul.f32.vlgmr.msra.gmra.mxu2 %v3492_v38 }
 0x31f   :  { %1504 = vmatmul.f32.gmra.mxu1 %v3485_v51 }
 0x320   :  { %1449 = vmatmul.f32.gmra.mxu3 %v3480_v19  ;;  %1562 = vmatmul.f32.gmra.mxu2 %v3493_v61 }
 0x327   :  { %1507 = vmatmul.f32.gmra.mxu1 %v3488_v40 }
 0x328   :  { %1452 = vmatmul.f32.gmra.mxu3 %v3481_v32  ;;  %1565 = vmatmul.f32.gmra.mxu2 %v3496_v57 }
 0x32f   :  { %1510 = vmatmul.f32.gmra.mxu1 %v3489_v59 }
 0x330   :  { %1568 = vmatmul.f32.gmra.mxu2 %v3497_v58  ;;  %1617 = vmatmul.f32.vlgmr.msra.gmra.mxu3 %v3500_v55  ;;  %v1130_v55 = vld [vmem:[%s6669_s3 + $0x40] sm:$0xff] }
 0x338   :  { %1620 = vmatmul.f32.gmra.mxu3 %v3501_v42  ;;  %v1127_v42 = vld [vmem:[%s6669_s3 + $0x28] sm:$0xff] }
 0x340   :  { %1623 = vmatmul.f32.gmra.mxu3 %v3504_v36 }
 0x348   :  { %1626 = vmatmul.f32.gmra.mxu3 %v3505_v47 }
 0x34e   :  { %v1183_v44 = vpop.f32.mrf.mxu1 }
 0x34f   :  { %1195 = vst.msk [vmem:[#allocation2] sm:$0xff] %vm929_vm2, %v1183_v44 }
 0x355   :  { %v5943_v62 = vpop.f32.mrf.mxu2 }
 0x357   :  { %v1186_v41 = vpop.f32.mrf.mxu1  ;;  %v5946_v39 = vpop.f32.mrf.mxu3 }
 0x358   :  { %1196 = vst.msk [vmem:[#allocation2 + $0x18] sm:$0xff] %vm929_vm2, %v1186_v41  ;;  %v1137_v41 = vld [vmem:[%s6669_s3 + $0x78] sm:$0xff] }
 0x359   :  { %3523 = vmatpush.msrb.mxu3 %v1137_v41  ;;  %1658 = vmatpush.msrb.mxu1 %v1137_v41  ;;  %v1155_v41 = vld [vmem:[%s6669_s3 + $0x108] sm:$0xff] }
 0x35d   :  { %v1228_v56 = vpop.f32.mrf.mxu2 }
 0x35e   :  { %1243 = vrot.lane.b32.xlu0 %v1228_v56, %s3569_s15  ;;  %v1136_v56 = vld [vmem:[%s6669_s3 + $0x70] sm:$0xff] }
 0x35f   :  { %v1189_v43 = vpop.f32.mrf.mxu1  ;;  %3524 = vmatpush.msrb.mxu3 %v1136_v56  ;;  %1659 = vmatpush.msrb.mxu1 %v1136_v56 }
 0x360   :  { %1197 = vst.msk [vmem:[#allocation2 + $0x30] sm:$0xff] %vm929_vm2, %v1189_v43  ;;  %v1135_v43 = vld [vmem:[%s6669_s3 + $0x68] sm:$0xff] }
 0x361   :  { %3525 = vmatpush.msrb.mxu3 %v1135_v43  ;;  %1660 = vmatpush.msrb.mxu1 %v1135_v43  ;;  %v1140_v43 = vld [vmem:[%s6669_s3 + $0x90] sm:$0xff] }
 0x366   :  { %v1231_v49 = vpop.f32.mrf.mxu2 }
 0x367   :  { %1245 = vrot.lane.b32.xlu1 %v1231_v49, %s3569_s15  ;;  %v1131_v49 = vld [vmem:[%s6669_s3 + $0x48] sm:$0xff] }
 0x368   :  { %v1287_v20 = vpop.f32.mrf.mxu3  ;;  %v1192_v53 = vpop.f32.mrf.mxu1 }
 0x369   :  { %1302 = vrot.lane.b32.xlu0 %v1287_v20, %s3570_s17  ;;  %1198 = vst.msk [vmem:[#allocation2 + $0x48] sm:$0xff] %vm929_vm2, %v1192_v53  ;;  %v1129_v20 = vld [vmem:[%s6669_s3 + $0x38] sm:$0xff]  ;;  %v1128_v53 = vld [vmem:[%s6669_s3 + $0x30] sm:$0xff] }
 0x36e   :  { %v1234_v34 = vpop.f32.mrf.mxu2 }
 0x370   :  { %v1343_v46 = vpop.f32.mrf.mxu1 }
 0x371   :  { %1247 = vrot.lane.b32.xlu0 %v1234_v34, %s3569_s15  ;;  %v1126_v34 = vld [vmem:[%s6669_s3 + $0x20] sm:$0xff] }
 0x378   :  { %v1402_v45 = vpop.f32.mrf.mxu2 }
 0x379   :  { %1414 = vst.msk [vmem:[#allocation2 + $0x8] sm:$0xff] %vm929_vm2, %v1402_v45  ;;  %v1124_v45 = vld [vmem:[%s6669_s3 + $0x10] sm:$0xff] }
 0x37b   :  { %v1290_v54 = vpop.f32.mrf.mxu3  ;;  %v1346_v52 = vpop.f32.mrf.mxu1 }
 0x37c   :  { %1304 = vrot.lane.b32.xlu2 %v1290_v54, %s3570_s17  ;;  %1361 = vrot.lane.b32.xlu1 %v1346_v52, %s3571_s20  ;;  %v1152_v54 = vld [vmem:[%s6669_s3 + $0xf0] sm:$0xff]  ;;  %v1123_v52 = vld [vmem:[%s6669_s3 + $0x8] sm:$0xff] }
 0x37d   :  { %1688 = vmatpush.msrb.mxu2 %v1152_v54 }
 0x381   :  { %v1405_v17 = vpop.f32.mrf.mxu2 }
 0x382   :  { %1415 = vst.msk [vmem:[#allocation2 + $0x20] sm:$0xff] %vm929_vm2, %v1405_v17 }
 0x384   :  { %v1293_v16 = vpop.f32.mrf.mxu3  ;;  %v1349_v50 = vpop.f32.mrf.mxu1 }
 0x385   :  { %1306 = vrot.lane.b32.xlu1 %v1293_v16, %s3570_s17  ;;  %1363 = vrot.lane.b32.xlu2 %v1349_v50, %s3571_s20  ;;  %v1151_v16 = vld [vmem:[%s6669_s3 + $0xe8] sm:$0xff]  ;;  %v1122_v50 = vld [vmem:[%s6669_s3] sm:$0xff] }
 0x386   :  { %1689 = vmatpush.msrb.mxu2 %v1151_v16 }
 0x38a   :  { %v1408_v60 = vpop.f32.mrf.mxu2 }
 0x38b   :  { %1416 = vst.msk [vmem:[#allocation2 + $0x38] sm:$0xff] %vm929_vm2, %v1408_v60  ;;  %v1150_v60 = vld [vmem:[%s6669_s3 + $0xe0] sm:$0xff] }
 0x38c   :  { %v1352_v37 = vpop.f32.mrf.mxu1  ;;  %1690 = vmatpush.msrb.mxu2 %v1150_v60 }
 0x38d   :  { %1365 = vrot.lane.b32.xlu2 %v1352_v37, %s3571_s20  ;;  %v1149_v37 = vld [vmem:[%s6669_s3 + $0xd8] sm:$0xff] }
 0x38e   :  { %1691 = vmatpush.msrb.mxu2 %v1149_v37 }
 0x393   :  { %v1411_v38 = vpop.f32.mrf.mxu2  ;;  %v1444_v48 = vpop.f32.mrf.mxu3 }
 0x394   :  { %1417 = vst.msk [vmem:[#allocation2 + $0x50] sm:$0xff] %vm929_vm2, %v1411_v38  ;;  %1460 = vrot.lane.b32.xlu0 %v1444_v48, %s3569_s15  ;;  %v1502_v51 = vpop.f32.mrf.mxu1  ;;  %v1148_v48 = vld [vmem:[%s6669_s3 + $0xd0] sm:$0xff] }
 0x395   :  { %1518 = vrot.lane.b32.xlu1 %v1502_v51, %s3570_s17  ;;  %1692 = vmatpush.msrb.mxu2 %v1148_v48  ;;  %v1147_v51 = vld [vmem:[%s6669_s3 + $0xc8] sm:$0xff] }
 0x397   :  { %1693 = vmatpush.msrb.mxu2 %v1147_v51 }
 0x39b   :  { %v1447_v19 = vpop.f32.mrf.mxu3  ;;  %v1560_v61 = vpop.f32.mrf.mxu2 }
 0x39c   :  { %1462 = vrot.lane.b32.xlu0 %v1447_v19, %s3569_s15  ;;  %1576 = vrot.lane.b32.xlu2 %v1560_v61, %s3571_s20  ;;  %v1505_v35 = vpop.f32.mrf.mxu1  ;;  %v1146_v61 = vld [vmem:[%s6669_s3 + $0xc0] sm:$0xff] }
 0x39d   :  { %1520 = vrot.lane.b32.xlu1 %v1505_v35, %s3570_s17  ;;  %v1157_v35 = vld [vmem:[%s6669_s3 + $0x118] sm:$0xff]  ;;  %1694 = vmatpush.msrb.mxu2 %v1146_v61 }
 0x3a3   :  { %v1450_v18 = vpop.f32.mrf.mxu3  ;;  %v1563_v40 = vpop.f32.mrf.mxu2 }
 0x3a4   :  { %1464 = vrot.lane.b32.xlu0 %v1450_v18, %s3569_s15  ;;  %1578 = vrot.lane.b32.xlu2 %v1563_v40, %s3571_s20  ;;  %v1508_v32 = vpop.f32.mrf.mxu1  ;;  %v1145_v18 = vld [vmem:[%s6669_s3 + $0xb8] sm:$0xff] }
 0x3a5   :  { %1522 = vrot.lane.b32.xlu1 %v1508_v32, %s3570_s17  ;;  %v1144_v32 = vld [vmem:[%s6669_s3 + $0xb0] sm:$0xff]  ;;  %1695 = vmatpush.msrb.mxu2 %v1145_v18 }
 0x3a7   :  { %1696 = vmatpush.msrb.mxu2 %v1144_v32 }
 0x3ab   :  { %v1453_v57 = vpop.f32.mrf.mxu3  ;;  %v1566_v59 = vpop.f32.mrf.mxu2 }
 0x3ac   :  { %1466 = vrot.lane.b32.xlu0 %v1453_v57, %s3569_s15  ;;  %1580 = vrot.lane.b32.xlu2 %v1566_v59, %s3571_s20  ;;  %v1511_v58 = vpop.f32.mrf.mxu1  ;;  %v1143_v57 = vld [vmem:[%s6669_s3 + $0xa8] sm:$0xff]  ;;  %v1156_v59 = vld [vmem:[%s6669_s3 + $0x110] sm:$0xff] }
 0x3ad   :  { %1524 = vrot.lane.b32.xlu1 %v1511_v58, %s3570_s17  ;;  %1697 = vmatpush.msrb.mxu2 %v1143_v57  ;;  %v1142_v58 = vld [vmem:[%s6669_s3 + $0xa0] sm:$0xff] }
 0x3af   :  { %1698 = vmatpush.msrb.mxu2 %v1142_v58 }
 0x3b3   :  { %v1569_v44 = vpop.f32.mrf.mxu2  ;;  %v1618_v56 = vpop.f32.mrf.mxu3 }
 0x3b4   :  { %1582 = vrot.lane.b32.xlu0 %v1569_v44, %s3571_s20  ;;  %1241 = vrot.lane.b32.xlu2 %v5943_v62, %s3569_s15  ;;  %v1134_v62 = vld [vmem:[%s6669_s3 + $0x60] sm:$0xff]  ;;  %v1141_v44 = vld [vmem:[%s6669_s3 + $0x98] sm:$0xff]  ;;  %1630 = vst.msk [vmem:[#allocation2 + $0x10] sm:$0xff] %vm929_vm2, %v1618_v56 }
 0x3b5   :  { %1300 = vrot.lane.b32.xlu1 %v5946_v39, %s3570_s17  ;;  %3526 = vmatpush.msrb.mxu3 %v1134_v62  ;;  %v1133_v39 = vld [vmem:[%s6669_s3 + $0x58] sm:$0xff] }
 0x3b6   :  { %1661 = vmatpush.msrb.mxu1 %v1134_v62  ;;  %1699 = vmatpush.msrb.mxu2 %v1141_v44 }
 0x3b7   :  { %3527 = vmatpush.msrb.mxu3 %v1133_v39 }
 0x3b8   :  { %1662 = vmatpush.msrb.mxu1 %v1133_v39  ;;  %1700 = vmatpush.msrb.mxu2 %v1140_v43 }
 0x3b9   :  { %3528 = vmatpush.msrb.mxu3 %v1132_v33 }
 0x3ba   :  { %1663 = vmatpush.msrb.mxu1 %v1132_v33  ;;  %v1139_v33 = vld [vmem:[%s6669_s3 + $0x88] sm:$0xff] }
 0x3bb   :  { %3529 = vmatpush.msrb.mxu3 %v1131_v49  ;;  %1701 = vmatpush.msrb.mxu2 %v1139_v33 }
 0x3bc   :  { %1359 = vrot.lane.b32.xlu2 %v1343_v46, %s3571_s20  ;;  %1664 = vmatpush.msrb.mxu1 %v1131_v49  ;;  %v1125_v46 = vld [vmem:[%s6669_s3 + $0x18] sm:$0xff]  ;;  %v1138_v49 = vld [vmem:[%s6669_s3 + $0x80] sm:$0xff] }
 0x3bd   :  { %3530 = vmatpush.msrb.mxu3 %v1130_v55  ;;  %1702 = vmatpush.msrb.mxu2 %v1138_v49 }
 0x3be   :  { %1665 = vmatpush.msrb.mxu1 %v1130_v55  ;;  %v1154_v55 = vld [vmem:[%s6669_s3 + $0x100] sm:$0xff] }
 0x3bf   :  { %3531 = vmatpush.msrb.mxu3 %v1129_v20 }
 0x3c0   :  { %1666 = vmatpush.msrb.mxu1 %v1129_v20  ;;  %v1621_v20 = vpop.f32.mrf.mxu3 }
 0x3c1   :  { %3532 = vmatpush.msrb.mxu3 %v1128_v53  ;;  %1631 = vst.msk [vmem:[#allocation2 + $0x28] sm:$0xff] %vm929_vm2, %v1621_v20 }
 0x3c2   :  { %1667 = vmatpush.msrb.mxu1 %v1128_v53 }
 0x3c3   :  { %3533 = vmatpush.msrb.mxu3 %v1127_v42 }
 0x3c4   :  { %1668 = vmatpush.msrb.mxu1 %v1127_v42 }
 0x3c5   :  { %3534 = vmatpush.msrb.mxu3 %v1126_v34 }
 0x3c6   :  { %1669 = vmatpush.msrb.mxu1 %v1126_v34 }
 0x3c7   :  { %3535 = vmatpush.msrb.mxu3 %v1125_v46 }
 0x3c8   :  { %1670 = vmatpush.msrb.mxu1 %v1125_v46  ;;  %v1624_v46 = vpop.f32.mrf.mxu3  ;;  %v1639_v48 = vld [vmem:[#allocation2 + $0x28] sm:$0xff] }
 0x3c9   :  { %3536 = vmatpush.msrb.mxu3 %v1124_v45  ;;  %1632 = vst.msk [vmem:[#allocation2 + $0x40] sm:$0xff] %vm929_vm2, %v1624_v46 }
 0x3ca   :  { %1671 = vmatpush.msrb.mxu1 %v1124_v45 }
 0x3cb   :  { %3537 = vmatpush.msrb.mxu3 %v1123_v52 }
 0x3cc   :  { %1672 = vmatpush.msrb.mxu1 %v1123_v52 }
 0x3cd   :  { %3538 = vmatpush.msrb.mxu3 %v1122_v50 }
 0x3ce   :  { %1673 = vmatpush.msrb.mxu1 %v1122_v50  ;;  %v1636_v50 = vld [vmem:[#allocation2 + $0x10] sm:$0xff] }
 0x3cf   :  { %1728 = vmatpush.msra.mxu3 %v1157_v35 }
 0x3d0   :  { %v1244_v36 = vpop.permute.xlu0 %1243  ;;  %v1627_v16 = vpop.f32.mrf.mxu3  ;;  %v1642_v35 = vld [vmem:[#allocation2 + $0x40] sm:$0xff] }
 0x3d1   :  { %1255 = vst.msk [vmem:[#allocation2 + $0x18] sm:$0xff] %vm1253_vm7, %v1244_v36  ;;  %1729 = vmatpush.msra.mxu3 %v1156_v59 }
 0x3d2   :  { %1633 = vst.msk [vmem:[#allocation2 + $0x58] sm:$0xff] %vm929_vm2, %v1627_v16 }
 0x3d3   :  { %1730 = vmatpush.msra.mxu3 %v1155_v41 }
 0x3d5   :  { %1731 = vmatpush.msra.mxu3 %v1154_v55 }
 0x3d6   :  { %v1305_v17 = vpop.permute.xlu2 %1304 }
 0x3d9   :  { %v1246_v47 = vpop.permute.xlu1 %1245  ;;  %v1645_v57 = vld [vmem:[#allocation2 + $0x58] sm:$0xff] }
 0x3da   :  { %1256 = vst.msk [vmem:[#allocation2 + $0x30] sm:$0xff] %vm1253_vm7, %v1246_v47 }
 0x3db   :  { %v1303_v38 = vpop.permute.xlu0 %1302  ;;  %1315 = vst.msk [vmem:[#allocation2 + $0x30] sm:$0xff] %vm1312_vm8, %v1305_v17 }
 0x3dc   :  { %1314 = vst.msk [vmem:[#allocation2 + $0x18] sm:$0xff] %vm1312_vm8, %v1303_v38 }
 0x3df   :  { %v1364_v19 = vpop.permute.xlu2 %1363 }
 0x3e0   :  { %1374 = vst.msk [vmem:[#allocation2 + $0x30] sm:$0xff] %vm1371_vm9, %v1364_v19 }
 0x3e3   :  { %v1248_v40 = vpop.permute.xlu0 %1247 }
 0x3e4   :  { %1257 = vst.msk [vmem:[#allocation2 + $0x48] sm:$0xff] %vm1253_vm7, %v1248_v40 }
 0x3e7   :  { %v1366_v62 = vpop.permute.xlu2 %1365  ;;  %v1640_v36 = vld [vmem:[#allocation2 + $0x30] sm:$0xff] }
 0x3ee   :  { %v1362_v39 = vpop.permute.xlu1 %1361 }
 0x3ef   :  { %1373 = vst.msk [vmem:[#allocation2 + $0x18] sm:$0xff] %vm1371_vm9, %v1362_v39 }
 0x3f6   :  { %v1577_v53 = vpop.permute.xlu2 %1576  ;;  %v1637_v42 = vld [vmem:[#allocation2 + $0x18] sm:$0xff] }
 0x3f7   :  { %v1307_v34 = vpop.permute.xlu1 %1306  ;;  %1677 = vmatmul.f32.vlgmr.msrb.gmra.mxu3 %v1637_v42 }
 0x3f8   :  { %1316 = vst.msk [vmem:[#allocation2 + $0x48] sm:$0xff] %vm1312_vm8, %v1307_v34  ;;  %v3572_v34 = vmov 32.0  }
 0x3f9   :  { %1375 = vst.msk [vmem:[#allocation2 + $0x48] sm:$0xff] %vm1371_vm9, %v1366_v62  ;;  %3550 = vrcp.f32 %v3572_v34 }
 0x3fe   :  { %v1579_v63 = vpop.permute.xlu2 %1578 }
 0x3ff   :  { %1680 = vmatmul.f32.gmra.mxu3 %v1640_v36 }
 0x400   :  { %v1643_v52 = vld [vmem:[#allocation2 + $0x48] sm:$0xff] }
 0x406   :  { %v1461_v45 = vpop.permute.xlu0 %1460  ;;  %v1581_v54 = vpop.permute.xlu2 %1580 }
 0x407   :  { %1472 = vst.msk [vmem:[#allocation2 + $0x8] sm:$0xff] %vm1253_vm7, %v1461_v45  ;;  %v1519_v17 = vpop.permute.xlu1 %1518  ;;  %1683 = vmatmul.f32.gmra.mxu3 %v1643_v52  ;;  %v3551_v52 = vpop.eup %3550 }
 0x408   :  { %1530 = vst.msk [vmem:[#allocation2 + $0x8] sm:$0xff] %vm1312_vm8, %v1519_v17  ;;  %vm1765_vm11 = vweird.f32 %v3551_v52 }
 0x409   :  { %1588 = vst.msk [vmem:[#allocation2 + $0x8] sm:$0xff] %vm1371_vm9, %v1577_v53 }
 0x40e   :  { %v1463_v47 = vpop.permute.xlu0 %1462  ;;  %v1242_v60 = vpop.permute.xlu2 %1241 }
 0x40f   :  { %1473 = vst.msk [vmem:[#allocation2 + $0x20] sm:$0xff] %vm1253_vm7, %v1463_v47  ;;  %v1521_v37 = vpop.permute.xlu1 %1520  ;;  %3393 = vmatmul.msk.f32.vlgmr.msra.gmra.mxu3 %vm929_vm2, %v1636_v50 }
 0x410   :  { %1254 = vst.msk [vmem:[#allocation2] sm:$0xff] %vm1253_vm7, %v1242_v60  ;;  %v1635_v38 = vld [vmem:[#allocation2 + $0x8] sm:$0xff] }
 0x411   :  { %1531 = vst.msk [vmem:[#allocation2 + $0x20] sm:$0xff] %vm1312_vm8, %v1521_v37  ;;  %1703 = vmatmul.f32.vlgmr.msrb.gmra.mxu2 %v1635_v38 }
 0x412   :  { %1589 = vst.msk [vmem:[#allocation2 + $0x20] sm:$0xff] %vm1371_vm9, %v1579_v63 }
 0x416   :  { %v1465_v51 = vpop.permute.xlu0 %1464  ;;  %v1360_v44 = vpop.permute.xlu2 %1359 }
 0x417   :  { %1474 = vst.msk [vmem:[#allocation2 + $0x38] sm:$0xff] %vm1253_vm7, %v1465_v51  ;;  %v1523_v19 = vpop.permute.xlu1 %1522  ;;  %3394 = vmatmul.msk.f32.gmra.mxu3 %vm929_vm2, %v1639_v48  ;;  %v1761_v48 = vmul.f32 32.0, %v3551_v52 }
 0x418   :  { %1532 = vst.msk [vmem:[#allocation2 + $0x38] sm:$0xff] %vm1312_vm8, %v1523_v19 }
 0x419   :  { %1590 = vst.msk [vmem:[#allocation2 + $0x38] sm:$0xff] %vm1371_vm9, %v1581_v54  ;;  %v1638_v61 = vld [vmem:[#allocation2 + $0x20] sm:$0xff] }
 0x41a   :  { %1706 = vmatmul.f32.gmra.mxu2 %v1638_v61 }
 0x41e   :  { %v1467_v18 = vpop.permute.xlu0 %1466 }
 0x41f   :  { %1475 = vst.msk [vmem:[#allocation2 + $0x50] sm:$0xff] %vm1253_vm7, %v1467_v18  ;;  %v1525_v40 = vpop.permute.xlu1 %1524  ;;  %3395 = vmatmul.msk.f32.gmra.mxu3 %vm929_vm2, %v1642_v35 }
 0x420   :  { %1533 = vst.msk [vmem:[#allocation2 + $0x50] sm:$0xff] %vm1312_vm8, %v1525_v40  ;;  %v1641_v32 = vld [vmem:[#allocation2 + $0x38] sm:$0xff]  ;;  %v1762_v40 = vsub.f32 1.0, %v1761_v48 }
 0x422   :  { %1709 = vmatmul.f32.gmra.mxu2 %v1641_v32 }
 0x426   :  { %v1583_v59 = vpop.permute.xlu0 %1582 }
 0x427   :  { %1591 = vst.msk [vmem:[#allocation2 + $0x50] sm:$0xff] %vm1371_vm9, %v1583_v59  ;;  %v1301_v58 = vpop.permute.xlu1 %1300  ;;  %3396 = vmatmul.msk.f32.gmra.mxu3 %vm929_vm2, %v1645_v57  ;;  %v1763_v59 = vmul.f32 %v3551_v52, %v1762_v40 }
 0x428   :  { %1313 = vst.msk [vmem:[#allocation2] sm:$0xff] %vm1312_vm8, %v1301_v58 }
 0x429   :  { %1372 = vst.msk [vmem:[#allocation2] sm:$0xff] %vm1371_vm9, %v1360_v44 }
 0x42e   :  { %v1644_v41 = vld [vmem:[#allocation2 + $0x50] sm:$0xff] }
 0x42f   :  { %1712 = vmatmul.f32.gmra.mxu2 %v1644_v41  ;;  %v1764_v41 = vadd.f32 %v3551_v52, %v1763_v59 }
 0x430   :  { %v1634_v56 = vld [vmem:[#allocation2] sm:$0xff] }
 0x431   :  { %1674 = vmatmul.f32.vlgmr.msrb.gmra.mxu1 %v1634_v56 }
 0x47a   :  { %v1678_v43 = vpop.f32.mrf.mxu3 }
 0x482   :  { %v1681_v62 = vpop.f32.mrf.mxu3 }
 0x48a   :  { %v1684_v39 = vpop.f32.mrf.mxu3 }
 0x492   :  { %v1733_v49 = vpop.f32.mrf.mxu3 }
 0x494   :  { %v1704_v33 = vpop.f32.mrf.mxu2 }
 0x49a   :  { %v1736_v20 = vpop.f32.mrf.mxu3 }
 0x49d   :  { %v1707_v55 = vpop.f32.mrf.mxu2 }
 0x49e   :  { %v1708_v46 = vadd.f32 %v1707_v55, %v1678_v43 }
 0x4a0   :  { %v1737_v45 = vadd.f32 %v1736_v20, %v1708_v46 }
 0x4a2   :  { %v1739_v42 = vpop.f32.mrf.mxu3  ;;  %v1748_v60 = vsel %vm1746_vm10, %v1737_v45, 0.0 }
 0x4a5   :  { %v1710_v53 = vpop.f32.mrf.mxu2 }
 0x4a6   :  { %v1711_v63 = vadd.f32 %v1710_v53, %v1681_v62  ;;  %v1766_v62 = vsel %vm1765_vm11, %v3551_v52, %v1764_v41 }
 0x4a8   :  { %v1740_v17 = vadd.f32 %v1739_v42, %v1711_v63 }
 0x4aa   :  { %v1742_v47 = vpop.f32.mrf.mxu3  ;;  %v1750_v19 = vsel %vm1746_vm10, %v1740_v17, 0.0 }
 0x4ae   :  { %v1675_v36 = vpop.f32.mrf.mxu1 }
 0x4af   :  { %v1705_v54 = vadd.f32 %v1704_v33, %v1675_v36 }
 0x4b1   :  { %v1734_v16 = vadd.f32 %v1733_v49, %v1705_v54 }
 0x4b2   :  { %v1713_v50 = vpop.f32.mrf.mxu2 }
 0x4b3   :  { %v1747_v37 = vsel %vm1746_vm10, %v1734_v16, 0.0  ;;  %v1714_v38 = vadd.f32 %v1713_v50, %v1684_v39 }
 0x4b4   :  { %v1749_v51 = vadd.f32 %v1748_v60, %v1747_v37 }
 0x4b5   :  { %v1743_v61 = vadd.f32 %v1742_v47, %v1714_v38 }
 0x4b6   :  { %v1751_v35 = vadd.f32 %v1750_v19, %v1749_v51 }
 0x4b7   :  { %v1752_v18 = vsel %vm1746_vm10, %v1743_v61, 0.0 }
 0x4b8   :  { %v1753_v32 = vadd.f32 %v1752_v18, %v1751_v35 }
 0x4ba   :  { %v1754_v57 = vrot.slane %v1753_v32, 4 }
 0x4bc   :  { %v1755_v58 = vadd.f32 %v1754_v57, %v1753_v32  ;;  %v1745_v57 = vld [vmem:[%s6675_s9] sm:$0x3] }
 0x4be   :  { %v1756_v44 = vrot.slane %v1755_v58, 2 }
 0x4c0   :  { %v1757_v56 = vadd.f32 %v1756_v44, %v1755_v58  ;;  %v1805_v44 = vperm.slane %v1745_v57, 0 }
 0x4c2   :  { %v1758_v43 = vrot.slane %v1757_v56, 1 }
 0x4c4   :  { %v1759_v39 = vadd.f32 %v1758_v43, %v1757_v56  ;;  %v1810_v56 = vperm.slane %v1745_v57, 1 }
 0x4c6   :  { %v1767_v33 = vmul.f32 %v1766_v62, %v1759_v39 }
 0x4c8   :  { %v1768_v49 = vsub.f32 %v1734_v16, %v1767_v33  ;;  %v1769_v55 = vsub.f32 %v1737_v45, %v1767_v33  ;;  %v1770_v20 = vsub.f32 %v1740_v17, %v1767_v33  ;;  %v1771_v53 = vsub.f32 %v1743_v61, %v1767_v33 }
 0x4ca   :  { %v1772_v42 = vmul.f32 %v1768_v49, %v1768_v49  ;;  %v1773_v34 = vmul.f32 %v1769_v55, %v1769_v55  ;;  %v1774_v46 = vmul.f32 %v1770_v20, %v1770_v20  ;;  %v1775_v63 = vmul.f32 %v1771_v53, %v1771_v53 }
 0x4cc   :  { %v1776_v36 = vsel %vm1746_vm10, %v1772_v42, 0.0  ;;  %v1777_v54 = vsel %vm1746_vm10, %v1773_v34, 0.0  ;;  %v1779_v47 = vsel %vm1746_vm10, %v1774_v46, 0.0  ;;  %v1781_v52 = vsel %vm1746_vm10, %v1775_v63, 0.0 }
 0x4cd   :  { %v1778_v50 = vadd.f32 %v1777_v54, %v1776_v36 }
 0x4cf   :  { %v1780_v60 = vadd.f32 %v1779_v47, %v1778_v50 }
 0x4d1   :  { %v1782_v37 = vadd.f32 %v1781_v52, %v1780_v60 }
 0x4d3   :  { %v1783_v38 = vrot.slane %v1782_v37, 4 }
 0x4d5   :  { %v1784_v16 = vadd.f32 %v1783_v38, %v1782_v37 }
 0x4d7   :  { %v1785_v45 = vrot.slane %v1784_v16, 2 }
 0x4d9   :  { %v1786_v17 = vadd.f32 %v1785_v45, %v1784_v16 }
 0x4db   :  { %v1787_v48 = vrot.slane %v1786_v17, 1 }
 0x4dd   :  { %v1788_v51 = vadd.f32 %v1787_v48, %v1786_v17 }
 0x4df   :  { %v1789_v19 = vmul.f32 %v1788_v51, %v1766_v62 }
 0x4e1   :  { %v1790_v61 = vadd.f32 1e-05, %v1789_v19 }
 0x4e3   :  { %3552 = vrsqrt.f32 %v1790_v61  ;;  %vm1797_vm13 = vweird.f32 %v1790_v61 }
 0x4e9   :  { %v3553_v35 = vpop.eup %3552 }
 0x4ea   :  { %v1792_v18 = vmul.f32 %v3553_v35, %v1790_v61  ;;  %vm1798_vm12 = vweird.f32 %v3553_v35 }
 0x4eb   :  { %vm1799_vm14 = vmor %vm1797_vm13, %vm1798_vm12 }
 0x4ec   :  { %v1793_v40 = vmul.f32 %v3553_v35, %v1792_v18 }
 0x4ee   :  { %v1794_v32 = vmul.f32 0.5, %v1793_v40 }
 0x4f0   :  { %v1795_v59 = vsub.f32 1.5, %v1794_v32 }
 0x4f2   :  { %v1796_v58 = vmul.f32 %v3553_v35, %v1795_v59 }
 0x4f4   :  { %v1800_v41 = vsel %vm1799_vm14, %v3553_v35, %v1796_v58 }
 0x4f5   :  { %v1801_v43 = vmul.f32 %v1800_v41, %v1768_v49  ;;  %v1802_v62 = vmul.f32 %v1800_v41, %v1769_v55  ;;  %v1803_v39 = vmul.f32 %v1800_v41, %v1770_v20  ;;  %v1804_v33 = vmul.f32 %v1800_v41, %v1771_v53 }
 0x4f7   :  { %v1806_v42 = vmul.f32 %v1805_v44, %v1801_v43  ;;  %v1807_v34 = vmul.f32 %v1805_v44, %v1802_v62  ;;  %v1808_v46 = vmul.f32 %v1805_v44, %v1803_v39  ;;  %v1809_v63 = vmul.f32 %v1805_v44, %v1804_v33 }
 0x4f9   :  { %v1811_v36 = vadd.f32 %v1810_v56, %v1806_v42  ;;  %v1812_v54 = vadd.f32 %v1810_v56, %v1807_v34  ;;  %v1813_v50 = vadd.f32 %v1810_v56, %v1808_v46  ;;  %v1814_v47 = vadd.f32 %v1810_v56, %v1809_v63 }
 0x4fb   :  { %v6137_v60 = vmax.f32 %v1811_v36, 0.0  ;;  %v6139_v52 = vmax.f32 %v1812_v54, 0.0  ;;  %v6141_v37 = vmax.f32 %v1813_v50, 0.0  ;;  %v6143_v38 = vmax.f32 %v1814_v47, 0.0 }
 0x4fc   :  { %3564 = dma.done.wait [#allocation7], 9216 }
 0x4fd   :  { %3565 = vsyncadd [#allocation7], 4294958080  ;;  %1911 = vmatpush.msrb.mxu0 %v6143_v38  ;;  %2028 = vmatpush.msra.mxu1 %v6143_v38  ;;  %v7029_v49 = vld [vmem:[#allocation28_spill] sm:$0xff]  ;;  %v7030_v55 = vld [vmem:[#allocation27_spill] sm:$0xff]  ;;  %vm1950_vm15 = vcmask 1048064  }
 0x4fe   :  { %2086 = vmatpush.msrb.mxu3 %v6143_v38  ;;  %2161 = vmatpush.msra.mxu2 %v3718_v15  ;;  %v1894_v15 = vld [vmem:[%s6670_s4] sm:$0xff]   ;;  %v7031_v20 = vld [vmem:[#allocation26_spill] sm:$0xff]  ;;  %v7032_v53 = vld [vmem:[#allocation25_spill] sm:$0xff] }
 0x4ff   :  { %1912 = vmatpush.msrb.mxu0 %v6141_v37  ;;  %2029 = vmatpush.msra.mxu1 %v6141_v37  ;;  %v7033_v16 = vld [vmem:[#allocation24_spill] sm:$0xff]  ;;  %v7034_v45 = vld [vmem:[#allocation23_spill] sm:$0xff]  ;;  %v7035_v17 = vld [vmem:[#allocation22_spill] sm:$0xff] }
 0x500   :  { %2087 = vmatpush.msrb.mxu3 %v6141_v37  ;;  %2162 = vmatpush.msra.mxu2 %v3713_v14  ;;  %v1895_v14 = vunpack.c.l.bf16 %v1894_v15  ;;  %v7036_v48 = vld [vmem:[#allocation21_spill] sm:$0xff]  ;;  %v7037_v51 = vld [vmem:[#allocation20_spill] sm:$0xff]  ;;  %v7038_v19 = vld [vmem:[#allocation19_spill] sm:$0xff] }
 0x501   :  { %1913 = vmatpush.msrb.mxu0 %v6139_v52  ;;  %2030 = vmatpush.msra.mxu1 %v6139_v52  ;;  %v7039_v61 = vld [vmem:[#allocation18_spill] sm:$0xff]  ;;  %v7040_v35 = vld [vmem:[#allocation17_spill] sm:$0xff]  ;;  %v7041_v57 = vld [vmem:[#allocation48_spill] sm:$0xff] }
 0x502   :  { %2088 = vmatpush.msrb.mxu3 %v6139_v52  ;;  %2163 = vmatpush.msra.mxu2 %v3708_v13  ;;  %v7019_v13 = vld [vmem:[#allocation13_spill] sm:$0xff]  ;;  %v7042_v59 = vld [vmem:[#allocation47_spill] sm:$0xff]  ;;  %v7043_v58 = vld [vmem:[#allocation46_spill] sm:$0xff] }
 0x503   :  { %1914 = vmatpush.msrb.mxu0 %v6137_v60  ;;  %2031 = vmatpush.msra.mxu1 %v6137_v60  ;;  %v3404_v18 = vld [vmem:[%s6670_s4 + $0x10] sm:$0xf]  ;;  %v7045_v56 = vld [vmem:[#allocation44_spill] sm:$0xff]  ;;  %v7046_v43 = vld [vmem:[#allocation43_spill] sm:$0xff] }
 0x504   :  { %2089 = vmatpush.msrb.mxu3 %v6137_v60  ;;  %2164 = vmatpush.msra.mxu2 %v3703_v12  ;;  %v1922_v12 = vunpack.c.h.bf16 %v1894_v15  ;;  %v2012_v40 = vunpack.c.l.bf16 %v3404_v18  ;;  %v7044_v41 = vld [vmem:[#allocation45_spill] sm:$0xff]  ;;  %v7047_v62 = vld [vmem:[#allocation42_spill] sm:$0xff]  ;;  %v7049_v42 = vld [vmem:[#allocation40_spill] sm:$0xff] }
 0x505   :  { %1938 = vmatpush.msra.mxu0 %v6143_v38  ;;  %2144 = vmatpush.msrb.mxu1 %v6143_v38  ;;  %v7048_v33 = vld [vmem:[#allocation41_spill] sm:$0xff]  ;;  %v7050_v34 = vld [vmem:[#allocation39_spill] sm:$0xff]  ;;  %v7051_v46 = vld [vmem:[#allocation38_spill] sm:$0xff] }
 0x506   :  { %3397 = vmatmul.msk.f32.vlgmr.msrb.gmra.mxu0 %vm929_vm2, %v1895_v14  ;;  %2165 = vmatpush.msra.mxu2 %v3698_v11  ;;  %v7018_v11 = vld [vmem:[#allocation53_spill] sm:$0xff]  ;;  %v7053_v54 = vld [vmem:[#allocation36_spill] sm:$0xff]  ;;  %v7054_v50 = vld [vmem:[#allocation35_spill] sm:$0xff] }
 0x507   :  { %1939 = vmatpush.msra.mxu0 %v6141_v37  ;;  %2145 = vmatpush.msrb.mxu1 %v6141_v37  ;;  %v7052_v36 = vld [vmem:[#allocation37_spill] sm:$0xff]  ;;  %v7055_v47 = vld [vmem:[#allocation34_spill] sm:$0xff] }
 0x508   :  { %2166 = vmatpush.msra.mxu2 %v3693_v10  ;;  %2181 = vmatpush.msra.mxu3 %v3798_v31  ;;  %v3400_v10 = vld [vmem:[%s6670_s4 + $0x8] sm:$0xff]  }
 0x509   :  { %1940 = vmatpush.msra.mxu0 %v6139_v52  ;;  %2146 = vmatpush.msrb.mxu1 %v6139_v52  ;;  %v7028_v31 = vld [vmem:[#allocation29_spill] sm:$0xff] }
 0x50a   :  { %2167 = vmatpush.msra.mxu2 %v3688_v9  ;;  %2182 = vmatpush.msra.mxu3 %v3793_v30  ;;  %v7017_v9 = vld [vmem:[#allocation14_spill] sm:$0xff] }
 0x50b   :  { %1941 = vmatpush.msra.mxu0 %v6137_v60  ;;  %2147 = vmatpush.msrb.mxu1 %v6137_v60  ;;  %v7027_v30 = vld [vmem:[#allocation30_spill] sm:$0xff] }
 0x50c   :  { %2168 = vmatpush.msra.mxu2 %v3683_v8  ;;  %2183 = vmatpush.msra.mxu3 %v3788_v29  ;;  %v1954_v8 = vunpack.c.l.bf16 %v3400_v10  ;;  %v7026_v29 = vld [vmem:[#allocation49_spill] sm:$0xff] }
 0x50d   :  { %1970 = vmatpush.msrb.mxu0 %v6143_v38  ;;  %3405 = vmatmul.msk.f32.vlgmr.msra.gmra.mxu1 %vm929_vm2, %v2012_v40 }
 0x50e   :  { %3399 = vmatmul.msk.f32.vlgmr.msra.gmra.mxu0 %vm929_vm2, %v1922_v12  ;;  %2169 = vmatpush.msra.mxu2 %v3678_v7  ;;  %v7016_v7 = vld [vmem:[#allocation54_spill] sm:$0xff] }
 0x50f   :  { %1971 = vmatpush.msrb.mxu0 %v6141_v37  ;;  %2184 = vmatpush.msra.mxu3 %v3783_v28  ;;  %v7025_v28 = vld [vmem:[#allocation31_spill] sm:$0xff] }
 0x510   :  { %2170 = vmatpush.msra.mxu2 %v3673_v6  ;;  %v7015_v6 = vld [vmem:[#allocation15_spill] sm:$0xff]  ;;  %2221 = vmatpush.msra.mxu1 %v7041_v57 }
 0x511   :  { %1972 = vmatpush.msrb.mxu0 %v6139_v52  ;;  %2185 = vmatpush.msra.mxu3 %v3778_v27  ;;  %v7024_v27 = vld [vmem:[#allocation50_spill] sm:$0xff] }
 0x512   :  { %2171 = vmatpush.msra.mxu2 %v3668_v5  ;;  %v1981_v5 = vunpack.c.h.bf16 %v3400_v10  ;;  %2222 = vmatpush.msra.mxu1 %v7042_v59 }
 0x513   :  { %1973 = vmatpush.msrb.mxu0 %v6137_v60  ;;  %2186 = vmatpush.msra.mxu3 %v3773_v26  ;;  %v7023_v26 = vld [vmem:[#allocation32_spill] sm:$0xff] }
 0x514   :  { %2172 = vmatpush.msra.mxu2 %v3663_v4  ;;  %v7013_v4 = vld [vmem:[#allocation16_spill] sm:$0xff]  ;;  %2223 = vmatpush.msra.mxu1 %v7043_v58 }
 0x515   :  { %1997 = vmatpush.msra.mxu0 %v6143_v38  ;;  %2187 = vmatpush.msra.mxu3 %v3768_v25 }
 0x516   :  { %3401 = vmatmul.msk.f32.vlgmr.msrb.gmra.mxu0 %vm929_vm2, %v1954_v8  ;;  %2173 = vmatpush.msra.mxu2 %v3658_v3  ;;  %v7012_v3 = vld [vmem:[#allocation56_spill] sm:$0xff] }
 0x517   :  { %1998 = vmatpush.msra.mxu0 %v6141_v37  ;;  %2188 = vmatpush.msra.mxu3 %v3763_v24  ;;  %v7022_v24 = vld [vmem:[#allocation51_spill] sm:$0xff] }
 0x518   :  { %2174 = vmatpush.msra.mxu2 %v3653_v2  ;;  %v3406_v2 = vld [vmem:[%s6670_s4 + $0x14] sm:$0xff]   ;;  %2224 = vmatpush.msra.mxu1 %v7044_v41 }
 0x519   :  { %1999 = vmatpush.msra.mxu0 %v6139_v52  ;;  %2189 = vmatpush.msra.mxu3 %v3758_v23  ;;  %v7021_v23 = vld [vmem:[#allocation12_spill] sm:$0xff]  ;;  %v2070_v32 = vunpack.c.h.bf16 %v3406_v2 }
 0x51a   :  { %2175 = vmatpush.msra.mxu2 %v3648_v1  ;;  %v7014_v1 = vld [vmem:[#allocation55_spill] sm:$0xff]  ;;  %2225 = vmatpush.msra.mxu1 %v7045_v56 }
 0x51b   :  { %2000 = vmatpush.msra.mxu0 %v6137_v60  ;;  %2190 = vmatpush.msra.mxu3 %v3753_v22  ;;  %v3410_v22 = vld [vmem:[%s6670_s4 + $0x1c] sm:$0xff]  }
 0x51c   :  { %2176 = vmatpush.msra.mxu2 %v3643_v0  ;;  %v2039_v0 = vunpack.c.l.bf16 %v3406_v2  ;;  %v2097_v25 = vunpack.c.l.bf16 %v3410_v22  ;;  %3409 = vmatmul.msk.f32.vlgmr.msrb.gmra.mxu3 %vm929_vm2, %v2070_v32  ;;  %v2128_v44 = vunpack.c.h.bf16 %v3410_v22 }
 0x51d   :  { %2055 = vmatpush.msrb.mxu0 %v6143_v38  ;;  %2191 = vmatpush.msra.mxu3 %v3748_v21  ;;  %v7020_v21 = vld [vmem:[#allocation52_spill] sm:$0xff] }
 0x51e   :  { %2249 = vmatpush.msrb.mxu2 %v7012_v3  ;;  %3403 = vmatmul.msk.f32.vlgmr.msra.gmra.mxu0 %vm929_vm2, %v1981_v5 }
 0x51f   :  { %2056 = vmatpush.msrb.mxu0 %v6141_v37  ;;  %2192 = vmatpush.msra.mxu3 %v7013_v4 }
 0x520   :  { %2250 = vmatpush.msrb.mxu2 %v7014_v1  ;;  %3413 = vmatmul.msk.f32.vlgmr.msrb.gmra.mxu1 %vm929_vm2, %v2128_v44 }
 0x521   :  { %2057 = vmatpush.msrb.mxu0 %v6139_v52  ;;  %2193 = vmatpush.msra.mxu3 %v7015_v6 }
 0x522   :  { %2251 = vmatpush.msrb.mxu2 %v7016_v7  ;;  %2226 = vmatpush.msra.mxu1 %v7046_v43 }
 0x523   :  { %2058 = vmatpush.msrb.mxu0 %v6137_v60  ;;  %2194 = vmatpush.msra.mxu3 %v7017_v9  ;;  %v3573_v9 = vmov 8.0  }
 0x524   :  { %2252 = vmatpush.msrb.mxu2 %v7018_v11  ;;  %2227 = vmatpush.msra.mxu1 %v7047_v62  ;;  %3554 = vrcp.f32 %v3573_v9 }
 0x525   :  { %2113 = vmatpush.msra.mxu0 %v6143_v38  ;;  %2195 = vmatpush.msra.mxu3 %v7019_v13 }
 0x526   :  { %3407 = vmatmul.msk.f32.vlgmr.msrb.gmra.mxu0 %vm929_vm2, %v2039_v0  ;;  %2253 = vmatpush.msrb.mxu2 %v7020_v21 }
 0x527   :  { %2114 = vmatpush.msra.mxu0 %v6141_v37  ;;  %2196 = vmatpush.msra.mxu3 %v7021_v23 }
 0x528   :  { %2254 = vmatpush.msrb.mxu2 %v7022_v24  ;;  %2228 = vmatpush.msra.mxu1 %v7048_v33 }
 0x529   :  { %2115 = vmatpush.msra.mxu0 %v6139_v52  ;;  %v7056_v52 = vld [vmem:[#allocation33_spill] sm:$0xff] }
 0x52a   :  { %2255 = vmatpush.msrb.mxu2 %v7024_v27  ;;  %2229 = vmatpush.msra.mxu1 %v7049_v42  ;;  %v3555_v21 = vpop.eup %3554 }
 0x52b   :  { %2116 = vmatpush.msra.mxu0 %v6137_v60  ;;  %v2269_v24 = vmul.f32 8.0, %v3555_v21  ;;  %vm2273_vm0 = vweird.f32 %v3555_v21 }
 0x52c   :  { %2256 = vmatpush.msrb.mxu2 %v7026_v29  ;;  %2230 = vmatpush.msra.mxu1 %v7050_v34 }
 0x52d   :  { %2201 = vmatpush.msrb.mxu0 %v7023_v26  ;;  %v2270_v29 = vsub.f32 1.0, %v2269_v24 }
 0x52e   :  { %3411 = vmatmul.msk.f32.vlgmr.msra.gmra.mxu0 %vm929_vm2, %v2097_v25  ;;  %2231 = vmatpush.msra.mxu1 %v7051_v46 }
 0x52f   :  { %2202 = vmatpush.msrb.mxu0 %v7025_v28 }
 0x530   :  { %2232 = vmatpush.msra.mxu1 %v7052_v36 }
 0x531   :  { %2203 = vmatpush.msrb.mxu0 %v7027_v30 }
 0x532   :  { %2233 = vmatpush.msra.mxu1 %v7053_v54 }
 0x533   :  { %2204 = vmatpush.msrb.mxu0 %v7028_v31 }
 0x534   :  { %2234 = vmatpush.msra.mxu1 %v7054_v50 }
 0x535   :  { %2205 = vmatpush.msrb.mxu0 %v7029_v49  ;;  %v2271_v49 = vmul.f32 %v3555_v21, %v2270_v29 }
 0x536   :  { %2235 = vmatpush.msra.mxu1 %v7055_v47 }
 0x537   :  { %2206 = vmatpush.msrb.mxu0 %v7030_v55 }
 0x538   :  { %2236 = vmatpush.msra.mxu1 %v7056_v52 }
 0x539   :  { %2207 = vmatpush.msrb.mxu0 %v7031_v20 }
 0x53b   :  { %2208 = vmatpush.msrb.mxu0 %v7032_v53  ;;  %v2272_v53 = vadd.f32 %v3555_v21, %v2271_v49 }
 0x53d   :  { %2209 = vmatpush.msrb.mxu0 %v7033_v16 }
 0x53f   :  { %2210 = vmatpush.msrb.mxu0 %v7034_v45 }
 0x541   :  { %2211 = vmatpush.msrb.mxu0 %v7035_v17  ;;  %v2274_v17 = vsel %vm2273_vm0, %v3555_v21, %v2272_v53 }
 0x543   :  { %2212 = vmatpush.msrb.mxu0 %v7036_v48 }
 0x545   :  { %2213 = vmatpush.msrb.mxu0 %v7037_v51 }
 0x547   :  { %2214 = vmatpush.msrb.mxu0 %v7038_v19 }
 0x549   :  { %2215 = vmatpush.msrb.mxu0 %v7039_v61 }
 0x54b   :  { %2216 = vmatpush.msrb.mxu0 %v7040_v35 }
 0x583   :  { %v1916_v39 = vpop.f32.mrf.mxu0 }
 0x584   :  { %1919 = vst.msk [vmem:[#allocation3] sm:$0xff] %vm1746_vm10, %v1916_v39  ;;  %v2261_v39 = vld [vmem:[%s6676_s10] sm:$0x3] }
 0x585   :  { %v2297_v34 = vperm.slane %v2261_v39, 0  ;;  %v2299_v36 = vperm.slane %v2261_v39, 1 }
 0x58a   :  { %v2033_v14 = vpop.f32.mrf.mxu1 }
 0x58b   :  { %v1943_v63 = vpop.f32.mrf.mxu0  ;;  %2036 = vst.msk [vmem:[#allocation3 + $0x10] sm:$0xff] %vm1746_vm10, %v2033_v14 }
 0x58c   :  { %1947 = vrot.lane.b32.xlu0 %v1943_v63, %s3570_s17 }
 0x593   :  { %v1975_v60 = vpop.f32.mrf.mxu0 }
 0x594   :  { %1978 = vst.msk [vmem:[#allocation3 + $0x8] sm:$0xff] %vm1746_vm10, %v1975_v60 }
 0x59b   :  { %v2002_v37 = vpop.f32.mrf.mxu0 }
 0x59c   :  { %2006 = vrot.lane.b32.xlu0 %v2002_v37, %s3570_s17 }
 0x59d   :  { %v2149_v10 = vpop.f32.mrf.mxu1 }
 0x59e   :  { %2152 = vst.msk [vmem:[#allocation3 + $0x20] sm:$0xff] %vm1746_vm10, %v2149_v10 }
 0x59f   :  { %v2091_v12 = vpop.f32.mrf.mxu3 }
 0x5a0   :  { %2094 = vst.msk [vmem:[#allocation3 + $0x18] sm:$0xff] %vm1746_vm10, %v2091_v12 }
 0x5a3   :  { %v2060_v38 = vpop.f32.mrf.mxu0 }
 0x5a4   :  { %2064 = vrot.lane.b32.xlu1 %v2060_v38, %s3570_s17 }
 0x5a5   :  { %v2157_v3 = vld [vmem:[#allocation3 + $0x20] sm:$0xff] }
 0x5ab   :  { %v2118_v15 = vpop.f32.mrf.mxu0 }
 0x5ac   :  { %2122 = vrot.lane.b32.xlu1 %v2118_v15, %s3570_s17 }
 0x5fe   :  { %v1948_v8 = vpop.permute.xlu0 %1947 }
 0x5ff   :  { %1951 = vst.msk [vmem:[#allocation3] sm:$0xff] %vm1950_vm15, %v1948_v8 }
 0x606   :  { %v2153_v5 = vld [vmem:[#allocation3] sm:$0xff] }
 0x607   :  { %2177 = vmatmul.f32.vlgmr.msra.gmra.mxu2 %v2153_v5 }
 0x60e   :  { %v2007_v2 = vpop.permute.xlu0 %2006 }
 0x60f   :  { %2009 = vst.msk [vmem:[#allocation3 + $0x8] sm:$0xff] %vm1950_vm15, %v2007_v2  ;;  %3414 = vmatmul.msk.f32.vlgmr.msrb.gmra.mxu2 %vm1746_vm10, %v2157_v3 }
 0x616   :  { %v2065_v4 = vpop.permute.xlu1 %2064  ;;  %v2154_v1 = vld [vmem:[#allocation3 + $0x8] sm:$0xff] }
 0x617   :  { %2067 = vst.msk [vmem:[#allocation3 + $0x10] sm:$0xff] %vm1950_vm15, %v2065_v4  ;;  %2197 = vmatmul.f32.vlgmr.msra.gmra.mxu3 %v2154_v1 }
 0x61e   :  { %v2123_v6 = vpop.permute.xlu1 %2122  ;;  %v2155_v0 = vld [vmem:[#allocation3 + $0x10] sm:$0xff] }
 0x61f   :  { %2125 = vst.msk [vmem:[#allocation3 + $0x18] sm:$0xff] %vm1950_vm15, %v2123_v6  ;;  %2217 = vmatmul.f32.vlgmr.msrb.gmra.mxu0 %v2155_v0 }
 0x626   :  { %v2156_v7 = vld [vmem:[#allocation3 + $0x18] sm:$0xff] }
 0x627   :  { %2237 = vmatmul.f32.vlgmr.msra.gmra.mxu1 %v2156_v7 }
 0x68a   :  { %v2178_v11 = vpop.f32.mrf.mxu2 }
 0x692   :  { %v2258_v27 = vpop.f32.mrf.mxu2 }
 0x69a   :  { %v2198_v13 = vpop.f32.mrf.mxu3 }
 0x69b   :  { %v2199_v22 = vadd.f32 %v2198_v13, %v2178_v11 }
 0x69c   :  { %v2218_v23 = vpop.f32.mrf.mxu0 }
 0x69d   :  { %v2219_v25 = vadd.f32 %v2218_v23, %v2199_v22 }
 0x6a4   :  { %v2238_v26 = vpop.f32.mrf.mxu1 }
 0x6a5   :  { %v2239_v28 = vadd.f32 %v2238_v26, %v2219_v25 }
 0x6a7   :  { %v2259_v30 = vadd.f32 %v2258_v27, %v2239_v28 }
 0x6a9   :  { %v2262_v31 = vrot.slane %v2259_v30, 4 }
 0x6ab   :  { %v2263_v55 = vadd.f32 %v2262_v31, %v2259_v30 }
 0x6ad   :  { %v2264_v20 = vrot.slane %v2263_v55, 2 }
 0x6af   :  { %v2265_v16 = vadd.f32 %v2264_v20, %v2263_v55 }
 0x6b1   :  { %v2266_v45 = vrot.slane %v2265_v16, 1 }
 0x6b3   :  { %v2267_v48 = vadd.f32 %v2266_v45, %v2265_v16 }
 0x6b5   :  { %v2275_v51 = vmul.f32 %v2274_v17, %v2267_v48 }
 0x6b7   :  { %v2276_v19 = vsub.f32 %v2259_v30, %v2275_v51 }
 0x6b9   :  { %v2277_v61 = vmul.f32 %v2276_v19, %v2276_v19 }
 0x6bb   :  { %v2278_v35 = vrot.slane %v2277_v61, 4 }
 0x6bd   :  { %v2279_v18 = vadd.f32 %v2278_v35, %v2277_v61 }
 0x6bf   :  { %v2280_v40 = vrot.slane %v2279_v18, 2 }
 0x6c1   :  { %v2281_v32 = vadd.f32 %v2280_v40, %v2279_v18 }
 0x6c3   :  { %v2282_v57 = vrot.slane %v2281_v32, 1 }
 0x6c5   :  { %v2283_v59 = vadd.f32 %v2282_v57, %v2281_v32 }
 0x6c7   :  { %v2284_v58 = vmul.f32 %v2283_v59, %v2274_v17 }
 0x6c9   :  { %v2285_v44 = vadd.f32 1e-05, %v2284_v58 }
 0x6cb   :  { %3556 = vrsqrt.f32 %v2285_v44  ;;  %vm2292_vm2 = vweird.f32 %v2285_v44 }
 0x6d1   :  { %v3557_v41 = vpop.eup %3556 }
 0x6d2   :  { %v2287_v56 = vmul.f32 %v3557_v41, %v2285_v44  ;;  %vm2293_vm1 = vweird.f32 %v3557_v41 }
 0x6d3   :  { %vm2294_vm3 = vmor %vm2292_vm2, %vm2293_vm1 }
 0x6d4   :  { %v2288_v43 = vmul.f32 %v3557_v41, %v2287_v56 }
 0x6d6   :  { %v2289_v62 = vmul.f32 0.5, %v2288_v43 }
 0x6d8   :  { %v2290_v33 = vsub.f32 1.5, %v2289_v62 }
 0x6da   :  { %v2291_v42 = vmul.f32 %v3557_v41, %v2290_v33 }
 0x6dc   :  { %v2295_v46 = vsel %vm2294_vm3, %v3557_v41, %v2291_v42 }
 0x6dd   :  { %v2296_v63 = vmul.f32 %v2295_v46, %v2276_v19 }
 0x6df   :  { %v2298_v54 = vmul.f32 %v2297_v34, %v2296_v63 }
 0x6e1   :  { %v2300_v50 = vadd.f32 %v2299_v36, %v2298_v54 }
 0x6e3   :  { %v2301_v47 = vmax.f32 %v2300_v50, 0.0 }
 0x6e4   :  { %3566 = dma.done.wait [#allocation7 + $0x1], 36864 }
 0x6e5   :  { %3567 = vsyncadd [#allocation7 + $0x1], 4294930432  ;;  %2615 = vmatpush.msra.mxu2 %v2301_v47  ;;  %2696 = vmatpush.msrb.mxu3 %v2301_v47  ;;  %vm2596_vm4 = vcmask 64512   ;;  %v2594_v60 = vld [vmem:[%s6672_s6] sm:$0x1]  ;;  %v7060_v9 = vld [vmem:[#allocation85_spill] sm:$0xff] }
 0x6e6   :  { %2642 = vmatpush.msra.mxu0 %v2301_v47  ;;  %2669 = vmatpush.msrb.mxu1 %v2301_v47  ;;  %v3420_v52 = vld [vmem:[%s6672_s6 + $0x3] sm:$0x1]  ;;  %v3416_v37 = vld [vmem:[%s6672_s6 + $0x1] sm:$0x1]  ;;  %v2595_v38 = vunpack.c.l.bf16 %v2594_v60  ;;  %v3418_v12 = vld [vmem:[%s6672_s6 + $0x2] sm:$0x1] }
 0x6e7   :  { %2777 = vmatpush.msrb.mxu2 %v2301_v47  ;;  %2804 = vmatpush.msra.mxu3 %v2301_v47  ;;  %v2677_v15 = vunpack.c.l.bf16 %v3420_v52  ;;  %v2623_v14 = vunpack.c.l.bf16 %v3416_v37  ;;  %v2650_v10 = vunpack.c.l.bf16 %v3418_v12  ;;  %v3426_v8 = vld [vmem:[%s6672_s6 + $0x6] sm:$0x1]  ;;  %v3428_v5 = vld [vmem:[%s6672_s6 + $0x7] sm:$0x1]  ;;  %v3422_v3 = vld [vmem:[%s6672_s6 + $0x4] sm:$0x1] }
 0x6e8   :  { %2723 = vmatpush.msrb.mxu0 %v2301_v47  ;;  %2750 = vmatpush.msra.mxu1 %v2301_v47  ;;  %v3424_v2 = vld [vmem:[%s6672_s6 + $0x5] sm:$0x1]  ;;  %v7057_v4 = vld [vmem:[#allocation87_spill] sm:$0xff]  ;;  %v2758_v0 = vunpack.c.l.bf16 %v3426_v8  ;;  %v2785_v7 = vunpack.c.l.bf16 %v3428_v5  ;;  %v2704_v11 = vunpack.c.l.bf16 %v3422_v3  ;;  %v7061_v21 = vld [vmem:[#allocation117_spill] sm:$0xff]  ;;  %vm3226_vm5 = vcmask 1041408  }
 0x6e9   :  { %3415 = vmatmul.msk.f32.vlgmr.msra.gmra.mxu2 %vm2596_vm4, %v2595_v38  ;;  %3421 = vmatmul.msk.f32.vlgmr.msrb.gmra.mxu3 %vm2596_vm4, %v2677_v15  ;;  %v7058_v1 = vld [vmem:[#allocation119_spill] sm:$0xff]  ;;  %v2731_v13 = vunpack.c.l.bf16 %v3424_v2  ;;  %v7062_v22 = vld [vmem:[#allocation149_spill] sm:$0xff]  ;;  %v3430_v26 = vld [vmem:[%s6672_s6 + $0x8] sm:$0x1] }
 0x6ea   :  { %3417 = vmatmul.msk.f32.vlgmr.msra.gmra.mxu0 %vm2596_vm4, %v2623_v14  ;;  %3419 = vmatmul.msk.f32.vlgmr.msrb.gmra.mxu1 %vm2596_vm4, %v2650_v10  ;;  %v7059_v6 = vld [vmem:[#allocation151_spill] sm:$0xff]  ;;  %v7067_v28 = vld [vmem:[#allocation81_spill] sm:$0xff]  ;;  %v2812_v55 = vunpack.c.l.bf16 %v3430_v26 }
 0x6eb   :  { %2831 = vmatpush.msra.mxu0 %v2301_v47  ;;  %2865 = vmatpush.msrb.mxu1 %v7057_v4  ;;  %v7063_v23 = vld [vmem:[#allocation83_spill] sm:$0xff]  ;;  %v7068_v29 = vld [vmem:[#allocation113_spill] sm:$0xff] }
 0x6ec   :  { %2885 = vmatpush.msra.mxu2 %v7058_v1  ;;  %2905 = vmatpush.msrb.mxu3 %v7059_v6  ;;  %v7064_v24 = vld [vmem:[#allocation115_spill] sm:$0xff]  ;;  %v7069_v30 = vld [vmem:[#allocation145_spill] sm:$0xff] }
 0x6ed   :  { %2866 = vmatpush.msrb.mxu1 %v7060_v9  ;;  %v7065_v25 = vld [vmem:[#allocation147_spill] sm:$0xff]  ;;  %v7070_v31 = vld [vmem:[#allocation181_spill] sm:$0xff] }
 0x6ee   :  { %2886 = vmatpush.msra.mxu2 %v7061_v21  ;;  %2906 = vmatpush.msrb.mxu3 %v7062_v22  ;;  %v7066_v27 = vld [vmem:[#allocation183_spill] sm:$0xff]  ;;  %v7075_v45 = vld [vmem:[#allocation77_spill] sm:$0xff] }
 0x6ef   :  { %2867 = vmatpush.msrb.mxu1 %v7063_v23  ;;  %v7071_v49 = vld [vmem:[#allocation79_spill] sm:$0xff]  ;;  %v7076_v17 = vld [vmem:[#allocation109_spill] sm:$0xff] }
 0x6f0   :  { %2887 = vmatpush.msra.mxu2 %v7064_v24  ;;  %2907 = vmatpush.msrb.mxu3 %v7065_v25  ;;  %v7072_v20 = vld [vmem:[#allocation111_spill] sm:$0xff]  ;;  %v7077_v48 = vld [vmem:[#allocation141_spill] sm:$0xff] }
 0x6f1   :  { %3427 = vmatmul.msk.f32.vlgmr.msrb.gmra.mxu2 %vm2596_vm4, %v2758_v0  ;;  %3429 = vmatmul.msk.f32.vlgmr.msra.gmra.mxu3 %vm2596_vm4, %v2785_v7  ;;  %v7073_v53 = vld [vmem:[#allocation143_spill] sm:$0xff]  ;;  %v7078_v51 = vld [vmem:[#allocation177_spill] sm:$0xff] }
 0x6f2   :  { %3423 = vmatmul.msk.f32.vlgmr.msrb.gmra.mxu0 %vm2596_vm4, %v2704_v11  ;;  %3425 = vmatmul.msk.f32.vlgmr.msra.gmra.mxu1 %vm2596_vm4, %v2731_v13  ;;  %v7074_v16 = vld [vmem:[#allocation179_spill] sm:$0xff]  ;;  %v7083_v40 = vld [vmem:[#allocation73_spill] sm:$0xff] }
 0x6f3   :  { %2925 = vmatpush.msrb.mxu0 %v7066_v27  ;;  %2868 = vmatpush.msrb.mxu1 %v7067_v28  ;;  %v7079_v19 = vld [vmem:[#allocation75_spill] sm:$0xff]  ;;  %v7084_v32 = vld [vmem:[#allocation105_spill] sm:$0xff] }
 0x6f4   :  { %2888 = vmatpush.msra.mxu2 %v7068_v29  ;;  %2908 = vmatpush.msrb.mxu3 %v7069_v30  ;;  %v7080_v61 = vld [vmem:[#allocation107_spill] sm:$0xff]  ;;  %v7085_v57 = vld [vmem:[#allocation173_spill] sm:$0xff] }
 0x6f5   :  { %2926 = vmatpush.msrb.mxu0 %v7070_v31  ;;  %2869 = vmatpush.msrb.mxu1 %v7071_v49  ;;  %v7081_v35 = vld [vmem:[#allocation175_spill] sm:$0xff]  ;;  %v7086_v59 = vld [vmem:[#allocation137_spill] sm:$0xff] }
 0x6f6   :  { %2889 = vmatpush.msra.mxu2 %v7072_v20  ;;  %2909 = vmatpush.msrb.mxu3 %v7073_v53  ;;  %v7082_v18 = vld [vmem:[#allocation139_spill] sm:$0xff]  ;;  %v7091_v43 = vld [vmem:[#allocation69_spill] sm:$0xff] }
 0x6f7   :  { %2927 = vmatpush.msrb.mxu0 %v7074_v16  ;;  %2870 = vmatpush.msrb.mxu1 %v7075_v45  ;;  %v7087_v58 = vld [vmem:[#allocation71_spill] sm:$0xff]  ;;  %v7092_v62 = vld [vmem:[#allocation101_spill] sm:$0xff] }
 0x6f8   :  { %2890 = vmatpush.msra.mxu2 %v7076_v17  ;;  %2910 = vmatpush.msrb.mxu3 %v7077_v48  ;;  %v7088_v44 = vld [vmem:[#allocation103_spill] sm:$0xff]  ;;  %v7093_v39 = vld [vmem:[#allocation169_spill] sm:$0xff] }
 0x6f9   :  { %2928 = vmatpush.msrb.mxu0 %v7078_v51  ;;  %2871 = vmatpush.msrb.mxu1 %v7079_v19  ;;  %v7089_v41 = vld [vmem:[#allocation171_spill] sm:$0xff]  ;;  %v7094_v33 = vld [vmem:[#allocation133_spill] sm:$0xff] }
 0x6fa   :  { %3431 = vmatmul.msk.f32.vlgmr.msra.gmra.mxu0 %vm2596_vm4, %v2812_v55  ;;  %2891 = vmatpush.msra.mxu2 %v7080_v61  ;;  %v7090_v56 = vld [vmem:[#allocation135_spill] sm:$0xff]  ;;  %v7099_v36 = vld [vmem:[#allocation65_spill] sm:$0xff] }
 0x6fb   :  { %2929 = vmatpush.msrb.mxu0 %v7081_v35  ;;  %2911 = vmatpush.msrb.mxu3 %v7082_v18  ;;  %v7095_v42 = vld [vmem:[#allocation67_spill] sm:$0xff]  ;;  %v7100_v54 = vld [vmem:[#allocation97_spill] sm:$0xff] }
 0x6fc   :  { %2872 = vmatpush.msrb.mxu1 %v7083_v40  ;;  %2892 = vmatpush.msra.mxu2 %v7084_v32  ;;  %v7096_v34 = vld [vmem:[#allocation99_spill] sm:$0xff]  ;;  %v7101_v50 = vld [vmem:[#allocation165_spill] sm:$0xff] }
 0x6fd   :  { %2930 = vmatpush.msrb.mxu0 %v7085_v57  ;;  %2912 = vmatpush.msrb.mxu3 %v7086_v59  ;;  %v7097_v46 = vld [vmem:[#allocation167_spill] sm:$0xff]  ;;  %v7102_v47 = vld [vmem:[#allocation129_spill] sm:$0xff] }
 0x6fe   :  { %2873 = vmatpush.msrb.mxu1 %v7087_v58  ;;  %2893 = vmatpush.msra.mxu2 %v7088_v44  ;;  %v7098_v63 = vld [vmem:[#allocation131_spill] sm:$0xff]  ;;  %v7107_v15 = vld [vmem:[#allocation61_spill] sm:$0xff] }
 0x6ff   :  { %2931 = vmatpush.msrb.mxu0 %v7089_v41  ;;  %2913 = vmatpush.msrb.mxu3 %v7090_v56  ;;  %v7103_v60 = vld [vmem:[#allocation63_spill] sm:$0xff]  ;;  %v7108_v14 = vld [vmem:[#allocation93_spill] sm:$0xff] }
 0x700   :  { %2874 = vmatpush.msrb.mxu1 %v7091_v43  ;;  %2894 = vmatpush.msra.mxu2 %v7092_v62  ;;  %v7104_v52 = vld [vmem:[#allocation95_spill] sm:$0xff]  ;;  %v7109_v12 = vld [vmem:[#allocation161_spill] sm:$0xff] }
 0x701   :  { %2932 = vmatpush.msrb.mxu0 %v7093_v39  ;;  %2914 = vmatpush.msrb.mxu3 %v7094_v33  ;;  %v7105_v37 = vld [vmem:[#allocation163_spill] sm:$0xff]  ;;  %v7110_v10 = vld [vmem:[#allocation125_spill] sm:$0xff] }
 0x702   :  { %2875 = vmatpush.msrb.mxu1 %v7095_v42  ;;  %2895 = vmatpush.msra.mxu2 %v7096_v34  ;;  %v7106_v38 = vld [vmem:[#allocation127_spill] sm:$0xff]  ;;  %v7115_v4 = vld [vmem:[#allocation57_spill] sm:$0xff] }
 0x703   :  { %2933 = vmatpush.msrb.mxu0 %v7097_v46  ;;  %2915 = vmatpush.msrb.mxu3 %v7098_v63  ;;  %v7111_v8 = vld [vmem:[#allocation59_spill] sm:$0xff]  ;;  %v7116_v1 = vld [vmem:[#allocation89_spill] sm:$0xff] }
 0x704   :  { %2876 = vmatpush.msrb.mxu1 %v7099_v36  ;;  %2896 = vmatpush.msra.mxu2 %v7100_v54  ;;  %v7112_v5 = vld [vmem:[#allocation91_spill] sm:$0xff]  ;;  %v7117_v6 = vld [vmem:[#allocation157_spill] sm:$0xff] }
 0x705   :  { %2934 = vmatpush.msrb.mxu0 %v7101_v50  ;;  %2916 = vmatpush.msrb.mxu3 %v7102_v47  ;;  %v7113_v3 = vld [vmem:[#allocation159_spill] sm:$0xff]  ;;  %v7118_v0 = vld [vmem:[#allocation121_spill] sm:$0xff] }
 0x706   :  { %2877 = vmatpush.msrb.mxu1 %v7103_v60  ;;  %2897 = vmatpush.msra.mxu2 %v7104_v52  ;;  %v7114_v2 = vld [vmem:[#allocation123_spill] sm:$0xff]  ;;  %v7123_v21 = vld [vmem:[#allocation213_spill] sm:$0xff] }
 0x707   :  { %2935 = vmatpush.msrb.mxu0 %v7105_v37  ;;  %2917 = vmatpush.msrb.mxu3 %v7106_v38  ;;  %v7119_v7 = vld [vmem:[#allocation215_spill] sm:$0xff]  ;;  %v7124_v22 = vld [vmem:[#allocation245_spill] sm:$0xff] }
 0x708   :  { %2878 = vmatpush.msrb.mxu1 %v7107_v15  ;;  %2898 = vmatpush.msra.mxu2 %v7108_v14  ;;  %v7120_v9 = vld [vmem:[#allocation247_spill] sm:$0xff]  ;;  %v7125_v23 = vld [vmem:[#allocation153_spill] sm:$0xff] }
 0x709   :  { %2936 = vmatpush.msrb.mxu0 %v7109_v12  ;;  %2918 = vmatpush.msrb.mxu3 %v7110_v10  ;;  %v7121_v11 = vld [vmem:[#allocation155_spill] sm:$0xff]  ;;  %v7126_v24 = vld [vmem:[#allocation277_spill] sm:$0xff] }
 0x70a   :  { %2879 = vmatpush.msrb.mxu1 %v7111_v8  ;;  %2899 = vmatpush.msra.mxu2 %v7112_v5  ;;  %v7122_v13 = vld [vmem:[#allocation279_spill] sm:$0xff]  ;;  %v7131_v29 = vld [vmem:[#allocation309_spill] sm:$0xff] }
 0x70b   :  { %2937 = vmatpush.msrb.mxu0 %v7113_v3  ;;  %2919 = vmatpush.msrb.mxu3 %v7114_v2  ;;  %v7127_v25 = vld [vmem:[#allocation311_spill] sm:$0xff]  ;;  %v7132_v30 = vld [vmem:[#allocation209_spill] sm:$0xff] }
 0x70c   :  { %2880 = vmatpush.msrb.mxu1 %v7115_v4  ;;  %2900 = vmatpush.msra.mxu2 %v7116_v1  ;;  %v7128_v26 = vld [vmem:[#allocation211_spill] sm:$0xff]  ;;  %v7133_v31 = vld [vmem:[#allocation241_spill] sm:$0xff] }
 0x70d   :  { %2938 = vmatpush.msrb.mxu0 %v7117_v6  ;;  %2920 = vmatpush.msrb.mxu3 %v7118_v0  ;;  %v7129_v27 = vld [vmem:[#allocation243_spill] sm:$0xff]  ;;  %v7134_v49 = vld [vmem:[#allocation273_spill] sm:$0xff] }
 0x70e   :  { %2945 = vmatpush.msra.mxu1 %v7119_v7  ;;  %2965 = vmatpush.msrb.mxu2 %v7120_v9  ;;  %v7130_v28 = vld [vmem:[#allocation275_spill] sm:$0xff]  ;;  %v7139_v45 = vld [vmem:[#allocation305_spill] sm:$0xff] }
 0x70f   :  { %2939 = vmatpush.msrb.mxu0 %v7121_v11  ;;  %2985 = vmatpush.msra.mxu3 %v7122_v13  ;;  %v7135_v55 = vld [vmem:[#allocation307_spill] sm:$0xff]  ;;  %v7140_v17 = vld [vmem:[#allocation205_spill] sm:$0xff] }
 0x710   :  { %2946 = vmatpush.msra.mxu1 %v7123_v21  ;;  %2966 = vmatpush.msrb.mxu2 %v7124_v22  ;;  %v7136_v20 = vld [vmem:[#allocation207_spill] sm:$0xff]  ;;  %v7141_v48 = vld [vmem:[#allocation237_spill] sm:$0xff] }
 0x711   :  { %2940 = vmatpush.msrb.mxu0 %v7125_v23  ;;  %2986 = vmatpush.msra.mxu3 %v7126_v24  ;;  %v7137_v53 = vld [vmem:[#allocation239_spill] sm:$0xff]  ;;  %v7142_v51 = vld [vmem:[#allocation269_spill] sm:$0xff] }
 0x712   :  { %2947 = vmatpush.msra.mxu1 %v7128_v26  ;;  %2967 = vmatpush.msrb.mxu2 %v7129_v27  ;;  %v7138_v16 = vld [vmem:[#allocation271_spill] sm:$0xff]  ;;  %v7147_v40 = vld [vmem:[#allocation301_spill] sm:$0xff] }
 0x713   :  { %3005 = vmatpush.msra.mxu0 %v7127_v25  ;;  %2987 = vmatpush.msra.mxu3 %v7130_v28  ;;  %v7143_v19 = vld [vmem:[#allocation303_spill] sm:$0xff]  ;;  %v7148_v32 = vld [vmem:[#allocation201_spill] sm:$0xff] }
 0x714   :  { %2948 = vmatpush.msra.mxu1 %v7132_v30  ;;  %2968 = vmatpush.msrb.mxu2 %v7133_v31  ;;  %v7144_v61 = vld [vmem:[#allocation203_spill] sm:$0xff]  ;;  %v7149_v57 = vld [vmem:[#allocation233_spill] sm:$0xff] }
 0x715   :  { %3006 = vmatpush.msra.mxu0 %v7131_v29  ;;  %2988 = vmatpush.msra.mxu3 %v7134_v49  ;;  %v7145_v35 = vld [vmem:[#allocation235_spill] sm:$0xff]  ;;  %v7150_v59 = vld [vmem:[#allocation265_spill] sm:$0xff] }
 0x716   :  { %2949 = vmatpush.msra.mxu1 %v7136_v20  ;;  %2969 = vmatpush.msrb.mxu2 %v7137_v53  ;;  %v7146_v18 = vld [vmem:[#allocation267_spill] sm:$0xff]  ;;  %v7155_v43 = vld [vmem:[#allocation297_spill] sm:$0xff]  ;;  %v7186_v53 = vld [vmem:[#allocation88_spill] sm:$0xff] }
 0x717   :  { %3007 = vmatpush.msra.mxu0 %v7135_v55  ;;  %2989 = vmatpush.msra.mxu3 %v7138_v16  ;;  %v7151_v58 = vld [vmem:[#allocation299_spill] sm:$0xff]  ;;  %v7156_v62 = vld [vmem:[#allocation197_spill] sm:$0xff] }
 0x718   :  { %2950 = vmatpush.msra.mxu1 %v7140_v17  ;;  %2970 = vmatpush.msrb.mxu2 %v7141_v48  ;;  %v7152_v44 = vld [vmem:[#allocation199_spill] sm:$0xff]  ;;  %v7157_v39 = vld [vmem:[#allocation229_spill] sm:$0xff]  ;;  %v7188_v17 = vld [vmem:[#allocation152_spill] sm:$0xff] }
 0x719   :  { %3008 = vmatpush.msra.mxu0 %v7139_v45  ;;  %2990 = vmatpush.msra.mxu3 %v7142_v51  ;;  %v7153_v41 = vld [vmem:[#allocation231_spill] sm:$0xff]  ;;  %v7158_v33 = vld [vmem:[#allocation261_spill] sm:$0xff]  ;;  %v7187_v45 = vld [vmem:[#allocation120_spill] sm:$0xff] }
 0x71a   :  { %2951 = vmatpush.msra.mxu1 %v7144_v61  ;;  %2971 = vmatpush.msrb.mxu2 %v7145_v35  ;;  %v7154_v56 = vld [vmem:[#allocation263_spill] sm:$0xff]  ;;  %v7163_v36 = vld [vmem:[#allocation293_spill] sm:$0xff]  ;;  %v7190_v51 = vld [vmem:[#allocation86_spill] sm:$0xff] }
 0x71b   :  { %3009 = vmatpush.msra.mxu0 %v7143_v19  ;;  %2991 = vmatpush.msra.mxu3 %v7146_v18  ;;  %v7159_v42 = vld [vmem:[#allocation295_spill] sm:$0xff]  ;;  %v7164_v54 = vld [vmem:[#allocation193_spill] sm:$0xff]  ;;  %v7191_v19 = vld [vmem:[#allocation118_spill] sm:$0xff] }
 0x71c   :  { %2952 = vmatpush.msra.mxu1 %v7148_v32  ;;  %2972 = vmatpush.msrb.mxu2 %v7149_v57  ;;  %v7160_v34 = vld [vmem:[#allocation195_spill] sm:$0xff]  ;;  %v7165_v50 = vld [vmem:[#allocation225_spill] sm:$0xff]  ;;  %v7192_v61 = vld [vmem:[#allocation150_spill] sm:$0xff] }
 0x71d   :  { %3010 = vmatpush.msra.mxu0 %v7147_v40  ;;  %2992 = vmatpush.msra.mxu3 %v7150_v59  ;;  %v7161_v46 = vld [vmem:[#allocation227_spill] sm:$0xff]  ;;  %v7166_v47 = vld [vmem:[#allocation257_spill] sm:$0xff]  ;;  %v7194_v18 = vld [vmem:[#allocation84_spill] sm:$0xff] }
 0x71e   :  { %2953 = vmatpush.msra.mxu1 %v7152_v44  ;;  %2973 = vmatpush.msrb.mxu2 %v7153_v41  ;;  %v7162_v63 = vld [vmem:[#allocation259_spill] sm:$0xff]  ;;  %v7171_v15 = vld [vmem:[#allocation289_spill] sm:$0xff]  ;;  %v7195_v40 = vld [vmem:[#allocation116_spill] sm:$0xff] }
 0x71f   :  { %3011 = vmatpush.msra.mxu0 %v7151_v58  ;;  %2993 = vmatpush.msra.mxu3 %v7154_v56  ;;  %v7167_v60 = vld [vmem:[#allocation291_spill] sm:$0xff]  ;;  %v7172_v14 = vld [vmem:[#allocation189_spill] sm:$0xff]  ;;  %v7196_v32 = vld [vmem:[#allocation148_spill] sm:$0xff] }
 0x720   :  { %2954 = vmatpush.msra.mxu1 %v7156_v62  ;;  %2974 = vmatpush.msrb.mxu2 %v7157_v39  ;;  %v7168_v52 = vld [vmem:[#allocation191_spill] sm:$0xff]  ;;  %v7173_v12 = vld [vmem:[#allocation221_spill] sm:$0xff]  ;;  %v7198_v59 = vld [vmem:[#allocation82_spill] sm:$0xff] }
 0x721   :  { %3012 = vmatpush.msra.mxu0 %v7155_v43  ;;  %2994 = vmatpush.msra.mxu3 %v7158_v33  ;;  %v7169_v37 = vld [vmem:[#allocation223_spill] sm:$0xff]  ;;  %v7174_v10 = vld [vmem:[#allocation253_spill] sm:$0xff]  ;;  %v7199_v44 = vld [vmem:[#allocation114_spill] sm:$0xff] }
 0x722   :  { %2955 = vmatpush.msra.mxu1 %v7160_v34  ;;  %2975 = vmatpush.msrb.mxu2 %v7161_v46  ;;  %v7170_v38 = vld [vmem:[#allocation255_spill] sm:$0xff]  ;;  %v7179_v4 = vld [vmem:[#allocation285_spill] sm:$0xff]  ;;  %v7200_v41 = vld [vmem:[#allocation146_spill] sm:$0xff] }
 0x723   :  { %3013 = vmatpush.msra.mxu0 %v7159_v42  ;;  %2995 = vmatpush.msra.mxu3 %v7162_v63  ;;  %v7175_v8 = vld [vmem:[#allocation287_spill] sm:$0xff]  ;;  %v7180_v1 = vld [vmem:[#allocation185_spill] sm:$0xff]  ;;  %v7202_v62 = vld [vmem:[#allocation80_spill] sm:$0xff] }
 0x724   :  { %2956 = vmatpush.msra.mxu1 %v7164_v54  ;;  %2976 = vmatpush.msrb.mxu2 %v7165_v50  ;;  %v7176_v5 = vld [vmem:[#allocation187_spill] sm:$0xff]  ;;  %v7181_v6 = vld [vmem:[#allocation217_spill] sm:$0xff]  ;;  %v7203_v39 = vld [vmem:[#allocation112_spill] sm:$0xff] }
 0x725   :  { %3014 = vmatpush.msra.mxu0 %v7163_v36  ;;  %2996 = vmatpush.msra.mxu3 %v7166_v47  ;;  %v7177_v3 = vld [vmem:[#allocation219_spill] sm:$0xff]  ;;  %v7182_v0 = vld [vmem:[#allocation249_spill] sm:$0xff]  ;;  %v7204_v33 = vld [vmem:[#allocation144_spill] sm:$0xff] }
 0x726   :  { %2957 = vmatpush.msra.mxu1 %v7168_v52  ;;  %2977 = vmatpush.msrb.mxu2 %v7169_v37  ;;  %v7178_v2 = vld [vmem:[#allocation251_spill] sm:$0xff]  ;;  %v7184_v9 = vld [vmem:[#allocation281_spill] sm:$0xff]  ;;  %v7206_v46 = vld [vmem:[#allocation78_spill] sm:$0xff] }
 0x727   :  { %3015 = vmatpush.msra.mxu0 %v7167_v60  ;;  %2997 = vmatpush.msra.mxu3 %v7170_v38  ;;  %v7183_v7 = vld [vmem:[#allocation283_spill] sm:$0xff]  ;;  %v7189_v48 = vld [vmem:[#allocation341_spill] sm:$0xff]  ;;  %v7207_v63 = vld [vmem:[#allocation110_spill] sm:$0xff] }
 0x728   :  { %2958 = vmatpush.msra.mxu1 %v7172_v14  ;;  %2978 = vmatpush.msrb.mxu2 %v7173_v12  ;;  %v7185_v20 = vld [vmem:[#allocation343_spill] sm:$0xff]  ;;  %v7197_v57 = vld [vmem:[#allocation337_spill] sm:$0xff]  ;;  %v7208_v36 = vld [vmem:[#allocation142_spill] sm:$0xff] }
 0x729   :  { %3016 = vmatpush.msra.mxu0 %v7171_v15  ;;  %2998 = vmatpush.msra.mxu3 %v7174_v10  ;;  %v7193_v35 = vld [vmem:[#allocation339_spill] sm:$0xff]  ;;  %v7205_v34 = vld [vmem:[#allocation333_spill] sm:$0xff]  ;;  %v7209_v54 = vld [vmem:[#allocation76_spill] sm:$0xff] }
 0x72a   :  { %2959 = vmatpush.msra.mxu1 %v7176_v5  ;;  %2979 = vmatpush.msrb.mxu2 %v7177_v3  ;;  %v7201_v43 = vld [vmem:[#allocation335_spill] sm:$0xff]  ;;  %v7211_v47 = vld [vmem:[#allocation108_spill] sm:$0xff]  ;;  %v7213_v52 = vld [vmem:[#allocation74_spill] sm:$0xff] }
 0x72b   :  { %3017 = vmatpush.msra.mxu0 %v7175_v8  ;;  %2999 = vmatpush.msra.mxu3 %v7178_v2  ;;  %v7210_v50 = vld [vmem:[#allocation331_spill] sm:$0xff]  ;;  %v7212_v60 = vld [vmem:[#allocation140_spill] sm:$0xff]  ;;  %v7214_v37 = vld [vmem:[#allocation329_spill] sm:$0xff] }
 0x72c   :  { %2960 = vmatpush.msra.mxu1 %v7180_v1  ;;  %2980 = vmatpush.msrb.mxu2 %v7181_v6  ;;  %v7215_v38 = vld [vmem:[#allocation106_spill] sm:$0xff]  ;;  %v7217_v14 = vld [vmem:[#allocation72_spill] sm:$0xff]  ;;  %v7218_v10 = vld [vmem:[#allocation327_spill] sm:$0xff] }
 0x72d   :  { %3018 = vmatpush.msra.mxu0 %v7179_v4  ;;  %3000 = vmatpush.msra.mxu3 %v7182_v0  ;;  %v7216_v15 = vld [vmem:[#allocation138_spill] sm:$0xff]  ;;  %v7219_v8 = vld [vmem:[#allocation104_spill] sm:$0xff]  ;;  %v7222_v2 = vld [vmem:[#allocation325_spill] sm:$0xff] }
 0x72e   :  { %v7220_v5 = vld [vmem:[#allocation136_spill] sm:$0xff]  ;;  %v7221_v3 = vld [vmem:[#allocation70_spill] sm:$0xff]  ;;  %v7225_v6 = vld [vmem:[#allocation323_spill] sm:$0xff] }
 0x72f   :  { %3019 = vmatpush.msra.mxu0 %v7183_v7  ;;  %v7223_v4 = vld [vmem:[#allocation102_spill] sm:$0xff]  ;;  %v7226_v0 = vld [vmem:[#allocation68_spill] sm:$0xff] }
 0x730   :  { %v7224_v1 = vld [vmem:[#allocation134_spill] sm:$0xff]  ;;  %v7227_v7 = vld [vmem:[#allocation100_spill] sm:$0xff] }
 0x731   :  { %3020 = vmatpush.msra.mxu0 %v7184_v9  ;;  %v7228_v9 = vld [vmem:[#allocation132_spill] sm:$0xff] }
 0x767   :  { %v2644_v11 = vpop.f32.mrf.mxu0  ;;  %v2671_v13 = vpop.f32.mrf.mxu1 }
 0x768   :  { %2647 = vst [vmem:[#allocation4 + $0x2] sm:$0x3] %v2644_v11  ;;  %v7229_v11 = vld [vmem:[#allocation321_spill] sm:$0xff] }
 0x769   :  { %2674 = vst [vmem:[#allocation4 + $0x4] sm:$0x3] %v2671_v13  ;;  %v7230_v13 = vld [vmem:[#allocation66_spill] sm:$0xff] }
 0x76c   :  { %v2617_v21 = vpop.f32.mrf.mxu2  ;;  %v2698_v22 = vpop.f32.mrf.mxu3 }
 0x76d   :  { %2620 = vst [vmem:[#allocation4] sm:$0x3] %v2617_v21  ;;  %v7231_v21 = vld [vmem:[#allocation98_spill] sm:$0xff] }
 0x76e   :  { %2701 = vst [vmem:[#allocation4 + $0x6] sm:$0x3] %v2698_v22  ;;  %v7232_v22 = vld [vmem:[#allocation130_spill] sm:$0xff] }
 0x76f   :  { %v2725_v23 = vpop.f32.mrf.mxu0  ;;  %v2752_v24 = vpop.f32.mrf.mxu1 }
 0x770   :  { %2728 = vst [vmem:[#allocation4 + $0x8] sm:$0x3] %v2725_v23  ;;  %v7233_v23 = vld [vmem:[#allocation319_spill] sm:$0xff] }
 0x771   :  { %2755 = vst [vmem:[#allocation4 + $0xa] sm:$0x3] %v2752_v24  ;;  %v7234_v24 = vld [vmem:[#allocation64_spill] sm:$0xff] }
 0x774   :  { %v2779_v25 = vpop.f32.mrf.mxu2  ;;  %v2806_v26 = vpop.f32.mrf.mxu3 }
 0x775   :  { %v2837_v27 = vld [vmem:[#allocation4] sm:$0xff]  ;;  %2782 = vst [vmem:[#allocation4 + $0xc] sm:$0x3] %v2779_v25  ;;  %v7235_v25 = vld [vmem:[#allocation96_spill] sm:$0xff] }
 0x776   :  { %2843 = vst [vmem:[#allocation1] ss:$4 sm:$0xff] %v2837_v27  ;;  %v7237_v27 = vld [vmem:[#allocation317_spill] sm:$0xff] }
 0x777   :  { %2809 = vst [vmem:[#allocation4 + $0xe] sm:$0x3] %v2806_v26  ;;  %v2833_v28 = vpop.f32.mrf.mxu0  ;;  %v7236_v26 = vld [vmem:[#allocation128_spill] sm:$0xff] }
 0x778   :  { %2836 = vst [vmem:[#allocation4 + $0x10] sm:$0x3] %v2833_v28  ;;  %v7238_v28 = vld [vmem:[#allocation62_spill] sm:$0xff] }
 0x77d   :  { %v6454_v29 = vld.sshfl [vmem:[#allocation1] sm:$0xff pattern:$0x73625140]  ;;  %v6456_v30 = vld.sshfl [vmem:[#allocation1 + $0x8] sm:$0xff pattern:$0x73625140] }
 0x77e   :  { %v2838_v31 = vld [vmem:[#allocation4 + $0x8] sm:$0xff]  ;;  %2881 = vmatmul.f32.vlgmr.msrb.gmra.mxu1 %v6454_v29  ;;  %2901 = vmatmul.f32.vlgmr.msra.gmra.mxu2 %v6456_v30  ;;  %v6460_v49 = vld.sshfl [vmem:[#allocation1 + $0x10] sm:$0xff pattern:$0x73625140] }
 0x77f   :  { %2845 = vst [vmem:[#allocation1 + $0x20] ss:$4 sm:$0xff] %v2838_v31  ;;  %2921 = vmatmul.f32.vlgmr.msrb.gmra.mxu3 %v6460_v49  ;;  %v6463_v55 = vld.sshfl [vmem:[#allocation1 + $0x18] sm:$0xff pattern:$0x73625140]  ;;  %3025 = vmatpush.msrb.mxu1 %v7185_v20 }
 0x780   :  { %2941 = vmatmul.f32.vlgmr.msrb.gmra.mxu0 %v6463_v55  ;;  %3045 = vmatpush.msra.mxu2 %v7186_v53  ;;  %v2839_v16 = vld [vmem:[#allocation4 + $0x10] sm:$0x3]  ;;  %v7239_v31 = vld [vmem:[#allocation94_spill] sm:$0xff] }
 0x781   :  { %3065 = vmatpush.msrb.mxu3 %v7187_v45  ;;  %3085 = vmatpush.msrb.mxu0 %v7188_v17  ;;  %2854 = vst [vmem:[#allocation1] ss:$4 sm:$0xff] %v2839_v16  ;;  %v7240_v20 = vld [vmem:[#allocation126_spill] sm:$0xff]  ;;  %v7241_v53 = vld [vmem:[#allocation315_spill] sm:$0xff]  ;;  %v7242_v16 = vld [vmem:[#allocation60_spill] sm:$0xff] }
 0x782   :  { %3026 = vmatpush.msrb.mxu1 %v7189_v48  ;;  %3046 = vmatpush.msra.mxu2 %v7190_v51  ;;  %v7243_v45 = vld [vmem:[#allocation92_spill] sm:$0xff]  ;;  %v7245_v51 = vld [vmem:[#allocation313_spill] sm:$0xff] }
 0x783   :  { %3066 = vmatpush.msrb.mxu3 %v7191_v19  ;;  %3086 = vmatpush.msrb.mxu0 %v7192_v61  ;;  %v7244_v17 = vld [vmem:[#allocation124_spill] sm:$0xff]  ;;  %v7246_v19 = vld [vmem:[#allocation58_spill] sm:$0xff] }
 0x784   :  { %3027 = vmatpush.msrb.mxu1 %v7193_v35  ;;  %3047 = vmatpush.msra.mxu2 %v7194_v18  ;;  %v7247_v61 = vld [vmem:[#allocation90_spill] sm:$0xff]  ;;  %v7249_v18 = vld [vmem:[#allocation184_spill] sm:$0xff] }
 0x785   :  { %3067 = vmatpush.msrb.mxu3 %v7195_v40  ;;  %3087 = vmatpush.msrb.mxu0 %v7196_v32  ;;  %v7248_v35 = vld [vmem:[#allocation122_spill] sm:$0xff]  ;;  %v7250_v40 = vld [vmem:[#allocation216_spill] sm:$0xff] }
 0x786   :  { %3028 = vmatpush.msrb.mxu1 %v7197_v57  ;;  %3048 = vmatpush.msra.mxu2 %v7198_v59  ;;  %v6480_v58 = vld.sshfl [vmem:[#allocation1 + $0x28] sm:$0xff pattern:$0x73625140]  ;;  %v6484_v56 = vld.sshfl [vmem:[#allocation1 + $0x30] sm:$0xff pattern:$0x73625140] }
 0x787   :  { %3068 = vmatpush.msrb.mxu3 %v7199_v44  ;;  %3088 = vmatpush.msrb.mxu0 %v7200_v41  ;;  %v6492_v42 = vld.sshfl [vmem:[#allocation1 + $0x20] sm:$0xff pattern:$0x73625140]  ;;  %v6508_v12 = vld.sshfl [vmem:[#allocation1 + $0x38] sm:$0xff pattern:$0x73625140] }
 0x788   :  { %2981 = vmatmul.f32.vlgmr.msrb.gmra.mxu2 %v6480_v58  ;;  %3029 = vmatpush.msrb.mxu1 %v7201_v43  ;;  %v6538_v48 = vld.sshfl [vmem:[#allocation1] sm:$0xff pattern:$0x73625140]  ;;  %v7253_v59 = vld [vmem:[#allocation182_spill] sm:$0xff] }
 0x789   :  { %3049 = vmatpush.msra.mxu2 %v7202_v62  ;;  %3069 = vmatpush.msrb.mxu3 %v7203_v39  ;;  %v7251_v32 = vld [vmem:[#allocation248_spill] sm:$0xff]  ;;  %v7254_v44 = vld [vmem:[#allocation214_spill] sm:$0xff] }
 0x78a   :  { %3089 = vmatpush.msrb.mxu0 %v7204_v33  ;;  %3001 = vmatmul.f32.vlgmr.msra.gmra.mxu3 %v6484_v56  ;;  %v7252_v57 = vld [vmem:[#allocation280_spill] sm:$0xff]  ;;  %v7255_v41 = vld [vmem:[#allocation246_spill] sm:$0xff] }
 0x78b   :  { %3030 = vmatpush.msrb.mxu1 %v7205_v34  ;;  %3050 = vmatpush.msra.mxu2 %v7206_v46  ;;  %v7256_v43 = vld [vmem:[#allocation278_spill] sm:$0xff]  ;;  %v7260_v62 = vld [vmem:[#allocation276_spill] sm:$0xff] }
 0x78c   :  { %3070 = vmatpush.msrb.mxu3 %v7207_v63  ;;  %3090 = vmatpush.msrb.mxu0 %v7208_v36  ;;  %v7261_v39 = vld [vmem:[#allocation178_spill] sm:$0xff]  ;;  %v7265_v63 = vld [vmem:[#allocation176_spill] sm:$0xff] }
 0x78d   :  { %2961 = vmatmul.f32.vlgmr.msra.gmra.mxu1 %v6492_v42  ;;  %3051 = vmatpush.msra.mxu2 %v7209_v54  ;;  %v7262_v33 = vld [vmem:[#allocation210_spill] sm:$0xff]  ;;  %v7266_v36 = vld [vmem:[#allocation208_spill] sm:$0xff] }
 0x78e   :  { %3031 = vmatpush.msrb.mxu1 %v7210_v50  ;;  %3071 = vmatpush.msrb.mxu3 %v7211_v47  ;;  %v7263_v34 = vld [vmem:[#allocation242_spill] sm:$0xff]  ;;  %v7267_v54 = vld [vmem:[#allocation240_spill] sm:$0xff] }
 0x78f   :  { %3091 = vmatpush.msrb.mxu0 %v7212_v60  ;;  %3052 = vmatpush.msra.mxu2 %v7213_v52  ;;  %v7264_v46 = vld [vmem:[#allocation274_spill] sm:$0xff]  ;;  %v7268_v50 = vld [vmem:[#allocation272_spill] sm:$0xff] }
 0x790   :  { %3032 = vmatpush.msrb.mxu1 %v7214_v37  ;;  %3072 = vmatpush.msrb.mxu3 %v7215_v38  ;;  %v7269_v47 = vld [vmem:[#allocation174_spill] sm:$0xff]  ;;  %v7273_v38 = vld [vmem:[#allocation172_spill] sm:$0xff] }
 0x791   :  { %3092 = vmatpush.msrb.mxu0 %v7216_v15  ;;  %3053 = vmatpush.msra.mxu2 %v7217_v14  ;;  %v7270_v60 = vld [vmem:[#allocation206_spill] sm:$0xff]  ;;  %v7274_v15 = vld [vmem:[#allocation204_spill] sm:$0xff] }
 0x792   :  { %3033 = vmatpush.msrb.mxu1 %v7218_v10  ;;  %3073 = vmatpush.msrb.mxu3 %v7219_v8  ;;  %v7271_v52 = vld [vmem:[#allocation238_spill] sm:$0xff]  ;;  %v7275_v14 = vld [vmem:[#allocation236_spill] sm:$0xff] }
 0x793   :  { %3093 = vmatpush.msrb.mxu0 %v7220_v5  ;;  %3054 = vmatpush.msra.mxu2 %v7221_v3  ;;  %v7272_v37 = vld [vmem:[#allocation270_spill] sm:$0xff]  ;;  %v7276_v10 = vld [vmem:[#allocation268_spill] sm:$0xff] }
 0x794   :  { %3021 = vmatmul.f32.vlgmr.msra.gmra.mxu0 %v6508_v12  ;;  %3034 = vmatpush.msrb.mxu1 %v7222_v2  ;;  %v7277_v8 = vld [vmem:[#allocation170_spill] sm:$0xff] }
 0x795   :  { %3074 = vmatpush.msrb.mxu3 %v7223_v4  ;;  %3094 = vmatpush.msrb.mxu0 %v7224_v1  ;;  %v7278_v5 = vld [vmem:[#allocation202_spill] sm:$0xff]  ;;  %v7281_v4 = vld [vmem:[#allocation168_spill] sm:$0xff] }
 0x796   :  { %3035 = vmatpush.msrb.mxu1 %v7225_v6  ;;  %3055 = vmatpush.msra.mxu2 %v7226_v0  ;;  %v7279_v3 = vld [vmem:[#allocation234_spill] sm:$0xff]  ;;  %v7282_v1 = vld [vmem:[#allocation200_spill] sm:$0xff] }
 0x797   :  { %3075 = vmatpush.msrb.mxu3 %v7227_v7  ;;  %3095 = vmatpush.msrb.mxu0 %v7228_v9  ;;  %v7280_v2 = vld [vmem:[#allocation266_spill] sm:$0xff]  ;;  %v7283_v6 = vld [vmem:[#allocation232_spill] sm:$0xff] }
 0x798   :  { %3036 = vmatpush.msrb.mxu1 %v7229_v11  ;;  %3056 = vmatpush.msra.mxu2 %v7230_v13  ;;  %v7284_v0 = vld [vmem:[#allocation264_spill] sm:$0xff]  ;;  %v7285_v7 = vld [vmem:[#allocation166_spill] sm:$0xff] }
 0x799   :  { %3076 = vmatpush.msrb.mxu3 %v7231_v21  ;;  %3096 = vmatpush.msrb.mxu0 %v7232_v22  ;;  %v7286_v9 = vld [vmem:[#allocation198_spill] sm:$0xff]  ;;  %v7289_v21 = vld [vmem:[#allocation164_spill] sm:$0xff] }
 0x79a   :  { %3037 = vmatpush.msrb.mxu1 %v7233_v23  ;;  %3057 = vmatpush.msra.mxu2 %v7234_v24  ;;  %v7287_v11 = vld [vmem:[#allocation230_spill] sm:$0xff]  ;;  %v7290_v22 = vld [vmem:[#allocation196_spill] sm:$0xff] }
 0x79b   :  { %3077 = vmatpush.msrb.mxu3 %v7235_v25  ;;  %3097 = vmatpush.msrb.mxu0 %v7236_v26  ;;  %v7288_v13 = vld [vmem:[#allocation262_spill] sm:$0xff]  ;;  %v7291_v23 = vld [vmem:[#allocation228_spill] sm:$0xff] }
 0x79c   :  { %3038 = vmatpush.msrb.mxu1 %v7237_v27  ;;  %3058 = vmatpush.msra.mxu2 %v7238_v28  ;;  %v7292_v24 = vld [vmem:[#allocation260_spill] sm:$0xff]  ;;  %v7293_v25 = vld [vmem:[#allocation162_spill] sm:$0xff] }
 0x79d   :  { %3078 = vmatpush.msrb.mxu3 %v7239_v31  ;;  %3098 = vmatpush.msrb.mxu0 %v7240_v20  ;;  %v7294_v26 = vld [vmem:[#allocation194_spill] sm:$0xff]  ;;  %v7297_v31 = vld [vmem:[#allocation160_spill] sm:$0xff] }
 0x79e   :  { %3039 = vmatpush.msrb.mxu1 %v7241_v53  ;;  %3059 = vmatpush.msra.mxu2 %v7242_v16  ;;  %v7295_v27 = vld [vmem:[#allocation226_spill] sm:$0xff]  ;;  %v7298_v20 = vld [vmem:[#allocation192_spill] sm:$0xff] }
 0x79f   :  { %3079 = vmatpush.msrb.mxu3 %v7243_v45  ;;  %3099 = vmatpush.msrb.mxu0 %v7244_v17  ;;  %v7296_v28 = vld [vmem:[#allocation258_spill] sm:$0xff]  ;;  %v7299_v53 = vld [vmem:[#allocation224_spill] sm:$0xff] }
 0x7a0   :  { %3040 = vmatpush.msrb.mxu1 %v7245_v51  ;;  %3060 = vmatpush.msra.mxu2 %v7246_v19  ;;  %v7300_v16 = vld [vmem:[#allocation256_spill] sm:$0xff]  ;;  %v7301_v45 = vld [vmem:[#allocation158_spill] sm:$0xff] }
 0x7a1   :  { %3080 = vmatpush.msrb.mxu3 %v7247_v61  ;;  %3100 = vmatpush.msrb.mxu0 %v7248_v35  ;;  %v7302_v17 = vld [vmem:[#allocation190_spill] sm:$0xff]  ;;  %v7305_v61 = vld [vmem:[#allocation156_spill] sm:$0xff] }
 0x7a2   :  { %3041 = vmatmul.f32.vlgmr.msrb.gmra.mxu1 %v6538_v48  ;;  %3061 = vmatmul.f32.vlgmr.msra.gmra.mxu2 %v6454_v29  ;;  %v7257_v29 = vld [vmem:[#allocation180_spill] sm:$0xff]  ;;  %v7303_v51 = vld [vmem:[#allocation222_spill] sm:$0xff] }
 0x7a3   :  { %3081 = vmatmul.f32.vlgmr.msrb.gmra.mxu3 %v6456_v30  ;;  %3101 = vmatmul.f32.vlgmr.msrb.gmra.mxu0 %v6460_v49  ;;  %v7258_v30 = vld [vmem:[#allocation212_spill] sm:$0xff]  ;;  %v7304_v19 = vld [vmem:[#allocation254_spill] sm:$0xff] }
 0x7a4   :  { %3105 = vmatpush.msra.mxu1 %v7249_v18  ;;  %3125 = vmatpush.msrb.mxu2 %v7250_v40  ;;  %v7259_v49 = vld [vmem:[#allocation244_spill] sm:$0xff] }
 0x7a5   :  { %3145 = vmatpush.msra.mxu3 %v7251_v32  ;;  %3165 = vmatpush.msra.mxu0 %v7252_v57  ;;  %v7306_v35 = vld [vmem:[#allocation188_spill] sm:$0xff]  ;;  %v7309_v32 = vld [vmem:[#allocation154_spill] sm:$0xff] }
 0x7a6   :  { %3106 = vmatpush.msra.mxu1 %v7253_v59  ;;  %3126 = vmatpush.msrb.mxu2 %v7254_v44  ;;  %v7307_v18 = vld [vmem:[#allocation220_spill] sm:$0xff]  ;;  %v7310_v57 = vld [vmem:[#allocation186_spill] sm:$0xff] }
 0x7a7   :  { %3146 = vmatpush.msra.mxu3 %v7255_v41  ;;  %3166 = vmatpush.msra.mxu0 %v7256_v43  ;;  %v7308_v40 = vld [vmem:[#allocation252_spill] sm:$0xff]  ;;  %v7311_v59 = vld [vmem:[#allocation218_spill] sm:$0xff] }
 0x7a8   :  { %3107 = vmatpush.msra.mxu1 %v7257_v29  ;;  %3127 = vmatpush.msrb.mxu2 %v7258_v30  ;;  %v7312_v44 = vld [vmem:[#allocation250_spill] sm:$0xff]  ;;  %v7313_v41 = vld [vmem:[#allocation312_spill] sm:$0xff] }
 0x7a9   :  { %3147 = vmatpush.msra.mxu3 %v7259_v49  ;;  %3167 = vmatpush.msra.mxu0 %v7260_v62  ;;  %v7314_v43 = vld [vmem:[#allocation344_spill] sm:$0xff]  ;;  %v7315_v29 = vld [vmem:[#allocation310_spill] sm:$0xff] }
 0x7aa   :  { %3108 = vmatpush.msra.mxu1 %v7261_v39  ;;  %3128 = vmatpush.msrb.mxu2 %v7262_v33  ;;  %v7316_v30 = vld [vmem:[#allocation342_spill] sm:$0xff]  ;;  %v7317_v49 = vld [vmem:[#allocation308_spill] sm:$0xff] }
 0x7ab   :  { %3148 = vmatpush.msra.mxu3 %v7263_v34  ;;  %3168 = vmatpush.msra.mxu0 %v7264_v46  ;;  %v7318_v62 = vld [vmem:[#allocation340_spill] sm:$0xff]  ;;  %v7319_v39 = vld [vmem:[#allocation306_spill] sm:$0xff] }
 0x7ac   :  { %3109 = vmatpush.msra.mxu1 %v7265_v63  ;;  %3129 = vmatpush.msrb.mxu2 %v7266_v36  ;;  %v7324_v33 = vld [vmem:[#allocation334_spill] sm:$0xff]  ;;  %v7325_v34 = vld [vmem:[#allocation300_spill] sm:$0xff] }
 0x7ad   :  { %3149 = vmatpush.msra.mxu3 %v7267_v54  ;;  %3169 = vmatpush.msra.mxu0 %v7268_v50  ;;  %v7326_v46 = vld [vmem:[#allocation332_spill] sm:$0xff]  ;;  %v7327_v63 = vld [vmem:[#allocation298_spill] sm:$0xff] }
 0x7ae   :  { %3110 = vmatpush.msra.mxu1 %v7269_v47  ;;  %3130 = vmatpush.msrb.mxu2 %v7270_v60  ;;  %v7328_v36 = vld [vmem:[#allocation330_spill] sm:$0xff]  ;;  %v7329_v54 = vld [vmem:[#allocation296_spill] sm:$0xff] }
 0x7af   :  { %3150 = vmatpush.msra.mxu3 %v7271_v52  ;;  %3170 = vmatpush.msra.mxu0 %v7272_v37  ;;  %v7330_v50 = vld [vmem:[#allocation328_spill] sm:$0xff]  ;;  %v7331_v47 = vld [vmem:[#allocation294_spill] sm:$0xff] }
 0x7b0   :  { %3111 = vmatpush.msra.mxu1 %v7273_v38  ;;  %3131 = vmatpush.msrb.mxu2 %v7274_v15  ;;  %v7332_v60 = vld [vmem:[#allocation326_spill] sm:$0xff]  ;;  %v7333_v52 = vld [vmem:[#allocation292_spill] sm:$0xff] }
 0x7b1   :  { %3151 = vmatpush.msra.mxu3 %v7275_v14  ;;  %3171 = vmatpush.msra.mxu0 %v7276_v10  ;;  %v7334_v37 = vld [vmem:[#allocation324_spill] sm:$0xff]  ;;  %v7335_v38 = vld [vmem:[#allocation290_spill] sm:$0xff] }
 0x7b2   :  { %3112 = vmatpush.msra.mxu1 %v7277_v8  ;;  %3132 = vmatpush.msrb.mxu2 %v7278_v5  ;;  %v7336_v15 = vld [vmem:[#allocation322_spill] sm:$0xff]  ;;  %v7337_v14 = vld [vmem:[#allocation288_spill] sm:$0xff] }
 0x7b3   :  { %3152 = vmatpush.msra.mxu3 %v7279_v3  ;;  %3172 = vmatpush.msra.mxu0 %v7280_v2  ;;  %v7338_v10 = vld [vmem:[#allocation320_spill] sm:$0xff]  ;;  %v7339_v8 = vld [vmem:[#allocation286_spill] sm:$0xff] }
 0x7b4   :  { %3113 = vmatpush.msra.mxu1 %v7281_v4  ;;  %3133 = vmatpush.msrb.mxu2 %v7282_v1  ;;  %v7340_v5 = vld [vmem:[#allocation318_spill] sm:$0xff]  ;;  %v7341_v3 = vld [vmem:[#allocation284_spill] sm:$0xff] }
 0x7b5   :  { %3153 = vmatpush.msra.mxu3 %v7283_v6  ;;  %3173 = vmatpush.msra.mxu0 %v7284_v0  ;;  %v7342_v2 = vld [vmem:[#allocation316_spill] sm:$0xff]  ;;  %v7343_v4 = vld [vmem:[#allocation282_spill] sm:$0xff] }
 0x7b6   :  { %3114 = vmatpush.msra.mxu1 %v7285_v7  ;;  %3134 = vmatpush.msrb.mxu2 %v7286_v9  ;;  %v7344_v1 = vld [vmem:[#allocation314_spill] sm:$0xff] }
 0x7b7   :  { %3154 = vmatpush.msra.mxu3 %v7287_v11  ;;  %3174 = vmatpush.msra.mxu0 %v7288_v13 }
 0x7b8   :  { %3115 = vmatpush.msra.mxu1 %v7289_v21  ;;  %3135 = vmatpush.msrb.mxu2 %v7290_v22 }
 0x7b9   :  { %3155 = vmatpush.msra.mxu3 %v7291_v23  ;;  %3175 = vmatpush.msra.mxu0 %v7292_v24 }
 0x7ba   :  { %3116 = vmatpush.msra.mxu1 %v7293_v25  ;;  %3136 = vmatpush.msrb.mxu2 %v7294_v26 }
 0x7bb   :  { %3156 = vmatpush.msra.mxu3 %v7295_v27  ;;  %3176 = vmatpush.msra.mxu0 %v7296_v28 }
 0x7bc   :  { %3117 = vmatpush.msra.mxu1 %v7297_v31  ;;  %3137 = vmatpush.msrb.mxu2 %v7298_v20 }
 0x7bd   :  { %3157 = vmatpush.msra.mxu3 %v7299_v53  ;;  %3177 = vmatpush.msra.mxu0 %v7300_v16 }
 0x7be   :  { %3118 = vmatpush.msra.mxu1 %v7301_v45  ;;  %3138 = vmatpush.msrb.mxu2 %v7302_v17 }
 0x7bf   :  { %3158 = vmatpush.msra.mxu3 %v7303_v51  ;;  %3178 = vmatpush.msra.mxu0 %v7304_v19 }
 0x7c0   :  { %3119 = vmatpush.msra.mxu1 %v7305_v61  ;;  %3139 = vmatpush.msrb.mxu2 %v7306_v35 }
 0x7c1   :  { %3159 = vmatpush.msra.mxu3 %v7307_v18  ;;  %3179 = vmatpush.msra.mxu0 %v7308_v40 }
 0x7c2   :  { %3120 = vmatpush.msra.mxu1 %v7309_v32  ;;  %3140 = vmatpush.msrb.mxu2 %v7310_v57 }
 0x7c3   :  { %3160 = vmatpush.msra.mxu3 %v7311_v59  ;;  %3180 = vmatpush.msra.mxu0 %v7312_v44 }
 0x7c4   :  { %3121 = vmatmul.f32.vlgmr.msra.gmra.mxu1 %v6463_v55  ;;  %3141 = vmatmul.f32.vlgmr.msrb.gmra.mxu2 %v6492_v42  ;;  %v7320_v55 = vld [vmem:[#allocation338_spill] sm:$0xff]  ;;  %v7321_v42 = vld [vmem:[#allocation304_spill] sm:$0xff] }
 0x7c5   :  { %3161 = vmatmul.f32.vlgmr.msra.gmra.mxu3 %v6480_v58  ;;  %3181 = vmatmul.f32.vlgmr.msra.gmra.mxu0 %v6484_v56  ;;  %v7322_v58 = vld [vmem:[#allocation336_spill] sm:$0xff]  ;;  %v7323_v56 = vld [vmem:[#allocation302_spill] sm:$0xff] }
 0x7c6   :  { %3185 = vmatpush.msrb.mxu1 %v7313_v41  ;;  %3205 = vmatpush.msra.mxu2 %v7314_v43 }
 0x7c8   :  { %3186 = vmatpush.msrb.mxu1 %v7315_v29  ;;  %3206 = vmatpush.msra.mxu2 %v7316_v30 }
 0x7ca   :  { %3187 = vmatpush.msrb.mxu1 %v7317_v49  ;;  %3207 = vmatpush.msra.mxu2 %v7318_v62 }
 0x7cc   :  { %3188 = vmatpush.msrb.mxu1 %v7319_v39  ;;  %3208 = vmatpush.msra.mxu2 %v7320_v55 }
 0x7ce   :  { %3189 = vmatpush.msrb.mxu1 %v7321_v42  ;;  %3209 = vmatpush.msra.mxu2 %v7322_v58 }
 0x7d0   :  { %3190 = vmatpush.msrb.mxu1 %v7323_v56  ;;  %3210 = vmatpush.msra.mxu2 %v7324_v33 }
 0x7d2   :  { %3191 = vmatpush.msrb.mxu1 %v7325_v34  ;;  %3211 = vmatpush.msra.mxu2 %v7326_v46 }
 0x7d4   :  { %3192 = vmatpush.msrb.mxu1 %v7327_v63  ;;  %3212 = vmatpush.msra.mxu2 %v7328_v36 }
 0x7d6   :  { %3193 = vmatpush.msrb.mxu1 %v7329_v54  ;;  %3213 = vmatpush.msra.mxu2 %v7330_v50 }
 0x7d8   :  { %3194 = vmatpush.msrb.mxu1 %v7331_v47  ;;  %3214 = vmatpush.msra.mxu2 %v7332_v60 }
 0x7da   :  { %3195 = vmatpush.msrb.mxu1 %v7333_v52  ;;  %3215 = vmatpush.msra.mxu2 %v7334_v37 }
 0x7dc   :  { %3196 = vmatpush.msrb.mxu1 %v7335_v38  ;;  %3216 = vmatpush.msra.mxu2 %v7336_v15 }
 0x7de   :  { %3197 = vmatpush.msrb.mxu1 %v7337_v14  ;;  %3217 = vmatpush.msra.mxu2 %v7338_v10 }
 0x7e0   :  { %3198 = vmatpush.msrb.mxu1 %v7339_v8  ;;  %3218 = vmatpush.msra.mxu2 %v7340_v5 }
 0x7e2   :  { %3199 = vmatpush.msrb.mxu1 %v7341_v3  ;;  %3219 = vmatpush.msra.mxu2 %v7342_v2 }
 0x7e4   :  { %3200 = vmatpush.msrb.mxu1 %v7343_v4  ;;  %3220 = vmatpush.msra.mxu2 %v7344_v1 }
 0x7e5   :  { %3201 = vmatmul.f32.vlgmr.msrb.gmra.mxu1 %v6508_v12  ;;  %3221 = vmatmul.f32.vlgmr.msra.gmra.mxu2 %v6538_v48  ;;  %v3574_v12 = vmov 2.0  }
 0x7e6   :  { %3558 = vrcp.f32 %v3574_v12 }
 0x7ec   :  { %v3559_v45 = vpop.eup %3558 }
 0x7ed   :  { %v3242_v51 = vmul.f32 2.0, %v3559_v45  ;;  %vm3246_vm6 = vweird.f32 %v3559_v45 }
 0x7ef   :  { %v3243_v61 = vsub.f32 1.0, %v3242_v51 }
 0x7f1   :  { %v3244_v18 = vmul.f32 %v3559_v45, %v3243_v61 }
 0x7f3   :  { %v3245_v32 = vadd.f32 %v3559_v45, %v3244_v18 }
 0x7f5   :  { %v3247_v59 = vsel %vm3246_vm6, %v3559_v45, %v3245_v32 }
 0x7fb   :  { %v2882_v0 = vpop.f32.mrf.mxu1 }
 0x7fd   :  { %v2942_v13 = vpop.f32.mrf.mxu0 }
 0x801   :  { %v2902_v6 = vpop.f32.mrf.mxu2 }
 0x802   :  { %v2903_v7 = vadd.f32 %v2902_v6, %v2882_v0  ;;  %v2922_v9 = vpop.f32.mrf.mxu3 }
 0x804   :  { %v2923_v11 = vadd.f32 %v2922_v9, %v2903_v7 }
 0x806   :  { %v2943_v21 = vadd.f32 %v2942_v13, %v2923_v11 }
 0x80a   :  { %v2962_v22 = vpop.f32.mrf.mxu1 }
 0x80b   :  { %v2963_v23 = vadd.f32 %v2962_v22, %v2943_v21  ;;  %v2982_v24 = vpop.f32.mrf.mxu2 }
 0x80d   :  { %v2983_v25 = vadd.f32 %v2982_v24, %v2963_v23  ;;  %v3002_v26 = vpop.f32.mrf.mxu3 }
 0x80f   :  { %v3003_v27 = vadd.f32 %v3002_v26, %v2983_v25 }
 0x811   :  { %v3022_v28 = vpop.f32.mrf.mxu0 }
 0x812   :  { %v3023_v20 = vadd.f32 %v3022_v28, %v3003_v27 }
 0x81f   :  { %v3042_v31 = vpop.f32.mrf.mxu1 }
 0x820   :  { %v3043_v53 = vadd.f32 %v3042_v31, %v3023_v20  ;;  %v3102_v62 = vpop.f32.mrf.mxu0 }
 0x822   :  { %v3227_v48 = vsel %vm3226_vm5, %v3043_v53, 0.0 }
 0x823   :  { %v3228_v16 = vrot.slane %v3227_v48, 4 }
 0x825   :  { %v3229_v17 = vadd.f32 %v3228_v16, %v3227_v48  ;;  %v3062_v43 = vpop.f32.mrf.mxu2 }
 0x826   :  { %v3082_v29 = vpop.f32.mrf.mxu3 }
 0x827   :  { %v3230_v19 = vrot.slane %v3229_v17, 2  ;;  %v3083_v30 = vadd.f32 %v3082_v29, %v3062_v43 }
 0x829   :  { %v3231_v35 = vadd.f32 %v3230_v19, %v3229_v17  ;;  %v3103_v55 = vadd.f32 %v3102_v62, %v3083_v30  ;;  %v3225_v17 = vld [vmem:[%s6677_s11] sm:$0xf] }
 0x82a   :  { %v3296_v32 = vperm.slane %v3225_v17, 2  ;;  %v3303_v43 = vperm.slane %v3225_v17, 1  ;;  %v3304_v29 = vperm.slane %v3225_v17, 3 }
 0x82b   :  { %v3232_v40 = vrot.slane %v3231_v35, 1 }
 0x82d   :  { %v3233_v57 = vadd.f32 %v3232_v40, %v3231_v35  ;;  %v3295_v35 = vperm.slane %v3225_v17, 0 }
 0x82f   :  { %v3248_v44 = vmul.f32 %v3247_v59, %v3233_v57 }
 0x831   :  { %v6651_v41 = vsub.f32 %v3043_v53, %v3248_v44  ;;  %v3299_v44 = vperm.slane %v3295_v35, 0 }
 0x833   :  { %v3252_v49 = vmul.f32 %v6651_v41, %v6651_v41 }
 0x835   :  { %v3254_v42 = vsel %vm3226_vm5, %v3252_v49, 0.0  ;;  %v3300_v49 = vperm.slane %v3296_v32, 0 }
 0x836   :  { %v3255_v33 = vrot.slane %v3254_v42, 4 }
 0x838   :  { %v3256_v63 = vadd.f32 %v3255_v33, %v3254_v42 }
 0x83a   :  { %v3257_v47 = vrot.slane %v3256_v63, 2 }
 0x83c   :  { %v3258_v38 = vadd.f32 %v3257_v47, %v3256_v63 }
 0x83e   :  { %v3259_v8 = vrot.slane %v3258_v38, 1 }
 0x840   :  { %v3260_v2 = vadd.f32 %v3259_v8, %v3258_v38 }
 0x841   :  { %v3122_v39 = vpop.f32.mrf.mxu1 }
 0x842   :  { %v3123_v56 = vadd.f32 %v3122_v39, %v3103_v55  ;;  %v3182_v54 = vpop.f32.mrf.mxu0  ;;  %v3268_v6 = vmul.f32 %v3260_v2, %v3247_v59  ;;  %v3307_v55 = vperm.slane %v3303_v43, 1 }
 0x844   :  { %v3270_v9 = vadd.f32 1e-05, %v3268_v6 }
 0x846   :  { %3560 = vrsqrt.f32 %v3270_v9  ;;  %vm3278_vm8 = vweird.f32 %v3270_v9 }
 0x847   :  { %v3142_v58 = vpop.f32.mrf.mxu2 }
 0x848   :  { %v3143_v34 = vadd.f32 %v3142_v58, %v3123_v56  ;;  %v3162_v46 = vpop.f32.mrf.mxu3  ;;  %v3308_v58 = vperm.slane %v3304_v29, 1 }
 0x84a   :  { %v3163_v36 = vadd.f32 %v3162_v46, %v3143_v34 }
 0x84c   :  { %v3183_v60 = vadd.f32 %v3182_v54, %v3163_v36  ;;  %v3561_v24 = vpop.eup %3560 }
 0x84d   :  { %v3273_v27 = vmul.f32 %v3561_v24, %v3270_v9  ;;  %vm3279_vm7 = vweird.f32 %v3561_v24 }
 0x84e   :  { %vm3280_vm9 = vmor %vm3278_vm8, %vm3279_vm7 }
 0x84f   :  { %v3274_v20 = vmul.f32 %v3561_v24, %v3273_v27 }
 0x851   :  { %v3275_v48 = vmul.f32 0.5, %v3274_v20 }
 0x853   :  { %v3276_v16 = vsub.f32 1.5, %v3275_v48 }
 0x855   :  { %v3277_v51 = vmul.f32 %v3561_v24, %v3276_v16 }
 0x857   :  { %v3281_v18 = vsel %vm3280_vm9, %v3561_v24, %v3277_v51 }
 0x862   :  { %v3202_v50 = vpop.f32.mrf.mxu1 }
 0x863   :  { %v3203_v52 = vadd.f32 %v3202_v50, %v3183_v60 }
 0x868   :  { %v3222_v37 = vpop.f32.mrf.mxu2 }
 0x869   :  { %v3223_v15 = vadd.f32 %v3222_v37, %v3203_v52 }
 0x86b   :  { %v3234_v14 = vsel %vm3226_vm5, %v3223_v15, 0.0 }
 0x86c   :  { %v3235_v10 = vrot.slane %v3234_v14, 4 }
 0x86e   :  { %v3236_v5 = vadd.f32 %v3235_v10, %v3234_v14 }
 0x870   :  { %v3237_v3 = vrot.slane %v3236_v5, 2 }
 0x872   :  { %v3238_v4 = vadd.f32 %v3237_v3, %v3236_v5 }
 0x874   :  { %v3239_v1 = vrot.slane %v3238_v4, 1 }
 0x876   :  { %v3240_v0 = vadd.f32 %v3239_v1, %v3238_v4 }
 0x878   :  { %v3249_v7 = vmul.f32 %v3247_v59, %v3240_v0 }
 0x87a   :  { %v3251_v11 = vsub.f32 %v3223_v15, %v3249_v7 }
 0x87c   :  { %v3253_v13 = vmul.f32 %v3251_v11, %v3251_v11 }
 0x87e   :  { %v3261_v21 = vsel %vm3226_vm5, %v3253_v13, 0.0 }
 0x87f   :  { %v3262_v22 = vrot.slane %v3261_v21, 4 }
 0x881   :  { %v3263_v23 = vadd.f32 %v3262_v22, %v3261_v21 }
 0x883   :  { %v3264_v25 = vrot.slane %v3263_v23, 2 }
 0x885   :  { %v3265_v26 = vadd.f32 %v3264_v25, %v3263_v23 }
 0x887   :  { %v3266_v28 = vrot.slane %v3265_v26, 1 }
 0x889   :  { %v3267_v31 = vadd.f32 %v3266_v28, %v3265_v26 }
 0x88b   :  { %v3269_v53 = vmul.f32 %v3267_v31, %v3247_v59  ;;  %v3292_v59 = vmul.f32 %v3281_v18, %v6651_v41 }
 0x88d   :  { %v3271_v12 = vadd.f32 1e-05, %v3269_v53  ;;  %v3301_v39 = vmul.f32 %v3299_v44, %v3292_v59 }
 0x88f   :  { %3562 = vrsqrt.f32 %v3271_v12  ;;  %vm3288_vm11 = vweird.f32 %v3271_v12  ;;  %v3309_v33 = vadd.f32 %v3307_v55, %v3301_v39 }
 0x891   :  { %v3311_v63 = vmax.f32 %v3309_v33, 0.0 }
 0x895   :  { %v3563_v45 = vpop.eup %3562 }
 0x896   :  { %v3283_v19 = vmul.f32 %v3563_v45, %v3271_v12  ;;  %vm3289_vm10 = vweird.f32 %v3563_v45 }
 0x897   :  { %vm3290_vm12 = vmor %vm3288_vm11, %vm3289_vm10 }
 0x898   :  { %v3284_v61 = vmul.f32 %v3563_v45, %v3283_v19 }
 0x89a   :  { %v3285_v40 = vmul.f32 0.5, %v3284_v61 }
 0x89c   :  { %v3286_v57 = vsub.f32 1.5, %v3285_v40 }
 0x89e   :  { %v3287_v30 = vmul.f32 %v3563_v45, %v3286_v57 }
 0x8a0   :  { %v3291_v62 = vsel %vm3290_vm12, %v3563_v45, %v3287_v30 }
 0x8a1   :  { %v3293_v42 = vmul.f32 %v3291_v62, %v3251_v11 }
 0x8a3   :  { %v3302_v56 = vmul.f32 %v3300_v49, %v3293_v42 }
 0x8a5   :  { %v3310_v34 = vadd.f32 %v3308_v58, %v3302_v56 }
 0x8a7   :  { %v3312_v46 = vmax.f32 %v3310_v34, 0.0 }
 0x8a9   :  { %v3315_v36 = vrot.slane %v3312_v46, 6 }
 0x8ab   :  { %v3316_v41 = vsel %vm3226_vm5, %v3311_v63, %v3315_v36 }
 0x8ac   :  { %3318 = vst [vmem:[%s6678_s12] sm:$0xf] %v3316_v41 }
 0x8ad   :  { %3323 = vsyncmov [#allocation7] }
 0x8b0   :  { %s3324_s25 = vpop.sfrf %3323 }
 0x8b1   :  { %p3432_p0 = scmp.ne.s32.totalorder %s3324_s25, 0 }
 0x8b3   :  { %3328 = shalt.err (%p3432_p0)  }
 0x8b4   :  { %3330 = vsyncmov [#allocation7 + $0x1] }
 0x8b7   :  { %s3331_s8 = vpop.sfrf %3330 }
 0x8b8   :  { %p3433_p1 = scmp.ne.s32.totalorder %s3331_s8, 0 }
 0x8ba   :  { %3335 = shalt.err (%p3433_p1)  }

</bundles_post_ra>
